<compile_context>
chip_gen: v7x
topology: tpu7x:2x2x1
jax: 0.10.0
libtpu: 0.0.40
codegen_flags: <defaults>
</compile_context>

<pallas_src>
import functools

import jax
import jax.numpy as jnp
from jax.experimental import pallas as pl
from jax.experimental.pallas import tpu as pltpu


def _round_up(x, m):
    return (x + m - 1) // m * m


def choose_tiles(n, *, tm=512, tk=1024):
    """Pick row / contraction tile sizes for an N-node graph.

    tm (row tile, second-minor) is a multiple of 8 and is shrunk until there
    are at least two row tiles so the 'parallel' row axis can be sharded
    across both v7x TensorCores.  tk (contraction tile, minor) is a multiple
    of 128.
    """
    tm = min(tm, _round_up(n, 8))
    tm = max(8, (tm // 8) * 8)
    while tm > 8 and _round_up(n, tm) // tm < 2:
        tm = max(8, ((tm // 2) // 8) * 8)
    tk = min(tk, _round_up(n, 128))
    tk = max(128, (tk // 128) * 128)
    return tm, tk


def prepare_adjacency(adjacency, tm, tk, dtype=jnp.bfloat16):
    """One-time cast (and zero-pad, only if needed) of the adjacency.

    The adjacency is constant across GCN layers / training steps, so this
    O(N^2) cast must NOT be paid per forward call — prepare once, reuse.
    """
    n = adjacency.shape[0]
    n_rows = _round_up(n, tm)
    n_k = _round_up(n, tk)
    adj = adjacency.astype(dtype)
    if (n_rows, n_k) != (n, n):
        adj = jnp.zeros((n_rows, n_k), dtype).at[:n, :n].set(adj)
    return adj


# ---------------------------------------------------------------------------
# Aggregate kernel: out = A @ support + bias
#   grid = (row tiles, k tiles); f32 output block is the resident accumulator.
#   support is fully VMEM-resident (constant index map) and sliced per k.
# ---------------------------------------------------------------------------
def _aggregate_kernel(adj_ref, sup_ref, b_ref, out_ref, *, tk):
    k = pl.program_id(1)

    @pl.when(k == 0)
    def _():
        out_ref[...] = jnp.zeros_like(out_ref)

    start = pl.multiple_of(k * tk, tk)
    out_ref[...] += jnp.dot(
        adj_ref[...],
        sup_ref[pl.ds(start, tk), :],
        preferred_element_type=jnp.float32,
    )

    @pl.when(k == pl.num_programs(1) - 1)
    def _():
        out_ref[...] += b_ref[...]


# ---------------------------------------------------------------------------
# Wrapper
# ---------------------------------------------------------------------------
def graph_convolution(adjacency, features, weight, bias=None, *,
                      tm=512, tk=1024, compute_dtype=jnp.bfloat16):
    """Dense GCN layer: adjacency @ (features @ weight) + bias.

    `adjacency` should normally be the output of prepare_adjacency(adj, tm, tk)
    so the bf16 cast / padding of the (large, constant) adjacency is amortized
    across calls; a raw (N, N) adjacency is accepted and prepared on the fly.
    """
    n, f_in = features.shape
    assert weight.shape[0] == f_in
    f_out = weight.shape[1]

    cd = compute_dtype
    cd_bytes = jnp.dtype(cd).itemsize

    n_rows = _round_up(n, tm)              # padded output / adjacency rows
    n_k = _round_up(n, tk)                 # padded contraction dim
    # NOTE: on v6e/v7x a 256-multiple f_out tile would fill the 256-wide MXU,
    # but at these shapes the kernel is HBM-bound so 128 alignment suffices.
    f_out_p = _round_up(f_out, 128)

    # ---- adjacency: prepared bf16 (cast/pad done ONCE outside, ideally) ----
    if adjacency.shape != (n_rows, n_k) or adjacency.dtype != cd:
        # Fallback path; costs an extra O(N^2) HBM pass per call.
        adjacency = prepare_adjacency(adjacency, tm, tk, cd)

    # ---- support = X @ W: tiny (<1% of FLOPs) -> plain f32 dot, one bf16 cast
    support = jnp.dot(features.astype(jnp.float32), weight.astype(jnp.float32),
                      preferred_element_type=jnp.float32).astype(cd)
    if (n_k, f_out_p) != (n, f_out):
        support = jnp.zeros((n_k, f_out_p), cd).at[:n, :f_out].set(support)

    # ---- bias (f32, broadcast row) -----------------------------------------
    if bias is None:
        b_p = jnp.zeros((1, f_out_p), jnp.float32)
    else:
        b_row = bias.astype(jnp.float32).reshape(1, f_out)
        if f_out_p == f_out:
            b_p = b_row
        else:
            b_p = jnp.zeros((1, f_out_p), jnp.float32).at[:, :f_out].set(b_row)

    kernel = functools.partial(_aggregate_kernel, tk=tk)

    out_p = pl.pallas_call(
        kernel,
        out_shape=jax.ShapeDtypeStruct((n_rows, f_out_p), jnp.float32),
        grid_spec=pltpu.PrefetchScalarGridSpec(
            num_scalar_prefetch=0,
            grid=(n_rows // tm, n_k // tk),
            in_specs=[
                # adjacency tile, streamed once overall
                pl.BlockSpec((tm, tk), lambda i, k: (i, k)),
                # support: fully resident in VMEM, fetched from HBM once
                pl.BlockSpec((n_k, f_out_p), lambda i, k: (0, 0)),
                # bias row, resident
                pl.BlockSpec((1, f_out_p), lambda i, k: (0, 0)),
            ],
            # output block index constant across k -> resident f32 accumulator
            out_specs=pl.BlockSpec((tm, f_out_p), lambda i, k: (i, 0)),
        ),
        compiler_params=pltpu.CompilerParams(
            dimension_semantics=("parallel", "arbitrary"),
            # Above v5e's 16 MiB / v6e+v7x's 32 MiB scoped defaults, within
            # v7x's 64 MiB physical VMEM.
            vmem_limit_bytes=48 * 1024 * 1024,
        ),
        cost_estimate=pl.CostEstimate(
            flops=2 * n_rows * n_k * f_out_p,
            transcendentals=0,
            bytes_accessed=(n_rows * n_k * cd_bytes        # adjacency (once)
                            + n_k * f_out_p * cd_bytes     # resident support
                            + f_out_p * 4                  # bias
                            + n_rows * f_out_p * 4)),      # f32 output
    )(adjacency, support, b_p)

    if n_rows == n and f_out_p == f_out:
        return out_p
    return out_p[:n, :f_out]


def kaiming_uniform(key, fan_in, shape, dtype=jnp.float32):
    # torch.nn.init.kaiming_uniform_ default: a=0, fan_in mode, gain=sqrt(2)
    bound = jnp.sqrt(6.0 / fan_in)
    return jax.random.uniform(key, shape, dtype=dtype, minval=-bound, maxval=bound)


if __name__ == "__main__":
    key = jax.random.PRNGKey(0)
    k_adj, k_x, k_w, k_b = jax.random.split(key, 4)

    N = 2048         # graph nodes (4 row tiles x 2 k tiles with default tiles)
    F_IN = 64        # input feature dim
    F_OUT = 128      # output feature dim

    # Dense degree-normalized adjacency standing in for the sparse tensor.
    adjacency = (jax.random.uniform(k_adj, (N, N)) < 0.1).astype(jnp.float32)
    adjacency = adjacency + jnp.eye(N, dtype=jnp.float32)
    deg = jnp.sum(adjacency, axis=1, keepdims=True)
    adjacency = adjacency / deg

    features = jax.random.normal(k_x, (N, F_IN), dtype=jnp.float32)

    # Parameters (weight init mirrors reset_parameters(); nonzero bias so the
    # bias-add path is actually exercised numerically).
    weight = kaiming_uniform(k_w, F_IN, (F_IN, F_OUT))
    bias = 0.1 * jax.random.normal(k_b, (F_OUT,), dtype=jnp.float32)

    # One-time adjacency prep (amortized across layers / steps in a real GCN).
    tm, tk = choose_tiles(N)
    adj_prepared = prepare_adjacency(adjacency, tm, tk)

    gcn_forward = jax.jit(
        lambda a, x, w, b: graph_convolution(a, x, w, b, tm=tm, tk=tk))

    out = gcn_forward(adj_prepared, features, weight, bias)
    out = jax.block_until_ready(out)
    assert out.shape == (N, F_OUT)
    assert out.dtype == jnp.float32

    # Reference with the same bf16-rounded operands (f32 accumulation) -> tight.
    adj_b = adjacency.astype(jnp.bfloat16).astype(jnp.float32)
    sup_b = jnp.dot(features, weight,
                    preferred_element_type=jnp.float32
                    ).astype(jnp.bfloat16).astype(jnp.float32)
    ref_b = adj_b @ sup_b + bias
    assert jnp.allclose(out, ref_b, atol=1e-2, rtol=1e-2), (
        float(jnp.max(jnp.abs(out - ref_b))))

    # Loose sanity check against the pure-f32 reference (bf16 input rounding).
    ref_f32 = adjacency @ (features @ weight) + bias
    assert jnp.allclose(out, ref_f32, atol=5e-2, rtol=5e-2), (
        float(jnp.max(jnp.abs(out - ref_f32))))

    print("KERNEL_OK")
</pallas_src>

<mosaic_0001>
module attributes {stable_mosaic.version = 11 : i64} {
  func.func @_aggregate_kernel(%arg0: i32, %arg1: i32, %arg2: memref<512x1024xbf16, #tpu.memory_space<vmem>>, %arg3: memref<2048x128xbf16, #tpu.memory_space<vmem>>, %arg4: memref<1x128xf32, #tpu.memory_space<vmem>>, %arg5: memref<512x128xf32, #tpu.memory_space<vmem>>) attributes {dimension_semantics = [#tpu.dimension_semantics<parallel>, #tpu.dimension_semantics<arbitrary>], iteration_bounds = array<i64: 4, 2>, scalar_prefetch = 0 : i64, scratch_operands = 0 : i64, tpu.core_type = #tpu.core_type<tc>, window_params = [{transform_indices = @transform_0, window_bounds = array<i64: 512, 1024>}, {pipeline_mode = #tpu.pipeline_mode<synchronous>, transform_indices = @transform_1, window_bounds = array<i64: 2048, 128>}, {pipeline_mode = #tpu.pipeline_mode<synchronous>, transform_indices = @transform_2, window_bounds = array<i64: 1, 128>}, {transform_indices = @transform_3, window_bounds = array<i64: 512, 128>}]} {
    %c0_i32 = arith.constant 0 : i32
    %0 = arith.cmpi eq, %arg1, %c0_i32 : i32
    %1 = arith.extui %0 : i1 to i32
    %c0_i32_0 = arith.constant 0 : i32
    %2 = arith.cmpi ne, %1, %c0_i32_0 : i32
    scf.if %2 {
      %cst_8 = arith.constant 0.000000e+00 : f32
      %15 = vector.broadcast %cst_8 : f32 to vector<512x128xf32>
      %c0_9 = arith.constant 0 : index
      %c0_10 = arith.constant 0 : index
      %16 = vector.load %arg5[%c0_9, %c0_10] : memref<512x128xf32, #tpu.memory_space<vmem>>, vector<512x128xf32>
      tpu.vector_store %arg5[%c0_9, %c0_10], %15 {strides = array<i32>} : memref<512x128xf32, #tpu.memory_space<vmem>>, vector<512x128xf32>,
    } else {
    }
    %c1024_i32 = arith.constant 1024 : i32
    %3 = arith.muli %arg1, %c1024_i32 : i32
    %4 = tpu.assume_multiple %3, 1024 : i32
    %c0 = arith.constant 0 : index
    %c0_1 = arith.constant 0 : index
    %5 = vector.load %arg5[%c0, %c0_1] : memref<512x128xf32, #tpu.memory_space<vmem>>, vector<512x128xf32>
    %c0_2 = arith.constant 0 : index
    %c0_3 = arith.constant 0 : index
    %6 = vector.load %arg2[%c0_2, %c0_3] : memref<512x1024xbf16, #tpu.memory_space<vmem>>, vector<512x1024xbf16>
    %7 = arith.index_cast %4 : i32 to index
    %c0_4 = arith.constant 0 : index
    %8 = vector.load %arg3[%7, %c0_4] : memref<2048x128xbf16, #tpu.memory_space<vmem>>, vector<1024x128xbf16>
    %cst = arith.constant dense<0.000000e+00> : vector<512x128xf32>
    %9 = tpu.matmul %6, %8, %cst {dimension_numbers = #tpu.dot_dimension_numbers<[1], [0], [0], [1], [0, 0, 1, 1], [], []>} : vector<512x1024xbf16>, vector<1024x128xbf16>, vector<512x128xf32> -> vector<512x128xf32>
    %10 = arith.addf %5, %9 : vector<512x128xf32>
    %c0_5 = arith.constant 0 : index
    %c0_6 = arith.constant 0 : index
    %11 = vector.load %arg5[%c0_5, %c0_6] : memref<512x128xf32, #tpu.memory_space<vmem>>, vector<512x128xf32>
    tpu.vector_store %arg5[%c0_5, %c0_6], %10 {strides = array<i32>} : memref<512x128xf32, #tpu.memory_space<vmem>>, vector<512x128xf32>,
    %c1_i32 = arith.constant 1 : i32
    %12 = arith.cmpi eq, %arg1, %c1_i32 : i32
    %13 = arith.extui %12 : i1 to i32
    %c0_i32_7 = arith.constant 0 : i32
    %14 = arith.cmpi ne, %13, %c0_i32_7 : i32
    scf.if %14 {
      %c0_8 = arith.constant 0 : index
      %c0_9 = arith.constant 0 : index
      %15 = vector.load %arg5[%c0_8, %c0_9] : memref<512x128xf32, #tpu.memory_space<vmem>>, vector<512x128xf32>
      %c0_10 = arith.constant 0 : index
      %c0_11 = arith.constant 0 : index
      %16 = vector.load %arg4[%c0_10, %c0_11] : memref<1x128xf32, #tpu.memory_space<vmem>>, vector<1x128xf32>
      %17 = vector.broadcast %16 : vector<1x128xf32> to vector<512x128xf32>
      %18 = arith.addf %15, %17 : vector<512x128xf32>
      %c0_12 = arith.constant 0 : index
      %c0_13 = arith.constant 0 : index
      %19 = vector.load %arg5[%c0_12, %c0_13] : memref<512x128xf32, #tpu.memory_space<vmem>>, vector<512x128xf32>
      tpu.vector_store %arg5[%c0_12, %c0_13], %18 {strides = array<i32>} : memref<512x128xf32, #tpu.memory_space<vmem>>, vector<512x128xf32>,
    } else {
    }
    return
  }
  func.func @transform_0(%arg0: i32, %arg1: i32) -> (i32, i32) {
    %c0_i32 = arith.constant 0 : i32
    return %arg0, %arg1 : i32, i32
  }
  func.func @transform_1(%arg0: i32, %arg1: i32) -> (i32, i32) {
    %c0_i32 = arith.constant 0 : i32
    %c0_i32_0 = arith.constant 0 : i32
    %c0_i32_1 = arith.constant 0 : i32
    return %c0_i32, %c0_i32_0 : i32, i32
  }
  func.func @transform_2(%arg0: i32, %arg1: i32) -> (i32, i32) {
    %c0_i32 = arith.constant 0 : i32
    %c0_i32_0 = arith.constant 0 : i32
    %c0_i32_1 = arith.constant 0 : i32
    return %c0_i32, %c0_i32_0 : i32, i32
  }
  func.func @transform_3(%arg0: i32, %arg1: i32) -> (i32, i32) {
    %c0_i32 = arith.constant 0 : i32
    %c0_i32_0 = arith.constant 0 : i32
    return %arg0, %c0_i32 : i32, i32
  }
}

</mosaic_0001>

<bundles_post_ra>
// kernel: _lambda_.1
= control target key start
LH: loop header
LB: loop body
LE: loop exit
PB: predicated region body
PF: predicated region fallthrough
CT: control target
= control target key end

     0   :  { %s6083_s0 = inlined_call_operand.hbm [shape: bf16[2048,2048], index: 0, kind: input, shape index: {}]   ;;  %s6084_s1 = inlined_call_operand.vmem [shape: bf16[2048,128], index: 1, kind: input, shape index: {}]   ;;  %s6085_s2 = inlined_call_operand.hbm [shape: f32[1,128], index: 2, kind: input, shape index: {}]   ;;  %s6086_s3 = inlined_call_operand.hbm [shape: f32[2048,128], index: 3, kind: output, shape index: {}]  }
   0x1   :  { %6098 = sst [smem:[#allocation39_spill]] %s6085_s2 }
   0x2   :  { %8 = vsyncpa [#allocation3], 0 }
   0x3   :  { %10 = vsyncpa [#allocation3 + $0x1], 0 }
   0x4   :  { %11 = vsyncpa [#allocation6], 0 }
   0x5   :  { %12 = vsyncpa [#allocation4], 0 }
   0x6   :  { %14 = vsyncpa [#allocation4 + $0x1], 0  ;;  %s4754_s12 = smov 0   ;;  %s4756_s13 = smov 0  }
   0x7   :  { %s4758_s14 = smov 0   ;;  %s4760_s15 = smov 0  }
   0x8   :  { %s4762_s16 = smov 0   ;;  %s4764_s17 = smov 0  }
   0x9   :  { %s4766_s18 = smov 0   ;;  %s4768_s19 = smov 0  }
   0xa   :  { %s4770_s20 = smov 0   ;;  %s4772_s21 = smov 0  }
   0xb   :  { %s4774_s22 = smov 0  }
   0xc LB: > { %6099 = sst [smem:[#allocation11_spill]] %s4682_s12  ;;  %s4008_s23 = sadd.s32 4294967295, %s4722_s22   ;;  %s4722_s22 = sphi %s4774_s22, %s20_s22   ;;  %s4718_s21 = sphi %s4772_s21, %s6179_s21   ;;  %s4714_s20 = sphi %s4770_s20, %s6170_s20   ;;  %s4710_s19 = sphi %s4768_s19, %s6178_s19   ;;  %s4706_s18 = sphi %s4766_s18, %s6169_s18   ;;  %s4702_s17 = sphi %s4764_s17, %s6177_s17   ;;  %s4698_s16 = sphi %s4762_s16, %s6176_s16   ;;  %s4694_s15 = sphi %s4760_s15, %s6175_s15   ;;  %s4690_s14 = sphi %s4758_s14, %s6174_s14   ;;  %s4686_s13 = sphi %s4756_s13, %s6173_s13   ;;  %s4682_s12 = sphi %s4754_s12, %s6172_s12  }
   0xd   : > { %6100 = sst [smem:[#allocation12_spill]] %s4714_s20  ;;  %s4009_s24 = sadd.s32 4294967294, %s4722_s22  }
   0xe   : > { %p48_p0 = scmp.ne.s32.totalorder %s4702_s17, %s4698_s16  ;;  %p49_p1 = scmp.eq.s32.totalorder %s4722_s22, 0 }
   0xf   : > { %p54_p2 = scmp.ne.s32.totalorder %s4698_s16, %s4694_s15  ;;  %p4814_p3 = scmp.eq.s32.totalorder %s4008_s23, 0 }
  0x10   : > { %p4819_p4 = por %p49_p1, %p48_p0  ;;  %p119_p5 = scmp.ne.s32.totalorder %s4690_s14, %s4686_s13 }
  0x11   : > { %s6101_s26 = scalar_select %p4814_p3, 1, 0 }
  0x12   : > { %p4827_p6 = por %p4814_p3, %p54_p2  ;;  %p120_p7 = scmp.eq.s32.totalorder %s4008_s23, 7 }
  0x13   : > { %p125_p8 = scmp.ne.s32.totalorder %s4686_s13, %s4682_s12  ;;  %p126_p9 = scmp.eq.s32.totalorder %s4009_s24, 7 }
  0x14   : > { %s6103_s29 = scalar_select %p4827_p6, 1, 0 }
  0x15   : > { %p4833_p10 = por %p120_p7, %p119_p5  ;;  %p4010_p11 = scmp.ge.s32.totalorder %s4722_s22, 1 }
  0x16   : > { %p4838_p12 = por %p126_p9, %p125_p8  ;;  %p133_p13 = scmp.lt.s32.totalorder %s4722_s22, 9 }
  0x17   : > { %s6104_s30 = scalar_select %p4833_p10, 1, 0 }
  0x18   : > { %s6105_s4 = scalar_select %p4838_p12, 1, 0 }
  0x19   : > { %p4843_p0 = pnand %p4010_p11, %p133_p13  ;;  %s4724_s6 = smov [#allocation5]  }
  0x1a   : > { %6106 = sst [smem:[#allocation13_spill]] %s6105_s4  ;;  %s149_s7 = sshll.u32 %s4724_s6, 4  ;;  %s150_s7 = int_to_ptr.vmem [resolvable:$true] %s149_s7 }
  0x1b   : > { %s6107_s5 = scalar_select %p4843_p0, 1, 0 }
  0x1c   : > { %p4362_p1 = pneg %p4843_p0  ;;  %p4375_p2 = scmp.lt.s32.totalorder %s4722_s22, 8 }
  0x1d   : > { %s6110_s2 = sld [smem:[#allocation39_spill]] }
  0x1e   : > { %p4852_p5 = pnand %p4362_p1, %p4814_p3  ;;  %p4858_p7 = pnand %p4375_p2, %p4819_p4 }
  0x20   : > { %s6109_s9 = scalar_select %p4858_p7, 1, 0 }
  0x21   : > { %p4540_p9 = pneg %p4852_p5 }
  0x23   : > { %s4538_s15 = scalar_lea.hbm %s6110_s2, 16 }
  0x24   : > { %p4539_p8 = scmp.ne.s32.totalorder %s6110_s2, %s4538_s15  ;;  %p4545_p1 = scmp.lt.u32.totalorder %s4538_s15, %s6110_s2 }
  0x26   : > { %p4541_p11 = pnand %p4540_p9, %p4539_p8 }
  0x28   : > { %p4542_p13 = pneg %p4541_p11 }
  0x2a   : > { %p4547_p4 = pnand %p4545_p1, %p4542_p13 }
  0x2c   : > { %4550 = shalt.err (!%p4547_p4)
}
  0x2d   : > { %s4551_s28 = scalar_lea.vmem %s150_s7, 16  ;;  %s4558_s10 = scalar_lea.vmem %s150_s7, 32 }
  0x2e   : > { %p4552_p2 = scmp.ne.s32.totalorder %s150_s7, %s4551_s28  ;;  %p4559_p3 = scmp.lt.s32.totalorder %s150_s7, %s150_s7 }
  0x2f   : > { %p4560_p6 = scmp.lt.s32.totalorder %s4558_s10, %s4551_s28 }
  0x30   : > { %p4554_p12 = pnand %p4552_p2, %p4540_p9 }
  0x31   : > { %p4561_p0 = por %p4560_p6, %p4559_p3 }
  0x32   : > { %p4555_p10 = pneg %p4554_p12 }
  0x34   : > { %p4562_p7 = pnand %p4561_p0, %p4555_p10 }
  0x36   : > { %4565 = shalt.err (!%p4562_p7)
}
  0x37   : > { %4365 = dma.hbm_to_vmem [thread:$0]  (!%p4852_p5), %s6110_s2, 16, %s150_s7, [#allocation6]  }
  0x38   : > { %s29_s25 = sadd.s32 1, %s4714_s20  ;;  %s32_s15 = sadd.s32 1, %s4718_s21 }
  0x39   : > { %p30_p12 = scmp.ge.s32.totalorder %s29_s25, 2  ;;  %s160_s24 = sand.u32 1, %s4702_s17  }
  0x3a   : > { %s4013_s6 = sshll.u32 %s160_s24, 11  ;;  %s4015_s28 = sshll.u32 %s4714_s20, 3 }
  0x3b   : > { %s6181_s25 = smov (%p30_p12, %s29_s25), 0  ;;  %s6183_s15 = smov (!%p30_p12, %s32_s15), %s4718_s21 }
  0x3c   : > { %6111 = sst [smem:[#allocation14_spill]] %s6181_s25  ;;  %s37_s8 = ssub.s32 %s4714_s20, %s6181_s25 }
  0x3d   : > { %p34_p3 = scmp.ge.s32.totalorder %s6183_s15, 4  ;;  %s4352_s10 = sshll.u32 %s4718_s21, 10 }
  0x3e   : > { %s164_s11 = scalar_lea.vmem [#allocation2], %s4013_s6  ;;  %s171_s23 = sadd.s32 %s4352_s10, %s4015_s28 }
  0x3f   : > { %s174_s7 = sshll.u32 %s164_s11, 4  ;;  %s6185_s15 = smov (%p34_p3, %s6183_s15), 0  ;;  %s4890_s7 = int_to_ptr.vmem [resolvable:$true] %s174_s7 }
  0x40   : > { %6112 = sst [smem:[#allocation15_spill]] %s6185_s15  ;;  %s36_s27 = ssub.s32 %s4718_s21, %s6185_s15 }
  0x41   : > { %s4017_s2 = sshll.u32 %s171_s23, 6  ;;  %s38_s4 = sor.u32 %s37_s8, %s36_s27 }
  0x42   : > { %p107_p6 = scmp.eq.s32.totalorder %s36_s27, 0  ;;  %p39_p10 = scmp.eq.s32.totalorder %s38_s4, 0 }
  0x43   : > { %s4897_s20 = scalar_lea.hbm %s6083_s0, %s4017_s2  ;;  %s6113_s6 = sadd.s32 1, %s4690_s14 }
  0x44   : > { %s4902_s11 = scalar_select %p107_p6, %s4690_s14, %s6113_s6  }
  0x45   : > { %s6114_s28 = sadd.s32 1, %s4702_s17  ;;  %s4909_s15 = scalar_lea.sflag [#allocation3], %s160_s24 }
  0x46   : > { %s4907_s10 = scalar_select %p39_p10, %s4702_s17, %s6114_s28  }
  0x47   : > { %s4566_s8 = scalar_lea.hbm %s4897_s20, 32768  ;;  %p6115_p5 = scmp.ne.s32.totalorder %s6109_s9, 0 }
  0x48   : > { %p4567_p0 = scmp.ne.s32.totalorder %s4897_s20, %s4566_s8  ;;  %s4571_s27 = scalar_lea.hbm %s6083_s0, 262144 }
  0x49   : > { %p4568_p7 = pneg %p6115_p5  ;;  %p4572_p11 = scmp.lt.u32.totalorder %s4897_s20, %s6083_s0 }
  0x4a   : > { %p4573_p13 = scmp.lt.u32.totalorder %s4571_s27, %s4566_s8  ;;  %p4575_p4 = scmp.lt.u32.totalorder %s4566_s8, %s4897_s20 }
  0x4b   : > { %p4569_p8 = pnand %p4568_p7, %p4567_p0 }
  0x4c   : > { %p4574_p1 = por %p4573_p13, %p4572_p11 }
  0x4d   : > { %p4570_p9 = pneg %p4569_p8 }
  0x4e   : > { %p4576_p2 = por %p4575_p4, %p4574_p1 }
  0x50   : > { %p4577_p12 = pnand %p4576_p2, %p4570_p9 }
  0x52   : > { %4580 = shalt.err (!%p4577_p12)
}
  0x53   : > { %s4581_s24 = scalar_lea.vmem %s4890_s7, 32768  ;;  %s4725_s23 = smov [#allocation2]  }
  0x54   : > { %p4582_p3 = scmp.ne.s32.totalorder %s4890_s7, %s4581_s24  ;;  %s4586_s6 = sshll.u32 %s4725_s23, 4  ;;  %s4587_s6 = int_to_ptr.vmem [resolvable:$false] %s4586_s6 }
  0x55   : > { %s4588_s28 = scalar_lea.vmem %s4587_s6, 65536  ;;  %p4589_p0 = scmp.lt.s32.totalorder %s4890_s7, %s4587_s6 }
  0x56   : > { %p4584_p6 = pnand %p4582_p3, %p4568_p7  ;;  %p4590_p8 = scmp.lt.s32.totalorder %s4588_s28, %s4581_s24 }
  0x58   : > { %p4585_p10 = pneg %p4584_p6  ;;  %p4591_p11 = por %p4590_p8, %p4589_p0 }
  0x5a   : > { %p4592_p13 = pnand %p4591_p11, %p4585_p10 }
  0x5c   : > { %4595 = shalt.err (!%p4592_p13)
}
  0x5d   : > { %s4726_s8 = smov 1024   ;;  %s4727_s2 = smov 512  }
  0x5e   : > { %s4728_s12 = smov 32   ;;  %p6116_p7 = scmp.ne.s32.totalorder %s6107_s5, 0 }
  0x5f   : > { %4369 = dma.hbm_to_vmem [thread:$0]  (!%p6115_p5), %s4897_s20, 32768, %s4890_s7, %s4909_s15, %s4726_s8, %s4727_s2, %s4728_s12  }
  0x60   : > { %186 = sbr.rel (%p6116_p7) target bundleno = 978 (0x3d2), region = 32 }
  0x67   : > { %s188_s27 = sand.u32 1, %s4698_s16   ;;  %p6117_p9 = scmp.ne.s32.totalorder %s6103_s29, 0 }
  0x68   : > { %s4019_s4 = sshll.u32 %s188_s27, 11  ;;  %s189_s25 = scalar_lea.sflag [#allocation3], %s188_s27 }
  0x69   : > { %s4940_s24 = scalar_lea.vmem [#allocation2], %s4019_s4 }
  0x6a   : > { %4669 = dma.done.wait (%p6117_p9), %s189_s25, 32768  }
  0x6b   : > { %4671 = vsyncadd (%p6117_p9), %s189_s25, 4294934528  ;;  %p6118_p1 = scmp.ne.s32.totalorder %s6101_s26, 0 }
  0x6d   : > { %4673 = dma.done.wait (%p6118_p1), [#allocation6], 16  }
  0x6e   : > { %4675 = vsyncadd (%p6118_p1), [#allocation6], 4294967280  ;;  %s216_s20 = sand.u32 1, %s4686_s13   ;;  %p4022_p5 = scmp.ne.s32.totalorder %s4706_s18, 0 }
  0x6f   : > { %s4021_s5 = sshll.u32 %s216_s20, 9  ;;  %v4729_v0 = vmov (!%p4022_p5), 0.0  }
  0x70   : > { %s4953_s9 = scalar_lea.vmem [#allocation7], %s4021_s5  ;;  %226 = sbr.rel (%p4022_p5) target bundleno = 145 (0x91), region = 44 }
  0x71   : > { %227 = vst [vmem:[%s4953_s9] sm:$0xff] (!%p4022_p5), %v4729_v0  ;;  %228 = vst [vmem:[%s4953_s9 + $0x8] sm:$0xff] (!%p4022_p5), %v4729_v0 }
  0x72   : > { %229 = vst [vmem:[%s4953_s9 + $0x10] sm:$0xff] (!%p4022_p5), %v4729_v0  ;;  %230 = vst [vmem:[%s4953_s9 + $0x18] sm:$0xff] (!%p4022_p5), %v4729_v0 }
  0x73   : > { %231 = vst [vmem:[%s4953_s9 + $0x20] sm:$0xff] (!%p4022_p5), %v4729_v0  ;;  %232 = vst [vmem:[%s4953_s9 + $0x28] sm:$0xff] (!%p4022_p5), %v4729_v0 }
  0x74   : > { %233 = vst [vmem:[%s4953_s9 + $0x30] sm:$0xff] (!%p4022_p5), %v4729_v0  ;;  %234 = vst [vmem:[%s4953_s9 + $0x38] sm:$0xff] (!%p4022_p5), %v4729_v0 }
  0x75   : > { %235 = vst [vmem:[%s4953_s9 + $0x40] sm:$0xff] (!%p4022_p5), %v4729_v0  ;;  %236 = vst [vmem:[%s4953_s9 + $0x48] sm:$0xff] (!%p4022_p5), %v4729_v0 }
  0x76   : > { %237 = vst [vmem:[%s4953_s9 + $0x50] sm:$0xff] (!%p4022_p5), %v4729_v0  ;;  %238 = vst [vmem:[%s4953_s9 + $0x58] sm:$0xff] (!%p4022_p5), %v4729_v0 }
  0x77   : > { %239 = vst [vmem:[%s4953_s9 + $0x60] sm:$0xff] %v4729_v0  ;;  %240 = vst [vmem:[%s4953_s9 + $0x68] sm:$0xff] %v4729_v0 }
  0x78   : > { %241 = vst [vmem:[%s4953_s9 + $0x70] sm:$0xff] %v4729_v0  ;;  %242 = vst [vmem:[%s4953_s9 + $0x78] sm:$0xff] %v4729_v0 }
  0x79   : > { %243 = vst [vmem:[%s4953_s9 + $0x80] sm:$0xff] %v4729_v0  ;;  %244 = vst [vmem:[%s4953_s9 + $0x88] sm:$0xff] %v4729_v0 }
  0x7a   : > { %245 = vst [vmem:[%s4953_s9 + $0x90] sm:$0xff] %v4729_v0  ;;  %246 = vst [vmem:[%s4953_s9 + $0x98] sm:$0xff] %v4729_v0 }
  0x7b   : > { %247 = vst [vmem:[%s4953_s9 + $0xa0] sm:$0xff] %v4729_v0  ;;  %248 = vst [vmem:[%s4953_s9 + $0xa8] sm:$0xff] %v4729_v0 }
  0x7c   : > { %249 = vst [vmem:[%s4953_s9 + $0xb0] sm:$0xff] %v4729_v0  ;;  %250 = vst [vmem:[%s4953_s9 + $0xb8] sm:$0xff] %v4729_v0 }
  0x7d   : > { %251 = vst [vmem:[%s4953_s9 + $0xc0] sm:$0xff] %v4729_v0  ;;  %252 = vst [vmem:[%s4953_s9 + $0xc8] sm:$0xff] %v4729_v0 }
  0x7e   : > { %253 = vst [vmem:[%s4953_s9 + $0xd0] sm:$0xff] %v4729_v0  ;;  %254 = vst [vmem:[%s4953_s9 + $0xd8] sm:$0xff] %v4729_v0 }
  0x7f   : > { %255 = vst [vmem:[%s4953_s9 + $0xe0] sm:$0xff] %v4729_v0  ;;  %256 = vst [vmem:[%s4953_s9 + $0xe8] sm:$0xff] %v4729_v0 }
  0x80   : > { %257 = vst [vmem:[%s4953_s9 + $0xf0] sm:$0xff] %v4729_v0  ;;  %258 = vst [vmem:[%s4953_s9 + $0xf8] sm:$0xff] %v4729_v0 }
  0x81   : > { %259 = vst [vmem:[%s4953_s9 + $0x100] sm:$0xff] %v4729_v0  ;;  %260 = vst [vmem:[%s4953_s9 + $0x108] sm:$0xff] %v4729_v0 }
  0x82   : > { %261 = vst [vmem:[%s4953_s9 + $0x110] sm:$0xff] %v4729_v0  ;;  %262 = vst [vmem:[%s4953_s9 + $0x118] sm:$0xff] %v4729_v0 }
  0x83   : > { %263 = vst [vmem:[%s4953_s9 + $0x120] sm:$0xff] %v4729_v0  ;;  %264 = vst [vmem:[%s4953_s9 + $0x128] sm:$0xff] %v4729_v0 }
  0x84   : > { %265 = vst [vmem:[%s4953_s9 + $0x130] sm:$0xff] %v4729_v0  ;;  %266 = vst [vmem:[%s4953_s9 + $0x138] sm:$0xff] %v4729_v0 }
  0x85   : > { %267 = vst [vmem:[%s4953_s9 + $0x140] sm:$0xff] %v4729_v0  ;;  %268 = vst [vmem:[%s4953_s9 + $0x148] sm:$0xff] %v4729_v0 }
  0x86   : > { %269 = vst [vmem:[%s4953_s9 + $0x150] sm:$0xff] %v4729_v0  ;;  %270 = vst [vmem:[%s4953_s9 + $0x158] sm:$0xff] %v4729_v0 }
  0x87   : > { %271 = vst [vmem:[%s4953_s9 + $0x160] sm:$0xff] %v4729_v0  ;;  %272 = vst [vmem:[%s4953_s9 + $0x168] sm:$0xff] %v4729_v0 }
  0x88   : > { %273 = vst [vmem:[%s4953_s9 + $0x170] sm:$0xff] %v4729_v0  ;;  %274 = vst [vmem:[%s4953_s9 + $0x178] sm:$0xff] %v4729_v0 }
  0x89   : > { %275 = vst [vmem:[%s4953_s9 + $0x180] sm:$0xff] %v4729_v0  ;;  %276 = vst [vmem:[%s4953_s9 + $0x188] sm:$0xff] %v4729_v0 }
  0x8a   : > { %277 = vst [vmem:[%s4953_s9 + $0x190] sm:$0xff] %v4729_v0  ;;  %278 = vst [vmem:[%s4953_s9 + $0x198] sm:$0xff] %v4729_v0 }
  0x8b   : > { %279 = vst [vmem:[%s4953_s9 + $0x1a0] sm:$0xff] %v4729_v0  ;;  %280 = vst [vmem:[%s4953_s9 + $0x1a8] sm:$0xff] %v4729_v0 }
  0x8c   : > { %281 = vst [vmem:[%s4953_s9 + $0x1b0] sm:$0xff] %v4729_v0  ;;  %282 = vst [vmem:[%s4953_s9 + $0x1b8] sm:$0xff] %v4729_v0 }
  0x8d   : > { %283 = vst [vmem:[%s4953_s9 + $0x1c0] sm:$0xff] %v4729_v0  ;;  %284 = vst [vmem:[%s4953_s9 + $0x1c8] sm:$0xff] %v4729_v0 }
  0x8e   : > { %285 = vst [vmem:[%s4953_s9 + $0x1d0] sm:$0xff] %v4729_v0  ;;  %286 = vst [vmem:[%s4953_s9 + $0x1d8] sm:$0xff] %v4729_v0 }
  0x8f   : > { %287 = vst [vmem:[%s4953_s9 + $0x1e0] sm:$0xff] %v4729_v0  ;;  %288 = vst [vmem:[%s4953_s9 + $0x1e8] sm:$0xff] %v4729_v0 }
  0x90   : > { %289 = vst [vmem:[%s4953_s9 + $0x1f0] sm:$0xff] %v4729_v0  ;;  %290 = vst [vmem:[%s4953_s9 + $0x1f8] sm:$0xff] %v4729_v0 }
  0x91 PF: > { %s4023_s26 = sshll.u32 %s4706_s18, 10  ;;  %v5086_v1 = vld [vmem:[%s4940_s24] sm:$0xff]  ;;  %v5092_v3 = vld [vmem:[%s4940_s24 + $0x8] sm:$0xff]  ;;  %v4730_v4 = vmov 0   ;;  %p4345_p4 = scmp.ne.s32.totalorder %s4706_s18, 1 }
  0x92   : > { %v5089_v2 = vld [vmem:[%s4940_s24 + $0x20] sm:$0xff]  ;;  %2408 = vmatprep.subr.bf16.mxu0 %v4730_v4  ;;  %2697 = vmatprep.subr.bf16.mxu1 %v4730_v4  ;;  %s612_s29 = sshra.s32 %s4023_s26, 3  ;;  %v5101_v7 = vld [vmem:[%s4940_s24 + $0x28] sm:$0xff] }
  0x93   : > { %v4025_v5 = vcombine.low %v5086_v1, %v5089_v2  ;;  %v4026_v6 = vcombine.high %v5086_v1, %v5089_v2  ;;  %s4024_s15 = sshll.u32 %s612_s29, 2  ;;  %v4027_v8 = vcombine.low %v5092_v3, %v5101_v7  ;;  %v4028_v9 = vcombine.high %v5092_v3, %v5101_v7  ;;  %v364_v42 = vld [vmem:[%s4940_s24 + $0x40] sm:$0xff]  ;;  %v365_v44 = vld [vmem:[%s4940_s24 + $0x48] sm:$0xff] }
  0x94   : > { %s5110_s6 = scalar_lea.vmem %s6084_s1, %s4024_s15  ;;  %v368_v43 = vld [vmem:[%s4940_s24 + $0x60] sm:$0xff]  ;;  %v369_v45 = vld [vmem:[%s4940_s24 + $0x68] sm:$0xff] }
  0x95   : > { %2440 = vmatprep.mubr.bf16.mxu0 %v4026_v6  ;;  %v4474_v10 = vld [vmem:[%s5110_s6] sm:$0xff]   ;;  %2729 = vmatprep.mubr.bf16.mxu1 %v4028_v9  ;;  %v4476_v12 = vld [vmem:[%s5110_s6 + $0x8] sm:$0xff]   ;;  %v4478_v14 = vld [vmem:[%s5110_s6 + $0x10] sm:$0xff]   ;;  %v4034_v48 = vcombine.high %v364_v42, %v368_v43  ;;  %v4036_v49 = vcombine.high %v365_v44, %v369_v45  ;;  %v4033_v56 = vcombine.low %v364_v42, %v368_v43 }
  0x96   : > { %v4475_v11 = vld [vmem:[%s5110_s6 + $0x80] sm:$0xff]   ;;  %2409 = vmatpush1.bf16.msra.mxu0 %v4474_v10  ;;  %v4477_v13 = vld [vmem:[%s5110_s6 + $0x88] sm:$0xff]   ;;  %v4479_v15 = vld [vmem:[%s5110_s6 + $0x90] sm:$0xff]   ;;  %v4035_v58 = vcombine.low %v365_v44, %v369_v45 }
  0x97   : > { %2698 = vmatpush1.bf16.msra.mxu1 %v4475_v11  ;;  %2410 = vmatprep.subr.bf16.mxu0 %v4730_v4  ;;  %v4480_v16 = vld [vmem:[%s5110_s6 + $0x18] sm:$0xff]   ;;  %v4482_v18 = vld [vmem:[%s5110_s6 + $0x20] sm:$0xff]   ;;  %v4484_v20 = vld [vmem:[%s5110_s6 + $0x28] sm:$0xff]  }
  0x98   : > { %2699 = vmatprep.subr.bf16.mxu1 %v4730_v4  ;;  %v4481_v17 = vld [vmem:[%s5110_s6 + $0x98] sm:$0xff]   ;;  %v4483_v19 = vld [vmem:[%s5110_s6 + $0xa0] sm:$0xff]   ;;  %v4485_v21 = vld [vmem:[%s5110_s6 + $0xa8] sm:$0xff]  }
  0x99   : > { %v4486_v22 = vld [vmem:[%s5110_s6 + $0x30] sm:$0xff]   ;;  %v4488_v24 = vld [vmem:[%s5110_s6 + $0x38] sm:$0xff]   ;;  %v4490_v26 = vld [vmem:[%s5110_s6 + $0x40] sm:$0xff]  }
  0x9a   : > { %2411 = vmatpush1.bf16.msra.mxu0 %v4476_v12  ;;  %v4487_v23 = vld [vmem:[%s5110_s6 + $0xb0] sm:$0xff]   ;;  %v4489_v25 = vld [vmem:[%s5110_s6 + $0xb8] sm:$0xff]   ;;  %v4491_v27 = vld [vmem:[%s5110_s6 + $0xc0] sm:$0xff]  }
  0x9b   : > { %2700 = vmatpush1.bf16.msra.mxu1 %v4477_v13  ;;  %2412 = vmatprep.subr.bf16.mxu0 %v4730_v4  ;;  %v4492_v28 = vld [vmem:[%s5110_s6 + $0x48] sm:$0xff]   ;;  %v4494_v30 = vld [vmem:[%s5110_s6 + $0x50] sm:$0xff]   ;;  %v4496_v32 = vld [vmem:[%s5110_s6 + $0x58] sm:$0xff]  }
  0x9c   : > { %2701 = vmatprep.subr.bf16.mxu1 %v4730_v4  ;;  %v4493_v29 = vld [vmem:[%s5110_s6 + $0xc8] sm:$0xff]   ;;  %v4495_v31 = vld [vmem:[%s5110_s6 + $0xd0] sm:$0xff]   ;;  %v4497_v33 = vld [vmem:[%s5110_s6 + $0xd8] sm:$0xff]  }
  0x9d   : > { %v4498_v34 = vld [vmem:[%s5110_s6 + $0x60] sm:$0xff]   ;;  %v4500_v36 = vld [vmem:[%s5110_s6 + $0x68] sm:$0xff]   ;;  %v4502_v38 = vld [vmem:[%s5110_s6 + $0x70] sm:$0xff]  }
  0x9e   : > { %2413 = vmatpush1.bf16.msra.mxu0 %v4478_v14  ;;  %v4499_v35 = vld [vmem:[%s5110_s6 + $0xe0] sm:$0xff]   ;;  %v4501_v37 = vld [vmem:[%s5110_s6 + $0xe8] sm:$0xff]   ;;  %v4503_v39 = vld [vmem:[%s5110_s6 + $0xf0] sm:$0xff]  }
  0x9f   : > { %2702 = vmatpush1.bf16.msra.mxu1 %v4479_v15  ;;  %2414 = vmatprep.subr.bf16.mxu0 %v4730_v4  ;;  %v4504_v40 = vld [vmem:[%s5110_s6 + $0x78] sm:$0xff]   ;;  %v4506_v46 = vld [vmem:[%s5110_s6 + $0x100] sm:$0xff]   ;;  %v4508_v52 = vld [vmem:[%s5110_s6 + $0x108] sm:$0xff]  }
  0xa0   : > { %2703 = vmatprep.subr.bf16.mxu1 %v4730_v4  ;;  %v4505_v41 = vld [vmem:[%s5110_s6 + $0xf8] sm:$0xff]   ;;  %v4507_v47 = vld [vmem:[%s5110_s6 + $0x180] sm:$0xff]   ;;  %v4509_v53 = vld [vmem:[%s5110_s6 + $0x188] sm:$0xff]  }
  0xa1   : > { %v372_v50 = vld [vmem:[%s4940_s24 + $0x80] sm:$0xff]  ;;  %v373_v54 = vld [vmem:[%s4940_s24 + $0x88] sm:$0xff]  ;;  %v4510_v57 = vld [vmem:[%s5110_s6 + $0x110] sm:$0xff]  }
  0xa2   : > { %2415 = vmatpush1.bf16.msra.mxu0 %v4480_v16  ;;  %v376_v51 = vld [vmem:[%s4940_s24 + $0xa0] sm:$0xff]  ;;  %v377_v55 = vld [vmem:[%s4940_s24 + $0xa8] sm:$0xff]  ;;  %v4511_v60 = vld [vmem:[%s5110_s6 + $0x190] sm:$0xff]  }
  0xa3   : > { %2704 = vmatpush1.bf16.msra.mxu1 %v4481_v17  ;;  %2416 = vmatprep.subr.bf16.mxu0 %v4730_v4  ;;  %v4042_v59 = vcombine.high %v372_v50, %v376_v51  ;;  %v4044_v61 = vcombine.high %v373_v54, %v377_v55  ;;  %v380_v62 = vld [vmem:[%s4940_s24 + $0xc0] sm:$0xff]  ;;  %v381_v0 = vld [vmem:[%s4940_s24 + $0xc8] sm:$0xff]  ;;  %v4512_v2 = vld [vmem:[%s5110_s6 + $0x118] sm:$0xff]   ;;  %v4043_v7 = vcombine.low %v373_v54, %v377_v55 }
  0xa4   : > { %2705 = vmatprep.subr.bf16.mxu1 %v4730_v4  ;;  %v384_v63 = vld [vmem:[%s4940_s24 + $0xe0] sm:$0xff]  ;;  %v385_v1 = vld [vmem:[%s4940_s24 + $0xe8] sm:$0xff]  ;;  %v4513_v3 = vld [vmem:[%s5110_s6 + $0x198] sm:$0xff]  }
  0xa5   : > { %v4514_v6 = vld [vmem:[%s5110_s6 + $0x120] sm:$0xff]   ;;  %v4052_v9 = vcombine.high %v381_v0, %v385_v1  ;;  %v4516_v13 = vld [vmem:[%s5110_s6 + $0x128] sm:$0xff]   ;;  %v4049_v17 = vcombine.low %v380_v62, %v384_v63  ;;  %v4526_v45 = vld [vmem:[%s5110_s6 + $0x150] sm:$0xff]  }
  0xa6   : > { %2417 = vmatpush1.bf16.msra.mxu0 %v4482_v18  ;;  %v4515_v10 = vld [vmem:[%s5110_s6 + $0x1a0] sm:$0xff]   ;;  %v389_v14 = vld [vmem:[%s4940_s24 + $0x108] sm:$0xff]  ;;  %v4051_v18 = vcombine.low %v381_v0, %v385_v1  ;;  %v4528_v55 = vld [vmem:[%s5110_s6 + $0x158] sm:$0xff]  }
  0xa7   : > { %2706 = vmatpush1.bf16.msra.mxu1 %v4483_v19  ;;  %2418 = vmatprep.subr.bf16.mxu0 %v4730_v4  ;;  %v388_v11 = vld [vmem:[%s4940_s24 + $0x100] sm:$0xff]  ;;  %v393_v15 = vld [vmem:[%s4940_s24 + $0x128] sm:$0xff] }
  0xa8   : > { %2707 = vmatprep.subr.bf16.mxu1 %v4730_v4  ;;  %v392_v12 = vld [vmem:[%s4940_s24 + $0x120] sm:$0xff]  ;;  %v4517_v16 = vld [vmem:[%s5110_s6 + $0x1a8] sm:$0xff]  }
  0xa9   : > { %v4058_v19 = vcombine.high %v388_v11, %v392_v12  ;;  %v428_v1 = vld [vmem:[%s4940_s24 + $0x240] sm:$0xff] }
  0xaa   : > { %2419 = vmatpush1.bf16.msra.mxu0 %v4484_v20  ;;  %v4060_v20 = vcombine.high %v389_v14, %v393_v15 }
  0xab   : > { %2708 = vmatpush1.bf16.msra.mxu1 %v4485_v21  ;;  %2420 = vmatprep.subr.bf16.mxu0 %v4730_v4  ;;  %v4518_v21 = vld [vmem:[%s5110_s6 + $0x130] sm:$0xff]  }
  0xac   : > { %2709 = vmatprep.subr.bf16.mxu1 %v4730_v4 }
  0xae   : > { %2421 = vmatpush1.bf16.msra.mxu0 %v4486_v22  ;;  %v4519_v22 = vld [vmem:[%s5110_s6 + $0x1b0] sm:$0xff]  }
  0xaf   : > { %2710 = vmatpush1.bf16.msra.mxu1 %v4487_v23  ;;  %2422 = vmatprep.subr.bf16.mxu0 %v4730_v4  ;;  %v396_v23 = vld [vmem:[%s4940_s24 + $0x140] sm:$0xff] }
  0xb0   : > { %2711 = vmatprep.subr.bf16.mxu1 %v4730_v4 }
  0xb2   : > { %2423 = vmatpush1.bf16.msra.mxu0 %v4488_v24  ;;  %v400_v24 = vld [vmem:[%s4940_s24 + $0x160] sm:$0xff] }
  0xb3   : > { %2712 = vmatpush1.bf16.msra.mxu1 %v4489_v25  ;;  %2424 = vmatprep.subr.bf16.mxu0 %v4730_v4  ;;  %v4520_v25 = vld [vmem:[%s5110_s6 + $0x138] sm:$0xff]  }
  0xb4   : > { %2713 = vmatprep.subr.bf16.mxu1 %v4730_v4 }
  0xb6   : > { %2425 = vmatpush1.bf16.msra.mxu0 %v4490_v26  ;;  %v397_v26 = vld [vmem:[%s4940_s24 + $0x148] sm:$0xff] }
  0xb7   : > { %2714 = vmatpush1.bf16.msra.mxu1 %v4491_v27  ;;  %2426 = vmatprep.subr.bf16.mxu0 %v4730_v4  ;;  %v401_v27 = vld [vmem:[%s4940_s24 + $0x168] sm:$0xff] }
  0xb8   : > { %2715 = vmatprep.subr.bf16.mxu1 %v4730_v4  ;;  %v4067_v42 = vcombine.low %v397_v26, %v401_v27 }
  0xba   : > { %2427 = vmatpush1.bf16.msra.mxu0 %v4492_v28  ;;  %v4521_v28 = vld [vmem:[%s5110_s6 + $0x1b8] sm:$0xff]  }
  0xbb   : > { %2716 = vmatpush1.bf16.msra.mxu1 %v4493_v29  ;;  %2428 = vmatprep.subr.bf16.mxu0 %v4730_v4  ;;  %v4057_v29 = vcombine.low %v388_v11, %v392_v12  ;;  %v4531_v11 = vld [vmem:[%s5110_s6 + $0x1e0] sm:$0xff]  }
  0xbc   : > { %2717 = vmatprep.subr.bf16.mxu1 %v4730_v4  ;;  %v436_v12 = vld [vmem:[%s4940_s24 + $0x280] sm:$0xff] }
  0xbe   : > { %2429 = vmatpush1.bf16.msra.mxu0 %v4494_v30  ;;  %v4059_v30 = vcombine.low %v389_v14, %v393_v15  ;;  %v437_v14 = vld [vmem:[%s4940_s24 + $0x288] sm:$0xff] }
  0xbf   : > { %2718 = vmatpush1.bf16.msra.mxu1 %v4495_v31  ;;  %2430 = vmatprep.subr.bf16.mxu0 %v4730_v4  ;;  %v4066_v31 = vcombine.high %v396_v23, %v400_v24  ;;  %v441_v15 = vld [vmem:[%s4940_s24 + $0x2a8] sm:$0xff] }
  0xc0   : > { %2719 = vmatprep.subr.bf16.mxu1 %v4730_v4 }
  0xc2   : > { %2431 = vmatpush1.bf16.msra.mxu0 %v4496_v32  ;;  %v4068_v32 = vcombine.high %v397_v26, %v401_v27 }
  0xc3   : > { %2720 = vmatpush1.bf16.msra.mxu1 %v4497_v33  ;;  %2432 = vmatprep.subr.bf16.mxu0 %v4730_v4  ;;  %v4522_v33 = vld [vmem:[%s5110_s6 + $0x140] sm:$0xff]  }
  0xc4   : > { %2721 = vmatprep.subr.bf16.mxu1 %v4730_v4 }
  0xc6   : > { %2433 = vmatpush1.bf16.msra.mxu0 %v4498_v34  ;;  %v4523_v34 = vld [vmem:[%s5110_s6 + $0x1c0] sm:$0xff]  }
  0xc7   : > { %2722 = vmatpush1.bf16.msra.mxu1 %v4499_v35  ;;  %2434 = vmatprep.subr.bf16.mxu0 %v4730_v4  ;;  %v404_v35 = vld [vmem:[%s4940_s24 + $0x180] sm:$0xff] }
  0xc8   : > { %2723 = vmatprep.subr.bf16.mxu1 %v4730_v4 }
  0xca   : > { %2435 = vmatpush1.bf16.msra.mxu0 %v4500_v36  ;;  %v408_v36 = vld [vmem:[%s4940_s24 + $0x1a0] sm:$0xff] }
  0xcb   : > { %2724 = vmatpush1.bf16.msra.mxu1 %v4501_v37  ;;  %2436 = vmatprep.subr.bf16.mxu0 %v4730_v4  ;;  %v4524_v37 = vld [vmem:[%s5110_s6 + $0x148] sm:$0xff]   ;;  %v4074_v43 = vcombine.high %v404_v35, %v408_v36 }
  0xcc   : > { %2725 = vmatprep.subr.bf16.mxu1 %v4730_v4 }
  0xce   : > { %2437 = vmatpush1.bf16.msra.mxu0 %v4502_v38  ;;  %v405_v38 = vld [vmem:[%s4940_s24 + $0x188] sm:$0xff] }
  0xcf   : > { %2726 = vmatpush1.bf16.msra.mxu1 %v4503_v39  ;;  %2438 = vmatprep.subr.bf16.mxu0 %v4730_v4  ;;  %v409_v39 = vld [vmem:[%s4940_s24 + $0x1a8] sm:$0xff] }
  0xd0   : > { %2727 = vmatprep.subr.bf16.mxu1 %v4730_v4  ;;  %v4076_v44 = vcombine.high %v405_v38, %v409_v39 }
  0xd2   : > { %2439 = vmatpush1.bf16.msra.mxu0 %v4504_v40  ;;  %v4525_v40 = vld [vmem:[%s5110_s6 + $0x1c8] sm:$0xff]  }
  0xd3   : > { %2728 = vmatpush1.bf16.msra.mxu1 %v4505_v41  ;;  %2986 = vmatprep.subr.bf16.mxu0 %v4730_v4  ;;  %v4065_v41 = vcombine.low %v396_v23, %v400_v24  ;;  %v449_v23 = vld [vmem:[%s4940_s24 + $0x2e8] sm:$0xff] }
  0xd4   : > { %3275 = vmatprep.subr.bf16.mxu1 %v4730_v4 }
  0xd5   : > { %2441 = vmatmul.mubr.bf16.vlgmr.msra.gmra.mrb[0].mxu0 %v4025_v5  ;;  %v4041_v5 = vcombine.low %v372_v50, %v376_v51  ;;  %v417_v50 = vld [vmem:[%s4940_s24 + $0x1e8] sm:$0xff]  ;;  %v4073_v51 = vcombine.low %v404_v35, %v408_v36 }
  0xd6   : > { %2730 = vmatmul.mubr.bf16.vlgmr.msra.gmra.mrb[0].mxu1 %v4027_v8  ;;  %2987 = vmatpush1.bf16.msra.mxu0 %v4506_v46  ;;  %v4050_v8 = vcombine.high %v380_v62, %v384_v63  ;;  %v4527_v46 = vld [vmem:[%s5110_s6 + $0x1d0] sm:$0xff]   ;;  %v4533_v36 = vld [vmem:[%s5110_s6 + $0x1e8] sm:$0xff]  }
  0xd7   : > { %3276 = vmatpush1.bf16.msra.mxu1 %v4507_v47  ;;  %2448 = vmatprep.mubr.bf16.mxu0 %v4034_v48  ;;  %v412_v47 = vld [vmem:[%s4940_s24 + $0x1c0] sm:$0xff] }
  0xd8   : > { %2737 = vmatprep.mubr.bf16.mxu1 %v4036_v49  ;;  %2988 = vmatprep.subr.bf16.mxu0 %v4730_v4  ;;  %v416_v48 = vld [vmem:[%s4940_s24 + $0x1e0] sm:$0xff]  ;;  %v413_v49 = vld [vmem:[%s4940_s24 + $0x1c8] sm:$0xff] }
  0xd9   : > { %3277 = vmatprep.subr.bf16.mxu1 %v4730_v4  ;;  %v4084_v54 = vcombine.high %v413_v49, %v417_v50  ;;  %v4083_v62 = vcombine.low %v413_v49, %v417_v50  ;;  %v469_v49 = vld [vmem:[%s4940_s24 + $0x388] sm:$0xff] }
  0xda   : > { %2989 = vmatpush1.bf16.msra.mxu0 %v4508_v52  ;;  %v4075_v52 = vcombine.low %v405_v38, %v409_v39  ;;  %v460_v38 = vld [vmem:[%s4940_s24 + $0x340] sm:$0xff]  ;;  %v473_v50 = vld [vmem:[%s4940_s24 + $0x3a8] sm:$0xff] }
  0xdb   : > { %3278 = vmatpush1.bf16.msra.mxu1 %v4509_v53  ;;  %2990 = vmatprep.subr.bf16.mxu0 %v4730_v4  ;;  %v4082_v53 = vcombine.high %v412_v47, %v416_v48  ;;  %v464_v39 = vld [vmem:[%s4940_s24 + $0x360] sm:$0xff] }
  0xdc   : > { %3279 = vmatprep.subr.bf16.mxu1 %v4730_v4 }
  0xdd   : > { %2449 = vmatmul.mubr.bf16.gmra.mrb[4].mxu0 %v4033_v56  ;;  %v4529_v56 = vld [vmem:[%s5110_s6 + $0x1d8] sm:$0xff]  }
  0xde   : > { %2738 = vmatmul.mubr.bf16.gmra.mrb[4].mxu1 %v4035_v58  ;;  %2456 = vmatprep.mubr.bf16.mxu0 %v4042_v59  ;;  %v424_v58 = vld [vmem:[%s4940_s24 + $0x220] sm:$0xff]  ;;  %v421_v59 = vld [vmem:[%s4940_s24 + $0x208] sm:$0xff] }
  0xdf   : > { %2745 = vmatprep.mubr.bf16.mxu1 %v4044_v61  ;;  %2991 = vmatpush1.bf16.msra.mxu0 %v4510_v57  ;;  %v420_v57 = vld [vmem:[%s4940_s24 + $0x200] sm:$0xff]  ;;  %v4081_v61 = vcombine.low %v412_v47, %v416_v48 }
  0xe0   : > { %3280 = vmatpush1.bf16.msra.mxu1 %v4511_v60  ;;  %2992 = vmatprep.subr.bf16.mxu0 %v4730_v4  ;;  %v425_v60 = vld [vmem:[%s4940_s24 + $0x228] sm:$0xff]  ;;  %v4090_v63 = vcombine.high %v420_v57, %v424_v58  ;;  %v468_v47 = vld [vmem:[%s4940_s24 + $0x380] sm:$0xff] }
  0xe1   : > { %3281 = vmatprep.subr.bf16.mxu1 %v4730_v4  ;;  %v4092_v0 = vcombine.high %v421_v59, %v425_v60  ;;  %v472_v48 = vld [vmem:[%s4940_s24 + $0x3a0] sm:$0xff] }
  0xe3   : > { %2993 = vmatpush1.bf16.msra.mxu0 %v4512_v2  ;;  %v432_v2 = vld [vmem:[%s4940_s24 + $0x260] sm:$0xff] }
  0xe4   : > { %3282 = vmatpush1.bf16.msra.mxu1 %v4513_v3  ;;  %2994 = vmatprep.subr.bf16.mxu0 %v4730_v4  ;;  %v429_v3 = vld [vmem:[%s4940_s24 + $0x248] sm:$0xff] }
  0xe5   : > { %2457 = vmatmul.mubr.bf16.gmra.mrb[8].mxu0 %v4041_v5  ;;  %3283 = vmatprep.subr.bf16.mxu1 %v4730_v4  ;;  %v433_v5 = vld [vmem:[%s4940_s24 + $0x268] sm:$0xff] }
  0xe6   : > { %2746 = vmatmul.mubr.bf16.gmra.mrb[8].mxu1 %v4043_v7  ;;  %2464 = vmatprep.mubr.bf16.mxu0 %v4050_v8  ;;  %v4091_v7 = vcombine.low %v421_v59, %v425_v60  ;;  %v4098_v8 = vcombine.high %v428_v1, %v432_v2  ;;  %v481_v59 = vld [vmem:[%s4940_s24 + $0x3e8] sm:$0xff]  ;;  %v4137_v60 = vcombine.low %v468_v47, %v472_v48 }
  0xe7   : > { %2753 = vmatprep.mubr.bf16.mxu1 %v4052_v9  ;;  %2995 = vmatpush1.bf16.msra.mxu0 %v4514_v6  ;;  %v4089_v6 = vcombine.low %v420_v57, %v424_v58  ;;  %v4100_v9 = vcombine.high %v429_v3, %v433_v5  ;;  %v480_v57 = vld [vmem:[%s4940_s24 + $0x3e0] sm:$0xff]  ;;  %v477_v58 = vld [vmem:[%s4940_s24 + $0x3c8] sm:$0xff] }
  0xe8   : > { %3284 = vmatpush1.bf16.msra.mxu1 %v4515_v10  ;;  %2996 = vmatprep.subr.bf16.mxu0 %v4730_v4  ;;  %v4530_v10 = vld [vmem:[%s5110_s6 + $0x160] sm:$0xff]  }
  0xe9   : > { %3285 = vmatprep.subr.bf16.mxu1 %v4730_v4 }
  0xeb   : > { %2997 = vmatpush1.bf16.msra.mxu0 %v4516_v13  ;;  %v440_v13 = vld [vmem:[%s4940_s24 + $0x2a0] sm:$0xff] }
  0xec   : > { %3286 = vmatpush1.bf16.msra.mxu1 %v4517_v16  ;;  %2998 = vmatprep.subr.bf16.mxu0 %v4730_v4  ;;  %v4097_v16 = vcombine.low %v428_v1, %v432_v2  ;;  %v4105_v24 = vcombine.low %v436_v12, %v440_v13  ;;  %v488_v1 = vld [vmem:[%s4940_s24 + $0x420] sm:$0xff]  ;;  %v485_v2 = vld [vmem:[%s4940_s24 + $0x408] sm:$0xff] }
  0xed   : > { %2465 = vmatmul.mubr.bf16.gmra.mrb[12].mxu0 %v4049_v17  ;;  %3287 = vmatprep.subr.bf16.mxu1 %v4730_v4  ;;  %v4099_v17 = vcombine.low %v429_v3, %v433_v5  ;;  %v489_v3 = vld [vmem:[%s4940_s24 + $0x428] sm:$0xff] }
  0xee   : > { %2754 = vmatmul.mubr.bf16.gmra.mrb[12].mxu1 %v4051_v18  ;;  %2472 = vmatprep.mubr.bf16.mxu0 %v4058_v19  ;;  %v4106_v18 = vcombine.high %v436_v12, %v440_v13  ;;  %v4108_v19 = vcombine.high %v437_v14, %v441_v15  ;;  %v493_v12 = vld [vmem:[%s4940_s24 + $0x448] sm:$0xff] }
  0xef   : > { %2761 = vmatprep.mubr.bf16.mxu1 %v4060_v20  ;;  %2999 = vmatpush1.bf16.msra.mxu0 %v4518_v21  ;;  %v444_v20 = vld [vmem:[%s4940_s24 + $0x2c0] sm:$0xff]  ;;  %v497_v13 = vld [vmem:[%s4940_s24 + $0x468] sm:$0xff] }
  0xf0   : > { %3288 = vmatpush1.bf16.msra.mxu1 %v4519_v22  ;;  %3000 = vmatprep.subr.bf16.mxu0 %v4730_v4  ;;  %v448_v21 = vld [vmem:[%s4940_s24 + $0x2e0] sm:$0xff]  ;;  %v445_v22 = vld [vmem:[%s4940_s24 + $0x2c8] sm:$0xff] }
  0xf1   : > { %3289 = vmatprep.subr.bf16.mxu1 %v4730_v4  ;;  %v4114_v26 = vcombine.high %v444_v20, %v448_v21  ;;  %v4116_v27 = vcombine.high %v445_v22, %v449_v23 }
  0xf3   : > { %3001 = vmatpush1.bf16.msra.mxu0 %v4520_v25  ;;  %v4107_v25 = vcombine.low %v437_v14, %v441_v15  ;;  %v4155_v15 = vcombine.low %v485_v2, %v489_v3 }
  0xf4   : > { %3290 = vmatpush1.bf16.msra.mxu1 %v4521_v28  ;;  %3002 = vmatprep.subr.bf16.mxu0 %v4730_v4  ;;  %v4532_v28 = vld [vmem:[%s5110_s6 + $0x168] sm:$0xff]  }
  0xf5   : > { %2473 = vmatmul.mubr.bf16.gmra.mrb[16].mxu0 %v4057_v29  ;;  %3291 = vmatprep.subr.bf16.mxu1 %v4730_v4  ;;  %v452_v29 = vld [vmem:[%s4940_s24 + $0x300] sm:$0xff] }
  0xf6   : > { %2762 = vmatmul.mubr.bf16.gmra.mrb[16].mxu1 %v4059_v30  ;;  %2480 = vmatprep.mubr.bf16.mxu0 %v4066_v31  ;;  %v456_v30 = vld [vmem:[%s4940_s24 + $0x320] sm:$0xff]  ;;  %v453_v31 = vld [vmem:[%s4940_s24 + $0x308] sm:$0xff] }
  0xf7   : > { %2769 = vmatprep.mubr.bf16.mxu1 %v4068_v32  ;;  %3003 = vmatpush1.bf16.msra.mxu0 %v4522_v33  ;;  %v457_v32 = vld [vmem:[%s4940_s24 + $0x328] sm:$0xff]  ;;  %v4113_v33 = vcombine.low %v444_v20, %v448_v21  ;;  %v4122_v35 = vcombine.high %v452_v29, %v456_v30 }
  0xf8   : > { %3292 = vmatpush1.bf16.msra.mxu1 %v4523_v34  ;;  %3004 = vmatprep.subr.bf16.mxu0 %v4730_v4  ;;  %v4115_v34 = vcombine.low %v445_v22, %v449_v23  ;;  %v501_v20 = vld [vmem:[%s4940_s24 + $0x488] sm:$0xff]  ;;  %v4163_v23 = vcombine.low %v493_v12, %v497_v13 }
  0xf9   : > { %3293 = vmatprep.subr.bf16.mxu1 %v4730_v4  ;;  %v505_v21 = vld [vmem:[%s4940_s24 + $0x4a8] sm:$0xff] }
  0xfb   : > { %3005 = vmatpush1.bf16.msra.mxu0 %v4524_v37  ;;  %v4124_v37 = vcombine.high %v453_v31, %v457_v32 }
  0xfc   : > { %3294 = vmatpush1.bf16.msra.mxu1 %v4525_v40  ;;  %3006 = vmatprep.subr.bf16.mxu0 %v4730_v4  ;;  %v461_v40 = vld [vmem:[%s4940_s24 + $0x348] sm:$0xff] }
  0xfd   : > { %2481 = vmatmul.mubr.bf16.gmra.mrb[20].mxu0 %v4065_v41  ;;  %3295 = vmatprep.subr.bf16.mxu1 %v4730_v4  ;;  %v465_v41 = vld [vmem:[%s4940_s24 + $0x368] sm:$0xff] }
  0xfe   : > { %2770 = vmatmul.mubr.bf16.gmra.mrb[20].mxu1 %v4067_v42  ;;  %2488 = vmatprep.mubr.bf16.mxu0 %v4074_v43  ;;  %v4121_v42 = vcombine.low %v452_v29, %v456_v30  ;;  %v4123_v43 = vcombine.low %v453_v31, %v457_v32  ;;  %v513_v29 = vld [vmem:[%s4940_s24 + $0x4e8] sm:$0xff]  ;;  %v4171_v31 = vcombine.low %v501_v20, %v505_v21 }
  0xff   : > { %2777 = vmatprep.mubr.bf16.mxu1 %v4076_v44  ;;  %3007 = vmatpush1.bf16.msra.mxu0 %v4526_v45  ;;  %v4130_v44 = vcombine.high %v460_v38, %v464_v39  ;;  %v4132_v45 = vcombine.high %v461_v40, %v465_v41 }
 0x100   : > { %3296 = vmatpush1.bf16.msra.mxu1 %v4527_v46  ;;  %3008 = vmatprep.subr.bf16.mxu0 %v4730_v4  ;;  %v4534_v46 = vld [vmem:[%s5110_s6 + $0x170] sm:$0xff]  }
 0x101   : > { %3297 = vmatprep.subr.bf16.mxu1 %v4730_v4 }
 0x103   : > { %3009 = vmatpush1.bf16.msra.mxu0 %v4528_v55  ;;  %v4140_v55 = vcombine.high %v469_v49, %v473_v50 }
 0x104   : > { %3298 = vmatpush1.bf16.msra.mxu1 %v4529_v56  ;;  %3010 = vmatprep.subr.bf16.mxu0 %v4730_v4  ;;  %v476_v56 = vld [vmem:[%s4940_s24 + $0x3c0] sm:$0xff] }
 0x105   : > { %2489 = vmatmul.mubr.bf16.gmra.mrb[24].mxu0 %v4073_v51  ;;  %3299 = vmatprep.subr.bf16.mxu1 %v4730_v4  ;;  %v4129_v51 = vcombine.low %v460_v38, %v464_v39  ;;  %v4145_v5 = vcombine.low %v476_v56, %v480_v57 }
 0x106   : > { %2778 = vmatmul.mubr.bf16.gmra.mrb[24].mxu1 %v4075_v52  ;;  %2496 = vmatprep.mubr.bf16.mxu0 %v4082_v53  ;;  %v4131_v52 = vcombine.low %v461_v40, %v465_v41  ;;  %v4138_v53 = vcombine.high %v468_v47, %v472_v48 }
 0x107   : > { %2785 = vmatprep.mubr.bf16.mxu1 %v4084_v54  ;;  %3011 = vmatpush1.bf16.msra.mxu0 %v4530_v10  ;;  %v4535_v54 = vld [vmem:[%s5110_s6 + $0x1f0] sm:$0xff]   ;;  %v492_v10 = vld [vmem:[%s4940_s24 + $0x440] sm:$0xff] }
 0x108   : > { %3300 = vmatpush1.bf16.msra.mxu1 %v4531_v11  ;;  %3012 = vmatprep.subr.bf16.mxu0 %v4730_v4  ;;  %v496_v11 = vld [vmem:[%s4940_s24 + $0x460] sm:$0xff] }
 0x109   : > { %3301 = vmatprep.subr.bf16.mxu1 %v4730_v4  ;;  %v4161_v22 = vcombine.low %v492_v10, %v496_v11 }
 0x10b   : > { %3013 = vmatpush1.bf16.msra.mxu0 %v4532_v28  ;;  %v509_v28 = vld [vmem:[%s4940_s24 + $0x4c8] sm:$0xff] }
 0x10c   : > { %3014 = vmatprep.subr.bf16.mxu0 %v4730_v4  ;;  %3302 = vmatpush1.bf16.msra.mxu1 %v4533_v36  ;;  %v517_v36 = vld [vmem:[%s4940_s24 + $0x508] sm:$0xff]  ;;  %v4179_v39 = vcombine.low %v509_v28, %v513_v29 }
 0x10d   : > { %2497 = vmatmul.mubr.bf16.gmra.mrb[28].mxu0 %v4081_v61  ;;  %3303 = vmatprep.subr.bf16.mxu1 %v4730_v4  ;;  %v4139_v61 = vcombine.low %v469_v49, %v473_v50  ;;  %v532_v50 = vld [vmem:[%s4940_s24 + $0x580] sm:$0xff] }
 0x10e   : > { %2786 = vmatmul.mubr.bf16.gmra.mrb[28].mxu1 %v4083_v62  ;;  %2504 = vmatprep.mubr.bf16.mxu0 %v4090_v63  ;;  %v4146_v62 = vcombine.high %v476_v56, %v480_v57  ;;  %v4148_v63 = vcombine.high %v477_v58, %v481_v59 }
 0x10f   : > { %2793 = vmatprep.mubr.bf16.mxu1 %v4092_v0  ;;  %3015 = vmatpush1.bf16.msra.mxu0 %v4534_v46  ;;  %v484_v0 = vld [vmem:[%s4940_s24 + $0x400] sm:$0xff] }
 0x110   : > { %3016 = vmatprep.subr.bf16.mxu0 %v4730_v4  ;;  %3304 = vmatpush1.bf16.msra.mxu1 %v4535_v54  ;;  %v4153_v14 = vcombine.low %v484_v0, %v488_v1 }
 0x111   : > { %3305 = vmatprep.subr.bf16.mxu1 %v4730_v4  ;;  %v4536_v4 = vld [vmem:[%s5110_s6 + $0x178] sm:$0xff]  }
 0x113   : > { %3017 = vmatpush1.bf16.msra.mxu0 %v4536_v4 }
 0x115   : > { %2505 = vmatmul.mubr.bf16.gmra.mrb[32].mxu0 %v4089_v6  ;;  %v4147_v6 = vcombine.low %v477_v58, %v481_v59  ;;  %v540_v58 = vld [vmem:[%s4940_s24 + $0x5c0] sm:$0xff] }
 0x116   : > { %2794 = vmatmul.mubr.bf16.gmra.mrb[32].mxu1 %v4091_v7  ;;  %2512 = vmatprep.mubr.bf16.mxu0 %v4098_v8  ;;  %v4154_v7 = vcombine.high %v484_v0, %v488_v1  ;;  %v4537_v8 = vld [vmem:[%s5110_s6 + $0x1f8] sm:$0xff]   ;;  %v544_v59 = vld [vmem:[%s4940_s24 + $0x5e0] sm:$0xff] }
 0x117   : > { %2801 = vmatprep.mubr.bf16.mxu1 %v4100_v9  ;;  %v4156_v9 = vcombine.high %v485_v2, %v489_v3  ;;  %3306 = vmatpush1.bf16.msra.mxu1 %v4537_v8  ;;  %v4210_v4 = vcombine.high %v540_v58, %v544_v59  ;;  %v548_v1 = vld [vmem:[%s4940_s24 + $0x600] sm:$0xff]  ;;  %v549_v3 = vld [vmem:[%s4940_s24 + $0x608] sm:$0xff] }
 0x118   : > { %v552_v2 = vld [vmem:[%s4940_s24 + $0x620] sm:$0xff] }
 0x119   : > { %v4218_v8 = vcombine.high %v548_v1, %v552_v2 }
 0x11d   : > { %2513 = vmatmul.mubr.bf16.gmra.mrb[36].mxu0 %v4097_v16  ;;  %v4162_v16 = vcombine.high %v492_v10, %v496_v11  ;;  %v556_v10 = vld [vmem:[%s4940_s24 + $0x640] sm:$0xff] }
 0x11e   : > { %2802 = vmatmul.mubr.bf16.gmra.mrb[36].mxu1 %v4099_v17  ;;  %2520 = vmatprep.mubr.bf16.mxu0 %v4106_v18  ;;  %v4164_v17 = vcombine.high %v493_v12, %v497_v13  ;;  %v500_v18 = vld [vmem:[%s4940_s24 + $0x480] sm:$0xff]  ;;  %v557_v12 = vld [vmem:[%s4940_s24 + $0x648] sm:$0xff] }
 0x11f   : > { %2809 = vmatprep.mubr.bf16.mxu1 %v4108_v19  ;;  %v504_v19 = vld [vmem:[%s4940_s24 + $0x4a0] sm:$0xff]  ;;  %v561_v13 = vld [vmem:[%s4940_s24 + $0x668] sm:$0xff] }
 0x120   : > { %v4169_v30 = vcombine.low %v500_v18, %v504_v19  ;;  %v560_v11 = vld [vmem:[%s4940_s24 + $0x660] sm:$0xff] }
 0x125   : > { %2521 = vmatmul.mubr.bf16.gmra.mrb[40].mxu0 %v4105_v24  ;;  %v4170_v24 = vcombine.high %v500_v18, %v504_v19  ;;  %v564_v18 = vld [vmem:[%s4940_s24 + $0x680] sm:$0xff] }
 0x126   : > { %2810 = vmatmul.mubr.bf16.gmra.mrb[40].mxu1 %v4107_v25  ;;  %2528 = vmatprep.mubr.bf16.mxu0 %v4114_v26  ;;  %v4172_v25 = vcombine.high %v501_v20, %v505_v21  ;;  %v508_v26 = vld [vmem:[%s4940_s24 + $0x4c0] sm:$0xff]  ;;  %v565_v20 = vld [vmem:[%s4940_s24 + $0x688] sm:$0xff] }
 0x127   : > { %2817 = vmatprep.mubr.bf16.mxu1 %v4116_v27  ;;  %v512_v27 = vld [vmem:[%s4940_s24 + $0x4e0] sm:$0xff]  ;;  %v569_v21 = vld [vmem:[%s4940_s24 + $0x6a8] sm:$0xff] }
 0x128   : > { %v4178_v32 = vcombine.high %v508_v26, %v512_v27  ;;  %v4177_v38 = vcombine.low %v508_v26, %v512_v27  ;;  %v568_v19 = vld [vmem:[%s4940_s24 + $0x6a0] sm:$0xff] }
 0x129   : > { %v572_v26 = vld [vmem:[%s4940_s24 + $0x6c0] sm:$0xff] }
 0x12a   : > { %v576_v27 = vld [vmem:[%s4940_s24 + $0x6e0] sm:$0xff] }
 0x12d   : > { %2529 = vmatmul.mubr.bf16.gmra.mrb[44].mxu0 %v4113_v33  ;;  %v4180_v33 = vcombine.high %v509_v28, %v513_v29  ;;  %v573_v28 = vld [vmem:[%s4940_s24 + $0x6c8] sm:$0xff] }
 0x12e   : > { %2818 = vmatmul.mubr.bf16.gmra.mrb[44].mxu1 %v4115_v34  ;;  %2536 = vmatprep.mubr.bf16.mxu0 %v4122_v35  ;;  %v516_v34 = vld [vmem:[%s4940_s24 + $0x500] sm:$0xff]  ;;  %v577_v29 = vld [vmem:[%s4940_s24 + $0x6e8] sm:$0xff] }
 0x12f   : > { %2825 = vmatprep.mubr.bf16.mxu1 %v4124_v37  ;;  %v520_v35 = vld [vmem:[%s4940_s24 + $0x520] sm:$0xff]  ;;  %v521_v37 = vld [vmem:[%s4940_s24 + $0x528] sm:$0xff] }
 0x130   : > { %v4186_v40 = vcombine.high %v516_v34, %v520_v35  ;;  %v4188_v41 = vcombine.high %v517_v36, %v521_v37  ;;  %v4185_v46 = vcombine.low %v516_v34, %v520_v35  ;;  %v4187_v47 = vcombine.low %v517_v36, %v521_v37  ;;  %v580_v34 = vld [vmem:[%s4940_s24 + $0x700] sm:$0xff]  ;;  %v581_v37 = vld [vmem:[%s4940_s24 + $0x708] sm:$0xff] }
 0x131   : > { %v584_v35 = vld [vmem:[%s4940_s24 + $0x720] sm:$0xff] }
 0x135   : > { %2537 = vmatmul.mubr.bf16.gmra.mrb[48].mxu0 %v4121_v42  ;;  %v524_v42 = vld [vmem:[%s4940_s24 + $0x540] sm:$0xff] }
 0x136   : > { %2826 = vmatmul.mubr.bf16.gmra.mrb[48].mxu1 %v4123_v43  ;;  %2544 = vmatprep.mubr.bf16.mxu0 %v4130_v44  ;;  %v528_v43 = vld [vmem:[%s4940_s24 + $0x560] sm:$0xff]  ;;  %v525_v44 = vld [vmem:[%s4940_s24 + $0x548] sm:$0xff] }
 0x137   : > { %2833 = vmatprep.mubr.bf16.mxu1 %v4132_v45  ;;  %v529_v45 = vld [vmem:[%s4940_s24 + $0x568] sm:$0xff]  ;;  %v4194_v48 = vcombine.high %v524_v42, %v528_v43  ;;  %v4193_v54 = vcombine.low %v524_v42, %v528_v43 }
 0x138   : > { %v4196_v49 = vcombine.high %v525_v44, %v529_v45 }
 0x13d   : > { %2545 = vmatmul.mubr.bf16.gmra.mrb[52].mxu0 %v4129_v51  ;;  %v536_v51 = vld [vmem:[%s4940_s24 + $0x5a0] sm:$0xff] }
 0x13e   : > { %2834 = vmatmul.mubr.bf16.gmra.mrb[52].mxu1 %v4131_v52  ;;  %2552 = vmatprep.mubr.bf16.mxu0 %v4138_v53  ;;  %v533_v52 = vld [vmem:[%s4940_s24 + $0x588] sm:$0xff]  ;;  %v4202_v56 = vcombine.high %v532_v50, %v536_v51 }
 0x13f   : > { %2841 = vmatprep.mubr.bf16.mxu1 %v4140_v55  ;;  %v537_v53 = vld [vmem:[%s4940_s24 + $0x5a8] sm:$0xff]  ;;  %v4195_v55 = vcombine.low %v525_v44, %v529_v45  ;;  %v4243_v45 = vcombine.low %v573_v28, %v577_v29 }
 0x140   : > { %v4204_v57 = vcombine.high %v533_v52, %v537_v53 }
 0x145   : > { %2553 = vmatmul.mubr.bf16.gmra.mrb[56].mxu0 %v4137_v60  ;;  %v541_v60 = vld [vmem:[%s4940_s24 + $0x5c8] sm:$0xff] }
 0x146   : > { %2842 = vmatmul.mubr.bf16.gmra.mrb[56].mxu1 %v4139_v61  ;;  %2560 = vmatprep.mubr.bf16.mxu0 %v4146_v62  ;;  %v545_v61 = vld [vmem:[%s4940_s24 + $0x5e8] sm:$0xff]  ;;  %v4201_v62 = vcombine.low %v532_v50, %v536_v51 }
 0x147   : > { %2849 = vmatprep.mubr.bf16.mxu1 %v4148_v63  ;;  %v4203_v63 = vcombine.low %v533_v52, %v537_v53  ;;  %v4212_v0 = vcombine.high %v541_v60, %v545_v61  ;;  %v588_v52 = vld [vmem:[%s4940_s24 + $0x740] sm:$0xff] }
 0x148   : > { %v592_v53 = vld [vmem:[%s4940_s24 + $0x760] sm:$0xff] }
 0x14d   : > { %2561 = vmatmul.mubr.bf16.gmra.mrb[60].mxu0 %v4145_v5  ;;  %v553_v5 = vld [vmem:[%s4940_s24 + $0x628] sm:$0xff] }
 0x14e   : > { %2850 = vmatmul.mubr.bf16.gmra.mrb[60].mxu1 %v4147_v6  ;;  %2568 = vmatprep.mubr.bf16.mxu0 %v4154_v7  ;;  %v4209_v6 = vcombine.low %v540_v58, %v544_v59  ;;  %v4211_v7 = vcombine.low %v541_v60, %v545_v61  ;;  %v4249_v59 = vcombine.low %v580_v34, %v584_v35 }
 0x14f   : > { %2857 = vmatprep.mubr.bf16.mxu1 %v4156_v9  ;;  %v4220_v9 = vcombine.high %v549_v3, %v553_v5 }
 0x155   : > { %2569 = vmatmul.mubr.bf16.gmra.mrb[64].mxu0 %v4153_v14  ;;  %v4217_v14 = vcombine.low %v548_v1, %v552_v2 }
 0x156   : > { %2858 = vmatmul.mubr.bf16.gmra.mrb[64].mxu1 %v4155_v15  ;;  %2576 = vmatprep.mubr.bf16.mxu0 %v4162_v16  ;;  %v4219_v15 = vcombine.low %v549_v3, %v553_v5  ;;  %v4226_v16 = vcombine.high %v556_v10, %v560_v11 }
 0x157   : > { %2865 = vmatprep.mubr.bf16.mxu1 %v4164_v17  ;;  %v4228_v17 = vcombine.high %v557_v12, %v561_v13 }
 0x15d   : > { %2577 = vmatmul.mubr.bf16.gmra.mrb[68].mxu0 %v4161_v22  ;;  %v4225_v22 = vcombine.low %v556_v10, %v560_v11  ;;  %v601_v10 = vld [vmem:[%s4940_s24 + $0x7a8] sm:$0xff] }
 0x15e   : > { %2866 = vmatmul.mubr.bf16.gmra.mrb[68].mxu1 %v4163_v23  ;;  %2584 = vmatprep.mubr.bf16.mxu0 %v4170_v24  ;;  %v4227_v23 = vcombine.low %v557_v12, %v561_v13  ;;  %v4234_v24 = vcombine.high %v564_v18, %v568_v19  ;;  %v4257_v13 = vcombine.low %v588_v52, %v592_v53 }
 0x15f   : > { %2873 = vmatprep.mubr.bf16.mxu1 %v4172_v25  ;;  %v4236_v25 = vcombine.high %v565_v20, %v569_v21 }
 0x165   : > { %2585 = vmatmul.mubr.bf16.gmra.mrb[72].mxu0 %v4169_v30  ;;  %v4233_v30 = vcombine.low %v564_v18, %v568_v19 }
 0x166   : > { %2874 = vmatmul.mubr.bf16.gmra.mrb[72].mxu1 %v4171_v31  ;;  %2592 = vmatprep.mubr.bf16.mxu0 %v4178_v32  ;;  %v4235_v31 = vcombine.low %v565_v20, %v569_v21  ;;  %v4242_v32 = vcombine.high %v572_v26, %v576_v27 }
 0x167   : > { %2881 = vmatprep.mubr.bf16.mxu1 %v4180_v33  ;;  %v4244_v33 = vcombine.high %v573_v28, %v577_v29  ;;  %v609_v28 = vld [vmem:[%s4940_s24 + $0x7e8] sm:$0xff] }
 0x16d   : > { %2593 = vmatmul.mubr.bf16.gmra.mrb[76].mxu0 %v4177_v38  ;;  %v585_v38 = vld [vmem:[%s4940_s24 + $0x728] sm:$0xff] }
 0x16e   : > { %2882 = vmatmul.mubr.bf16.gmra.mrb[76].mxu1 %v4179_v39  ;;  %2600 = vmatprep.mubr.bf16.mxu0 %v4186_v40 }
 0x16f   : > { %2889 = vmatprep.mubr.bf16.mxu1 %v4188_v41  ;;  %v4241_v41 = vcombine.low %v572_v26, %v576_v27  ;;  %v605_v27 = vld [vmem:[%s4940_s24 + $0x7c8] sm:$0xff] }
 0x175   : > { %2601 = vmatmul.mubr.bf16.gmra.mrb[80].mxu0 %v4185_v46  ;;  %v4250_v46 = vcombine.high %v580_v34, %v584_v35 }
 0x176   : > { %2890 = vmatmul.mubr.bf16.gmra.mrb[80].mxu1 %v4187_v47  ;;  %2608 = vmatprep.mubr.bf16.mxu0 %v4194_v48 }
 0x177   : > { %2897 = vmatprep.mubr.bf16.mxu1 %v4196_v49  ;;  %v4252_v49 = vcombine.high %v581_v37, %v585_v38 }
 0x17d   : > { %2609 = vmatmul.mubr.bf16.gmra.mrb[84].mxu0 %v4193_v54 }
 0x17e   : > { %2898 = vmatmul.mubr.bf16.gmra.mrb[84].mxu1 %v4195_v55  ;;  %2616 = vmatprep.mubr.bf16.mxu0 %v4202_v56  ;;  %v589_v55 = vld [vmem:[%s4940_s24 + $0x748] sm:$0xff] }
 0x17f   : > { %2905 = vmatprep.mubr.bf16.mxu1 %v4204_v57  ;;  %v593_v56 = vld [vmem:[%s4940_s24 + $0x768] sm:$0xff] }
 0x180   : > { %v4260_v2 = vcombine.high %v589_v55, %v593_v56 }
 0x185   : > { %2617 = vmatmul.mubr.bf16.gmra.mrb[88].mxu0 %v4201_v62 }
 0x186   : > { %2906 = vmatmul.mubr.bf16.gmra.mrb[88].mxu1 %v4203_v63  ;;  %2624 = vmatprep.mubr.bf16.mxu0 %v4210_v4  ;;  %v4251_v63 = vcombine.low %v581_v37, %v585_v38  ;;  %v4258_v4 = vcombine.high %v588_v52, %v592_v53 }
 0x187   : > { %2913 = vmatprep.mubr.bf16.mxu1 %v4212_v0 }
 0x18d   : > { %2625 = vmatmul.mubr.bf16.gmra.mrb[92].mxu0 %v4209_v6  ;;  %v596_v6 = vld [vmem:[%s4940_s24 + $0x780] sm:$0xff] }
 0x18e   : > { %2914 = vmatmul.mubr.bf16.gmra.mrb[92].mxu1 %v4211_v7  ;;  %2632 = vmatprep.mubr.bf16.mxu0 %v4218_v8  ;;  %v600_v7 = vld [vmem:[%s4940_s24 + $0x7a0] sm:$0xff] }
 0x18f   : > { %2921 = vmatprep.mubr.bf16.mxu1 %v4220_v9  ;;  %v597_v9 = vld [vmem:[%s4940_s24 + $0x788] sm:$0xff]  ;;  %v4266_v18 = vcombine.high %v596_v6, %v600_v7 }
 0x190   : > { %v4268_v21 = vcombine.high %v597_v9, %v601_v10  ;;  %v4267_v35 = vcombine.low %v597_v9, %v601_v10 }
 0x195   : > { %2633 = vmatmul.mubr.bf16.gmra.mrb[96].mxu0 %v4217_v14 }
 0x196   : > { %2922 = vmatmul.mubr.bf16.gmra.mrb[96].mxu1 %v4219_v15  ;;  %2640 = vmatprep.mubr.bf16.mxu0 %v4226_v16 }
 0x197   : > { %2929 = vmatprep.mubr.bf16.mxu1 %v4228_v17  ;;  %v4259_v17 = vcombine.low %v589_v55, %v593_v56  ;;  %v4275_v55 = vcombine.low %v605_v27, %v609_v28 }
 0x19d   : > { %2641 = vmatmul.mubr.bf16.gmra.mrb[100].mxu0 %v4225_v22 }
 0x19e   : > { %2930 = vmatmul.mubr.bf16.gmra.mrb[100].mxu1 %v4227_v23  ;;  %2648 = vmatprep.mubr.bf16.mxu0 %v4234_v24  ;;  %v604_v24 = vld [vmem:[%s4940_s24 + $0x7c0] sm:$0xff] }
 0x19f   : > { %2937 = vmatprep.mubr.bf16.mxu1 %v4236_v25  ;;  %v608_v25 = vld [vmem:[%s4940_s24 + $0x7e0] sm:$0xff] }
 0x1a5   : > { %2649 = vmatmul.mubr.bf16.gmra.mrb[104].mxu0 %v4233_v30 }
 0x1a6   : > { %2938 = vmatmul.mubr.bf16.gmra.mrb[104].mxu1 %v4235_v31  ;;  %2656 = vmatprep.mubr.bf16.mxu0 %v4242_v32  ;;  %v4265_v31 = vcombine.low %v596_v6, %v600_v7 }
 0x1a7   : > { %2945 = vmatprep.mubr.bf16.mxu1 %v4244_v33 }
 0x1a8   : > { %v2442_v36 = vpop.f32.mrb[0].mxu0 }
 0x1a9   : > { %v2731_v39 = vpop.f32.mrb[0].mxu1  ;;  %v2444_v40 = vpop.f32.mrb[1].mxu0 }
 0x1aa   : > { %v5356_v42 = vadd.f32 %v2731_v39, %v2442_v36  ;;  %v2733_v43 = vpop.f32.mrb[1].mxu1  ;;  %v2445_v44 = vpop.f32.mrb[2].mxu0  ;;  %v4274_v36 = vcombine.high %v604_v24, %v608_v25  ;;  %v4276_v39 = vcombine.high %v605_v27, %v609_v28 }
 0x1ab   : > { %v2734_v47 = vpop.f32.mrb[2].mxu1  ;;  %v2447_v48 = vpop.f32.mrb[3].mxu0  ;;  %v358_v43 = vld [vmem:[%s4940_s24 + $0x10] sm:$0xff] }
 0x1ac   : > { %v5358_v50 = vadd.f32 %v2734_v47, %v2445_v44  ;;  %v2736_v51 = vpop.f32.mrb[3].mxu1  ;;  %v362_v44 = vld [vmem:[%s4940_s24 + $0x30] sm:$0xff]  ;;  %v363_v47 = vld [vmem:[%s4940_s24 + $0x38] sm:$0xff] }
 0x1ad   : > { %2657 = vmatmul.mubr.bf16.gmra.mrb[108].mxu0 %v4241_v41  ;;  %v4273_v51 = vcombine.low %v604_v24, %v608_v25  ;;  %v4030_v56 = vcombine.high %v358_v43, %v362_v44  ;;  %v4029_v7 = vcombine.low %v358_v43, %v362_v44  ;;  %v379_v24 = vld [vmem:[%s4940_s24 + $0xb8] sm:$0xff] }
 0x1ae   : > { %2946 = vmatmul.mubr.bf16.gmra.mrb[108].mxu1 %v4243_v45  ;;  %2664 = vmatprep.mubr.bf16.mxu0 %v4250_v46  ;;  %v359_v46 = vld [vmem:[%s4940_s24 + $0x18] sm:$0xff] }
 0x1af   : > { %2953 = vmatprep.mubr.bf16.mxu1 %v4252_v49  ;;  %v383_v44 = vld [vmem:[%s4940_s24 + $0xd8] sm:$0xff] }
 0x1b0   : > { %v2450_v54 = vpop.f32.mrb[4].mxu0 }
 0x1b1   : > { %v2739_v57 = vpop.f32.mrb[4].mxu1  ;;  %v2452_v58 = vpop.f32.mrb[5].mxu0 }
 0x1b2   : > { %v5364_v60 = vadd.f32 %v2739_v57, %v2450_v54  ;;  %v2741_v61 = vpop.f32.mrb[5].mxu1  ;;  %v2453_v62 = vpop.f32.mrb[6].mxu0 }
 0x1b3   : > { %v2742_v0 = vpop.f32.mrb[6].mxu1  ;;  %v2455_v1 = vpop.f32.mrb[7].mxu0 }
 0x1b4   : > { %v5366_v3 = vadd.f32 %v2742_v0, %v2453_v62  ;;  %v2744_v5 = vpop.f32.mrb[7].mxu1  ;;  %v367_v1 = vld [vmem:[%s4940_s24 + $0x58] sm:$0xff] }
 0x1b5   : > { %2665 = vmatmul.mubr.bf16.gmra.mrb[112].mxu0 %v4249_v59  ;;  %v4032_v59 = vcombine.high %v359_v46, %v363_v47 }
 0x1b6   : > { %2954 = vmatmul.mubr.bf16.gmra.mrb[112].mxu1 %v4251_v63  ;;  %2672 = vmatprep.mubr.bf16.mxu0 %v4258_v4  ;;  %v366_v63 = vld [vmem:[%s4940_s24 + $0x50] sm:$0xff] }
 0x1b7   : > { %2961 = vmatprep.mubr.bf16.mxu1 %v4260_v2  ;;  %v370_v4 = vld [vmem:[%s4940_s24 + $0x70] sm:$0xff]  ;;  %v371_v2 = vld [vmem:[%s4940_s24 + $0x78] sm:$0xff] }
 0x1b8   : > { %v2458_v8 = vpop.f32.mrb[8].mxu0  ;;  %v4037_v27 = vcombine.low %v366_v63, %v370_v4 }
 0x1b9   : > { %v2747_v11 = vpop.f32.mrb[8].mxu1  ;;  %v2460_v12 = vpop.f32.mrb[9].mxu0 }
 0x1ba   : > { %v5372_v14 = vadd.f32 %v2747_v11, %v2458_v8  ;;  %v2749_v15 = vpop.f32.mrb[9].mxu1  ;;  %v2461_v16 = vpop.f32.mrb[10].mxu0  ;;  %v4031_v11 = vcombine.low %v359_v46, %v363_v47  ;;  %v4038_v12 = vcombine.high %v366_v63, %v370_v4  ;;  %v390_v63 = vld [vmem:[%s4940_s24 + $0x110] sm:$0xff] }
 0x1bb   : > { %v2750_v19 = vpop.f32.mrb[10].mxu1  ;;  %v2463_v20 = vpop.f32.mrb[11].mxu0  ;;  %v394_v4 = vld [vmem:[%s4940_s24 + $0x130] sm:$0xff] }
 0x1bc   : > { %v5374_v22 = vadd.f32 %v2750_v19, %v2461_v16  ;;  %v2752_v23 = vpop.f32.mrb[11].mxu1  ;;  %v4040_v16 = vcombine.high %v367_v1, %v371_v2  ;;  %v374_v19 = vld [vmem:[%s4940_s24 + $0x90] sm:$0xff] }
 0x1bd   : > { %2673 = vmatmul.mubr.bf16.gmra.mrb[116].mxu0 %v4257_v13  ;;  %v378_v20 = vld [vmem:[%s4940_s24 + $0xb0] sm:$0xff]  ;;  %v375_v23 = vld [vmem:[%s4940_s24 + $0x98] sm:$0xff] }
 0x1be   : > { %2962 = vmatmul.mubr.bf16.gmra.mrb[116].mxu1 %v4259_v17  ;;  %2680 = vmatprep.mubr.bf16.mxu0 %v4266_v18 }
 0x1bf   : > { %2969 = vmatprep.mubr.bf16.mxu1 %v4268_v21 }
 0x1c0   : > { %v2466_v26 = vpop.f32.mrb[12].mxu0 }
 0x1c1   : > { %v2755_v29 = vpop.f32.mrb[12].mxu1  ;;  %v2468_v30 = vpop.f32.mrb[13].mxu0 }
 0x1c2   : > { %v5380_v32 = vadd.f32 %v2755_v29, %v2466_v26  ;;  %v2757_v33 = vpop.f32.mrb[13].mxu1  ;;  %v2469_v34 = vpop.f32.mrb[14].mxu0 }
 0x1c3   : > { %v2758_v37 = vpop.f32.mrb[14].mxu1  ;;  %v2471_v38 = vpop.f32.mrb[15].mxu0  ;;  %v4046_v33 = vcombine.high %v374_v19, %v378_v20 }
 0x1c4   : > { %v5382_v40 = vadd.f32 %v2758_v37, %v2469_v34  ;;  %v2760_v41 = vpop.f32.mrb[15].mxu1 }
 0x1c5   : > { %2681 = vmatmul.mubr.bf16.gmra.mrb[120].mxu0 %v4265_v31  ;;  %v4039_v31 = vcombine.low %v367_v1, %v371_v2  ;;  %v386_v41 = vld [vmem:[%s4940_s24 + $0xf0] sm:$0xff]  ;;  %v391_v1 = vld [vmem:[%s4940_s24 + $0x118] sm:$0xff] }
 0x1c6   : > { %2970 = vmatmul.mubr.bf16.gmra.mrb[120].mxu1 %v4267_v35  ;;  %2688 = vmatprep.mubr.bf16.mxu0 %v4274_v36  ;;  %v4048_v36 = vcombine.high %v375_v23, %v379_v24  ;;  %v395_v2 = vld [vmem:[%s4940_s24 + $0x138] sm:$0xff] }
 0x1c7   : > { %2977 = vmatprep.mubr.bf16.mxu1 %v4276_v39  ;;  %v382_v39 = vld [vmem:[%s4940_s24 + $0xd0] sm:$0xff] }
 0x1c8   : > { %v2474_v45 = vpop.f32.mrb[16].mxu0 }
 0x1c9   : > { %v2763_v48 = vpop.f32.mrb[16].mxu1  ;;  %v2476_v49 = vpop.f32.mrb[17].mxu0 }
 0x1ca   : > { %v5388_v52 = vadd.f32 %v2763_v48, %v2474_v45  ;;  %v2765_v53 = vpop.f32.mrb[17].mxu1  ;;  %v2477_v54 = vpop.f32.mrb[18].mxu0  ;;  %v387_v45 = vld [vmem:[%s4940_s24 + $0xf8] sm:$0xff]  ;;  %v4045_v48 = vcombine.low %v374_v19, %v378_v20 }
 0x1cb   : > { %v2766_v57 = vpop.f32.mrb[18].mxu1  ;;  %v2479_v58 = vpop.f32.mrb[19].mxu0 }
 0x1cc   : > { %v5390_v61 = vadd.f32 %v2766_v57, %v2477_v54  ;;  %v2768_v62 = vpop.f32.mrb[19].mxu1  ;;  %v4047_v54 = vcombine.low %v375_v23, %v379_v24  ;;  %v4056_v58 = vcombine.high %v383_v44, %v387_v45  ;;  %v402_v23 = vld [vmem:[%s4940_s24 + $0x170] sm:$0xff] }
 0x1cd   : > { %2689 = vmatmul.mubr.bf16.gmra.mrb[124].mxu0 %v4273_v51 }
 0x1ce   : > { %2978 = vmatmul.mubr.bf16.gmra.mrb[124].mxu1 %v4275_v55  ;;  %3018 = vmatprep.mubr.bf16.mxu0 %v4030_v56  ;;  %v4054_v55 = vcombine.high %v382_v39, %v386_v41 }
 0x1cf   : > { %3307 = vmatprep.mubr.bf16.mxu1 %v4032_v59 }
 0x1d0   : > { %v2482_v0 = vpop.f32.mrb[20].mxu0 }
 0x1d1   : > { %v2771_v5 = vpop.f32.mrb[20].mxu1  ;;  %v2484_v6 = vpop.f32.mrb[21].mxu0 }
 0x1d2   : > { %v5396_v8 = vadd.f32 %v2771_v5, %v2482_v0  ;;  %v2773_v9 = vpop.f32.mrb[21].mxu1  ;;  %v2485_v10 = vpop.f32.mrb[22].mxu0 }
 0x1d3   : > { %v2774_v13 = vpop.f32.mrb[22].mxu1  ;;  %v2487_v15 = vpop.f32.mrb[23].mxu0 }
 0x1d4   : > { %v5398_v17 = vadd.f32 %v2774_v13, %v2485_v10  ;;  %v2776_v18 = vpop.f32.mrb[23].mxu1  ;;  %v4062_v13 = vcombine.high %v390_v63, %v394_v4 }
 0x1d5   : > { %3019 = vmatmul.mubr.bf16.vlgmr.msra.gmra.mrb[128].mxu0 %v4029_v7  ;;  %v4053_v7 = vcombine.low %v382_v39, %v386_v41  ;;  %v4064_v18 = vcombine.high %v391_v1, %v395_v2 }
 0x1d6   : > { %3308 = vmatmul.mubr.bf16.vlgmr.msra.gmra.mrb[128].mxu1 %v4031_v11  ;;  %3026 = vmatprep.mubr.bf16.mxu0 %v4038_v12  ;;  %v4055_v12 = vcombine.low %v383_v44, %v387_v45  ;;  %v406_v45 = vld [vmem:[%s4940_s24 + $0x190] sm:$0xff] }
 0x1d7   : > { %3315 = vmatprep.mubr.bf16.mxu1 %v4040_v16 }
 0x1d8   : > { %v2490_v21 = vpop.f32.mrb[24].mxu0 }
 0x1d9   : > { %v2779_v25 = vpop.f32.mrb[24].mxu1  ;;  %v2492_v26 = vpop.f32.mrb[25].mxu0 }
 0x1da   : > { %v5404_v28 = vadd.f32 %v2779_v25, %v2490_v21  ;;  %v2781_v29 = vpop.f32.mrb[25].mxu1  ;;  %v2493_v30 = vpop.f32.mrb[26].mxu0  ;;  %v398_v21 = vld [vmem:[%s4940_s24 + $0x150] sm:$0xff]  ;;  %v399_v25 = vld [vmem:[%s4940_s24 + $0x158] sm:$0xff] }
 0x1db   : > { %v2782_v34 = vpop.f32.mrb[26].mxu1  ;;  %v2495_v35 = vpop.f32.mrb[27].mxu0  ;;  %v403_v26 = vld [vmem:[%s4940_s24 + $0x178] sm:$0xff] }
 0x1dc   : > { %v5406_v37 = vadd.f32 %v2782_v34, %v2493_v30  ;;  %v2784_v38 = vpop.f32.mrb[27].mxu1  ;;  %v4061_v30 = vcombine.low %v390_v63, %v394_v4  ;;  %v4063_v35 = vcombine.low %v391_v1, %v395_v2  ;;  %v4072_v41 = vcombine.high %v399_v25, %v403_v26 }
 0x1dd   : > { %3027 = vmatmul.mubr.bf16.gmra.mrb[132].mxu0 %v4037_v27 }
 0x1de   : > { %3316 = vmatmul.mubr.bf16.gmra.mrb[132].mxu1 %v4039_v31  ;;  %3034 = vmatprep.mubr.bf16.mxu0 %v4046_v33 }
 0x1df   : > { %3323 = vmatprep.mubr.bf16.mxu1 %v4048_v36  ;;  %v4070_v36 = vcombine.high %v398_v21, %v402_v23 }
 0x1e0   : > { %v2498_v43 = vpop.f32.mrb[28].mxu0 }
 0x1e1   : > { %v2787_v46 = vpop.f32.mrb[28].mxu1  ;;  %v2500_v47 = vpop.f32.mrb[29].mxu0 }
 0x1e2   : > { %v5412_v49 = vadd.f32 %v2787_v46, %v2498_v43  ;;  %v2789_v51 = vpop.f32.mrb[29].mxu1  ;;  %v2501_v53 = vpop.f32.mrb[30].mxu0  ;;  %v410_v46 = vld [vmem:[%s4940_s24 + $0x1b0] sm:$0xff] }
 0x1e3   : > { %v2790_v56 = vpop.f32.mrb[30].mxu1  ;;  %v2503_v57 = vpop.f32.mrb[31].mxu0  ;;  %v411_v51 = vld [vmem:[%s4940_s24 + $0x1b8] sm:$0xff]  ;;  %v4078_v63 = vcombine.high %v406_v45, %v410_v46 }
 0x1e4   : > { %v5414_v59 = vadd.f32 %v2790_v56, %v2501_v53  ;;  %v2792_v62 = vpop.f32.mrb[31].mxu1 }
 0x1e5   : > { %3035 = vmatmul.mubr.bf16.gmra.mrb[136].mxu0 %v4045_v48  ;;  %v407_v48 = vld [vmem:[%s4940_s24 + $0x198] sm:$0xff]  ;;  %v4071_v62 = vcombine.low %v399_v25, %v403_v26 }
 0x1e6   : > { %3324 = vmatmul.mubr.bf16.gmra.mrb[136].mxu1 %v4047_v54  ;;  %3042 = vmatprep.mubr.bf16.mxu0 %v4054_v55  ;;  %v4069_v55 = vcombine.low %v398_v21, %v402_v23  ;;  %v4080_v1 = vcombine.high %v407_v48, %v411_v51  ;;  %v4079_v23 = vcombine.low %v407_v48, %v411_v51 }
 0x1e7   : > { %3331 = vmatprep.mubr.bf16.mxu1 %v4056_v58 }
 0x1e8   : > { %v2506_v0 = vpop.f32.mrb[32].mxu0 }
 0x1e9   : > { %v2795_v5 = vpop.f32.mrb[32].mxu1  ;;  %v2508_v6 = vpop.f32.mrb[33].mxu0 }
 0x1ea   : > { %v5420_v9 = vadd.f32 %v2795_v5, %v2506_v0  ;;  %v2797_v10 = vpop.f32.mrb[33].mxu1  ;;  %v2509_v11 = vpop.f32.mrb[34].mxu0  ;;  %v414_v6 = vld [vmem:[%s4940_s24 + $0x1d0] sm:$0xff] }
 0x1eb   : > { %v2798_v15 = vpop.f32.mrb[34].mxu1  ;;  %v2511_v16 = vpop.f32.mrb[35].mxu0 }
 0x1ec   : > { %v5422_v19 = vadd.f32 %v2798_v15, %v2509_v11  ;;  %v2800_v20 = vpop.f32.mrb[35].mxu1  ;;  %v415_v11 = vld [vmem:[%s4940_s24 + $0x1d8] sm:$0xff]  ;;  %v4077_v16 = vcombine.low %v406_v45, %v410_v46 }
 0x1ed   : > { %3043 = vmatmul.mubr.bf16.gmra.mrb[140].mxu0 %v4053_v7  ;;  %v418_v7 = vld [vmem:[%s4940_s24 + $0x1f0] sm:$0xff] }
 0x1ee   : > { %3332 = vmatmul.mubr.bf16.gmra.mrb[140].mxu1 %v4055_v12  ;;  %3050 = vmatprep.mubr.bf16.mxu0 %v4062_v13  ;;  %v419_v12 = vld [vmem:[%s4940_s24 + $0x1f8] sm:$0xff] }
 0x1ef   : > { %3339 = vmatprep.mubr.bf16.mxu1 %v4064_v18  ;;  %v4087_v48 = vcombine.low %v415_v11, %v419_v12 }
 0x1f0   : > { %v2514_v24 = vpop.f32.mrb[36].mxu0 }
 0x1f1   : > { %v2803_v27 = vpop.f32.mrb[36].mxu1  ;;  %v2516_v29 = vpop.f32.mrb[37].mxu0 }
 0x1f2   : > { %v5428_v31 = vadd.f32 %v2803_v27, %v2514_v24  ;;  %v2805_v33 = vpop.f32.mrb[37].mxu1  ;;  %v2517_v34 = vpop.f32.mrb[38].mxu0  ;;  %v4086_v24 = vcombine.high %v414_v6, %v418_v7  ;;  %v4088_v27 = vcombine.high %v415_v11, %v419_v12 }
 0x1f3   : > { %v2806_v38 = vpop.f32.mrb[38].mxu1  ;;  %v2519_v39 = vpop.f32.mrb[39].mxu0  ;;  %v422_v33 = vld [vmem:[%s4940_s24 + $0x210] sm:$0xff] }
 0x1f4   : > { %v5430_v43 = vadd.f32 %v2806_v38, %v2517_v34  ;;  %v2808_v44 = vpop.f32.mrb[39].mxu1  ;;  %v426_v34 = vld [vmem:[%s4940_s24 + $0x230] sm:$0xff]  ;;  %v427_v38 = vld [vmem:[%s4940_s24 + $0x238] sm:$0xff] }
 0x1f5   : > { %3051 = vmatmul.mubr.bf16.gmra.mrb[144].mxu0 %v4061_v30  ;;  %v4085_v44 = vcombine.low %v414_v6, %v418_v7  ;;  %v4094_v51 = vcombine.high %v422_v33, %v426_v34  ;;  %v4093_v7 = vcombine.low %v422_v33, %v426_v34  ;;  %v443_v33 = vld [vmem:[%s4940_s24 + $0x2b8] sm:$0xff] }
 0x1f6   : > { %3340 = vmatmul.mubr.bf16.gmra.mrb[144].mxu1 %v4063_v35  ;;  %3058 = vmatprep.mubr.bf16.mxu0 %v4070_v36  ;;  %v423_v36 = vld [vmem:[%s4940_s24 + $0x218] sm:$0xff] }
 0x1f7   : > { %3347 = vmatprep.mubr.bf16.mxu1 %v4072_v41 }
 0x1f8   : > { %v2522_v47 = vpop.f32.mrb[40].mxu0 }
 0x1f9   : > { %v2811_v53 = vpop.f32.mrb[40].mxu1  ;;  %v2524_v54 = vpop.f32.mrb[41].mxu0 }
 0x1fa   : > { %v5436_v56 = vadd.f32 %v2811_v53, %v2522_v47  ;;  %v2813_v57 = vpop.f32.mrb[41].mxu1  ;;  %v2525_v58 = vpop.f32.mrb[42].mxu0 }
 0x1fb   : > { %v2814_v4 = vpop.f32.mrb[42].mxu1  ;;  %v2527_v0 = vpop.f32.mrb[43].mxu0 }
 0x1fc   : > { %v5438_v2 = vadd.f32 %v2814_v4, %v2525_v58  ;;  %v2816_v5 = vpop.f32.mrb[43].mxu1  ;;  %v431_v0 = vld [vmem:[%s4940_s24 + $0x258] sm:$0xff] }
 0x1fd   : > { %3059 = vmatmul.mubr.bf16.gmra.mrb[148].mxu0 %v4069_v55  ;;  %v4096_v55 = vcombine.high %v423_v36, %v427_v38 }
 0x1fe   : > { %3348 = vmatmul.mubr.bf16.gmra.mrb[148].mxu1 %v4071_v62  ;;  %3066 = vmatprep.mubr.bf16.mxu0 %v4078_v63  ;;  %v430_v62 = vld [vmem:[%s4940_s24 + $0x250] sm:$0xff] }
 0x1ff   : > { %3355 = vmatprep.mubr.bf16.mxu1 %v4080_v1  ;;  %v434_v63 = vld [vmem:[%s4940_s24 + $0x270] sm:$0xff]  ;;  %v435_v1 = vld [vmem:[%s4940_s24 + $0x278] sm:$0xff] }
 0x200   : > { %v2530_v10 = vpop.f32.mrb[44].mxu0 }
 0x201   : > { %v2819_v13 = vpop.f32.mrb[44].mxu1  ;;  %v2532_v15 = vpop.f32.mrb[45].mxu0 }
 0x202   : > { %v5444_v18 = vadd.f32 %v2819_v13, %v2530_v10  ;;  %v2821_v20 = vpop.f32.mrb[45].mxu1  ;;  %v2533_v21 = vpop.f32.mrb[46].mxu0  ;;  %v4095_v13 = vcombine.low %v423_v36, %v427_v38  ;;  %v4102_v15 = vcombine.high %v430_v62, %v434_v63  ;;  %v4101_v36 = vcombine.low %v430_v62, %v434_v63  ;;  %v447_v63 = vld [vmem:[%s4940_s24 + $0x2d8] sm:$0xff] }
 0x203   : > { %v2822_v25 = vpop.f32.mrb[46].mxu1  ;;  %v2535_v26 = vpop.f32.mrb[47].mxu0 }
 0x204   : > { %v5446_v29 = vadd.f32 %v2822_v25, %v2533_v21  ;;  %v2824_v30 = vpop.f32.mrb[47].mxu1  ;;  %v4104_v21 = vcombine.high %v431_v0, %v435_v1  ;;  %v438_v25 = vld [vmem:[%s4940_s24 + $0x290] sm:$0xff] }
 0x205   : > { %3067 = vmatmul.mubr.bf16.gmra.mrb[152].mxu0 %v4077_v16  ;;  %v442_v26 = vld [vmem:[%s4940_s24 + $0x2b0] sm:$0xff]  ;;  %v439_v30 = vld [vmem:[%s4940_s24 + $0x298] sm:$0xff] }
 0x206   : > { %3356 = vmatmul.mubr.bf16.gmra.mrb[152].mxu1 %v4079_v23  ;;  %3074 = vmatprep.mubr.bf16.mxu0 %v4086_v24 }
 0x207   : > { %3363 = vmatprep.mubr.bf16.mxu1 %v4088_v27 }
 0x208   : > { %v2538_v35 = vpop.f32.mrb[48].mxu0 }
 0x209   : > { %v2827_v39 = vpop.f32.mrb[48].mxu1  ;;  %v2540_v41 = vpop.f32.mrb[49].mxu0 }
 0x20a   : > { %v5452_v45 = vadd.f32 %v2827_v39, %v2538_v35  ;;  %v2829_v46 = vpop.f32.mrb[49].mxu1  ;;  %v2541_v47 = vpop.f32.mrb[50].mxu0 }
 0x20b   : > { %v2830_v53 = vpop.f32.mrb[50].mxu1  ;;  %v2543_v54 = vpop.f32.mrb[51].mxu0  ;;  %v4110_v46 = vcombine.high %v438_v25, %v442_v26 }
 0x20c   : > { %v5454_v57 = vadd.f32 %v2830_v53, %v2541_v47  ;;  %v2832_v58 = vpop.f32.mrb[51].mxu1 }
 0x20d   : > { %3075 = vmatmul.mubr.bf16.gmra.mrb[156].mxu0 %v4085_v44  ;;  %v4103_v44 = vcombine.low %v431_v0, %v435_v1  ;;  %v450_v58 = vld [vmem:[%s4940_s24 + $0x2f0] sm:$0xff]  ;;  %v4109_v0 = vcombine.low %v438_v25, %v442_v26 }
 0x20e   : > { %3364 = vmatmul.mubr.bf16.gmra.mrb[156].mxu1 %v4087_v48  ;;  %3082 = vmatprep.mubr.bf16.mxu0 %v4094_v51  ;;  %v4112_v51 = vcombine.high %v439_v30, %v443_v33  ;;  %v454_v25 = vld [vmem:[%s4940_s24 + $0x310] sm:$0xff] }
 0x20f   : > { %3371 = vmatprep.mubr.bf16.mxu1 %v4096_v55  ;;  %v446_v55 = vld [vmem:[%s4940_s24 + $0x2d0] sm:$0xff] }
 0x210   : > { %v2546_v4 = vpop.f32.mrb[52].mxu0  ;;  %v458_v26 = vld [vmem:[%s4940_s24 + $0x330] sm:$0xff] }
 0x211   : > { %v2835_v5 = vpop.f32.mrb[52].mxu1  ;;  %v2548_v6 = vpop.f32.mrb[53].mxu0 }
 0x212   : > { %v5460_v10 = vadd.f32 %v2835_v5, %v2546_v4  ;;  %v2837_v11 = vpop.f32.mrb[53].mxu1  ;;  %v2549_v12 = vpop.f32.mrb[54].mxu0  ;;  %v451_v4 = vld [vmem:[%s4940_s24 + $0x2f8] sm:$0xff] }
 0x213   : > { %v2838_v16 = vpop.f32.mrb[54].mxu1  ;;  %v2551_v20 = vpop.f32.mrb[55].mxu0 }
 0x214   : > { %v5462_v23 = vadd.f32 %v2838_v16, %v2549_v12  ;;  %v2840_v24 = vpop.f32.mrb[55].mxu1  ;;  %v4111_v12 = vcombine.low %v439_v30, %v443_v33  ;;  %v4120_v20 = vcombine.high %v447_v63, %v451_v4  ;;  %v4117_v30 = vcombine.low %v446_v55, %v450_v58 }
 0x215   : > { %3083 = vmatmul.mubr.bf16.gmra.mrb[160].mxu0 %v4093_v7 }
 0x216   : > { %3372 = vmatmul.mubr.bf16.gmra.mrb[160].mxu1 %v4095_v13  ;;  %3090 = vmatprep.mubr.bf16.mxu0 %v4102_v15  ;;  %v4118_v13 = vcombine.high %v446_v55, %v450_v58  ;;  %v462_v55 = vld [vmem:[%s4940_s24 + $0x350] sm:$0xff] }
 0x217   : > { %3379 = vmatprep.mubr.bf16.mxu1 %v4104_v21  ;;  %v466_v58 = vld [vmem:[%s4940_s24 + $0x370] sm:$0xff] }
 0x218   : > { %v2554_v27 = vpop.f32.mrb[56].mxu0 }
 0x219   : > { %v2843_v34 = vpop.f32.mrb[56].mxu1  ;;  %v2556_v35 = vpop.f32.mrb[57].mxu0 }
 0x21a   : > { %v5468_v38 = vadd.f32 %v2843_v34, %v2554_v27  ;;  %v2845_v39 = vpop.f32.mrb[57].mxu1  ;;  %v2557_v41 = vpop.f32.mrb[58].mxu0  ;;  %v455_v34 = vld [vmem:[%s4940_s24 + $0x318] sm:$0xff] }
 0x21b   : > { %v2846_v47 = vpop.f32.mrb[58].mxu1  ;;  %v2559_v48 = vpop.f32.mrb[59].mxu0  ;;  %v459_v35 = vld [vmem:[%s4940_s24 + $0x338] sm:$0xff] }
 0x21c   : > { %v5470_v53 = vadd.f32 %v2846_v47, %v2557_v41  ;;  %v2848_v54 = vpop.f32.mrb[59].mxu1  ;;  %v4126_v47 = vcombine.high %v454_v25, %v458_v26 }
 0x21d   : > { %3091 = vmatmul.mubr.bf16.gmra.mrb[164].mxu0 %v4101_v36  ;;  %v4128_v54 = vcombine.high %v455_v34, %v459_v35 }
 0x21e   : > { %3380 = vmatmul.mubr.bf16.gmra.mrb[164].mxu1 %v4103_v44  ;;  %3098 = vmatprep.mubr.bf16.mxu0 %v4110_v46  ;;  %v4119_v46 = vcombine.low %v447_v63, %v451_v4  ;;  %v4125_v63 = vcombine.low %v454_v25, %v458_v26  ;;  %v470_v25 = vld [vmem:[%s4940_s24 + $0x390] sm:$0xff] }
 0x21f   : > { %3387 = vmatprep.mubr.bf16.mxu1 %v4112_v51  ;;  %v474_v26 = vld [vmem:[%s4940_s24 + $0x3b0] sm:$0xff] }
 0x220   : > { %v2562_v62 = vpop.f32.mrb[60].mxu0 }
 0x221   : > { %v2851_v5 = vpop.f32.mrb[60].mxu1  ;;  %v2564_v6 = vpop.f32.mrb[61].mxu0 }
 0x222   : > { %v5476_v1 = vadd.f32 %v2851_v5, %v2562_v62  ;;  %v2853_v7 = vpop.f32.mrb[61].mxu1  ;;  %v2565_v11 = vpop.f32.mrb[62].mxu0 }
 0x223   : > { %v2854_v15 = vpop.f32.mrb[62].mxu1  ;;  %v2567_v16 = vpop.f32.mrb[63].mxu0  ;;  %v467_v7 = vld [vmem:[%s4940_s24 + $0x378] sm:$0xff] }
 0x224   : > { %v5478_v21 = vadd.f32 %v2854_v15, %v2565_v11  ;;  %v2856_v24 = vpop.f32.mrb[63].mxu1  ;;  %v4127_v16 = vcombine.low %v455_v34, %v459_v35  ;;  %v4133_v34 = vcombine.low %v462_v55, %v466_v58 }
 0x225   : > { %3099 = vmatmul.mubr.bf16.gmra.mrb[168].mxu0 %v4109_v0  ;;  %v463_v0 = vld [vmem:[%s4940_s24 + $0x358] sm:$0xff] }
 0x226   : > { %3388 = vmatmul.mubr.bf16.gmra.mrb[168].mxu1 %v4111_v12  ;;  %3106 = vmatprep.mubr.bf16.mxu0 %v4118_v13 }
 0x227   : > { %3395 = vmatprep.mubr.bf16.mxu1 %v4120_v20  ;;  %v4134_v20 = vcombine.high %v462_v55, %v466_v58  ;;  %v478_v55 = vld [vmem:[%s4940_s24 + $0x3d0] sm:$0xff] }
 0x228   : > { %v2570_v27 = vpop.f32.mrb[64].mxu0  ;;  %v482_v58 = vld [vmem:[%s4940_s24 + $0x3f0] sm:$0xff] }
 0x229   : > { %v2859_v36 = vpop.f32.mrb[64].mxu1  ;;  %v2572_v39 = vpop.f32.mrb[65].mxu0 }
 0x22a   : > { %v5484_v33 = vadd.f32 %v2859_v36, %v2570_v27  ;;  %v2861_v41 = vpop.f32.mrb[65].mxu1  ;;  %v2573_v44 = vpop.f32.mrb[66].mxu0  ;;  %v4136_v36 = vcombine.high %v463_v0, %v467_v7 }
 0x22b   : > { %v2862_v48 = vpop.f32.mrb[66].mxu1  ;;  %v2575_v51 = vpop.f32.mrb[67].mxu0 }
 0x22c   : > { %v5486_v62 = vadd.f32 %v2862_v48, %v2573_v44  ;;  %v2864_v5 = vpop.f32.mrb[67].mxu1  ;;  %v471_v44 = vld [vmem:[%s4940_s24 + $0x398] sm:$0xff] }
 0x22d   : > { %3107 = vmatmul.mubr.bf16.gmra.mrb[172].mxu0 %v4117_v30  ;;  %v4135_v5 = vcombine.low %v463_v0, %v467_v7  ;;  %v4141_v0 = vcombine.low %v470_v25, %v474_v26 }
 0x22e   : > { %3396 = vmatmul.mubr.bf16.gmra.mrb[172].mxu1 %v4119_v46  ;;  %3114 = vmatprep.mubr.bf16.mxu0 %v4126_v47  ;;  %v475_v46 = vld [vmem:[%s4940_s24 + $0x3b8] sm:$0xff] }
 0x22f   : > { %3403 = vmatprep.mubr.bf16.mxu1 %v4128_v54 }
 0x230   : > { %v2578_v6 = vpop.f32.mrb[68].mxu0 }
 0x231   : > { %v2867_v11 = vpop.f32.mrb[68].mxu1  ;;  %v2580_v12 = vpop.f32.mrb[69].mxu0 }
 0x232   : > { %v5492_v4 = vadd.f32 %v2867_v11, %v2578_v6  ;;  %v2869_v13 = vpop.f32.mrb[69].mxu1  ;;  %v2581_v15 = vpop.f32.mrb[70].mxu0  ;;  %v4142_v6 = vcombine.high %v470_v25, %v474_v26  ;;  %v486_v25 = vld [vmem:[%s4940_s24 + $0x410] sm:$0xff] }
 0x233   : > { %v2870_v24 = vpop.f32.mrb[70].mxu1  ;;  %v2583_v27 = vpop.f32.mrb[71].mxu0  ;;  %v490_v26 = vld [vmem:[%s4940_s24 + $0x430] sm:$0xff] }
 0x234   : > { %v5494_v39 = vadd.f32 %v2870_v24, %v2581_v15  ;;  %v2872_v30 = vpop.f32.mrb[71].mxu1  ;;  %v483_v24 = vld [vmem:[%s4940_s24 + $0x3f8] sm:$0xff] }
 0x235   : > { %3115 = vmatmul.mubr.bf16.gmra.mrb[176].mxu0 %v4125_v63  ;;  %v4144_v63 = vcombine.high %v471_v44, %v475_v46 }
 0x236   : > { %3404 = vmatmul.mubr.bf16.gmra.mrb[176].mxu1 %v4127_v16  ;;  %3122 = vmatprep.mubr.bf16.mxu0 %v4134_v20  ;;  %v479_v20 = vld [vmem:[%s4940_s24 + $0x3d8] sm:$0xff] }
 0x237   : > { %3411 = vmatprep.mubr.bf16.mxu1 %v4136_v36 }
 0x238   : > { %v2586_v41 = vpop.f32.mrb[72].mxu0 }
 0x239   : > { %v2875_v47 = vpop.f32.mrb[72].mxu1  ;;  %v2588_v48 = vpop.f32.mrb[73].mxu0 }
 0x23a   : > { %v5500_v35 = vadd.f32 %v2875_v47, %v2586_v41  ;;  %v2877_v51 = vpop.f32.mrb[73].mxu1  ;;  %v2589_v54 = vpop.f32.mrb[74].mxu0  ;;  %v4143_v47 = vcombine.low %v471_v44, %v475_v46  ;;  %v4150_v48 = vcombine.high %v478_v55, %v482_v58  ;;  %v4149_v44 = vcombine.low %v478_v55, %v482_v58  ;;  %v494_v55 = vld [vmem:[%s4940_s24 + $0x450] sm:$0xff] }
 0x23b   : > { %v2878_v11 = vpop.f32.mrb[74].mxu1  ;;  %v2591_v12 = vpop.f32.mrb[75].mxu0  ;;  %v498_v58 = vld [vmem:[%s4940_s24 + $0x470] sm:$0xff] }
 0x23c   : > { %v5502_v13 = vadd.f32 %v2878_v11, %v2589_v54  ;;  %v2880_v15 = vpop.f32.mrb[75].mxu1  ;;  %v4152_v54 = vcombine.high %v479_v20, %v483_v24  ;;  %v487_v12 = vld [vmem:[%s4940_s24 + $0x418] sm:$0xff] }
 0x23d   : > { %3123 = vmatmul.mubr.bf16.gmra.mrb[180].mxu0 %v4133_v34 }
 0x23e   : > { %3412 = vmatmul.mubr.bf16.gmra.mrb[180].mxu1 %v4135_v5  ;;  %3130 = vmatprep.mubr.bf16.mxu0 %v4142_v6 }
 0x23f   : > { %3419 = vmatprep.mubr.bf16.mxu1 %v4144_v63  ;;  %v491_v63 = vld [vmem:[%s4940_s24 + $0x438] sm:$0xff] }
 0x240   : > { %v2594_v16 = vpop.f32.mrb[76].mxu0 }
 0x241   : > { %v2883_v27 = vpop.f32.mrb[76].mxu1  ;;  %v2596_v36 = vpop.f32.mrb[77].mxu0 }
 0x242   : > { %v5508_v7 = vadd.f32 %v2883_v27, %v2594_v16  ;;  %v2885_v30 = vpop.f32.mrb[77].mxu1  ;;  %v2597_v41 = vpop.f32.mrb[78].mxu0 }
 0x243   : > { %v2886_v34 = vpop.f32.mrb[78].mxu1  ;;  %v2599_v51 = vpop.f32.mrb[79].mxu0  ;;  %v4158_v30 = vcombine.high %v486_v25, %v490_v26 }
 0x244   : > { %v5510_v5 = vadd.f32 %v2886_v34, %v2597_v41  ;;  %v2888_v6 = vpop.f32.mrb[79].mxu1 }
 0x245   : > { %3131 = vmatmul.mubr.bf16.gmra.mrb[184].mxu0 %v4141_v0  ;;  %v4151_v0 = vcombine.low %v479_v20, %v483_v24  ;;  %v495_v6 = vld [vmem:[%s4940_s24 + $0x458] sm:$0xff]  ;;  %v4157_v20 = vcombine.low %v486_v25, %v490_v26  ;;  %v502_v25 = vld [vmem:[%s4940_s24 + $0x490] sm:$0xff] }
 0x246   : > { %3420 = vmatmul.mubr.bf16.gmra.mrb[184].mxu1 %v4143_v47  ;;  %3138 = vmatprep.mubr.bf16.mxu0 %v4150_v48  ;;  %v4160_v48 = vcombine.high %v487_v12, %v491_v63  ;;  %v506_v26 = vld [vmem:[%s4940_s24 + $0x4b0] sm:$0xff] }
 0x247   : > { %3427 = vmatprep.mubr.bf16.mxu1 %v4152_v54 }
 0x248   : > { %v2602_v11 = vpop.f32.mrb[80].mxu0 }
 0x249   : > { %v2891_v15 = vpop.f32.mrb[80].mxu1  ;;  %v2604_v16 = vpop.f32.mrb[81].mxu0 }
 0x24a   : > { %v5516_v46 = vadd.f32 %v2891_v15, %v2602_v11  ;;  %v2893_v27 = vpop.f32.mrb[81].mxu1  ;;  %v2605_v36 = vpop.f32.mrb[82].mxu0  ;;  %v499_v11 = vld [vmem:[%s4940_s24 + $0x478] sm:$0xff] }
 0x24b   : > { %v2894_v41 = vpop.f32.mrb[82].mxu1  ;;  %v2607_v47 = vpop.f32.mrb[83].mxu0 }
 0x24c   : > { %v5518_v34 = vadd.f32 %v2894_v41, %v2605_v36  ;;  %v2896_v51 = vpop.f32.mrb[83].mxu1  ;;  %v4168_v47 = vcombine.high %v495_v6, %v499_v11 }
 0x24d   : > { %3139 = vmatmul.mubr.bf16.gmra.mrb[188].mxu0 %v4149_v44  ;;  %v4159_v44 = vcombine.low %v487_v12, %v491_v63  ;;  %v4165_v12 = vcombine.low %v494_v55, %v498_v58 }
 0x24e   : > { %6119 = vst [vmem:[#allocation16_spill] sm:$0xff] %v5518_v34  ;;  %3428 = vmatmul.mubr.bf16.gmra.mrb[188].mxu1 %v4151_v0  ;;  %3146 = vmatprep.mubr.bf16.mxu0 %v4158_v30  ;;  %v4166_v0 = vcombine.high %v494_v55, %v498_v58  ;;  %v510_v55 = vld [vmem:[%s4940_s24 + $0x4d0] sm:$0xff] }
 0x24f   : > { %3435 = vmatprep.mubr.bf16.mxu1 %v4160_v48  ;;  %v514_v58 = vld [vmem:[%s4940_s24 + $0x4f0] sm:$0xff] }
 0x250   : > { %v2610_v54 = vpop.f32.mrb[84].mxu0 }
 0x251   : > { %v2899_v15 = vpop.f32.mrb[84].mxu1  ;;  %v2612_v16 = vpop.f32.mrb[85].mxu0 }
 0x252   : > { %v5524_v24 = vadd.f32 %v2899_v15, %v2610_v54  ;;  %v2901_v27 = vpop.f32.mrb[85].mxu1  ;;  %v2613_v36 = vpop.f32.mrb[86].mxu0  ;;  %v503_v15 = vld [vmem:[%s4940_s24 + $0x498] sm:$0xff] }
 0x253   : > { %v2902_v30 = vpop.f32.mrb[86].mxu1  ;;  %v2615_v41 = vpop.f32.mrb[87].mxu0  ;;  %v507_v16 = vld [vmem:[%s4940_s24 + $0x4b8] sm:$0xff] }
 0x254   : > { %6120 = vst [vmem:[#allocation17_spill] sm:$0xff] %v5524_v24  ;;  %v5526_v48 = vadd.f32 %v2902_v30, %v2613_v36  ;;  %v2904_v51 = vpop.f32.mrb[87].mxu1 }
 0x255   : > { %3147 = vmatmul.mubr.bf16.gmra.mrb[192].mxu0 %v4157_v20  ;;  %v4167_v20 = vcombine.low %v495_v6, %v499_v11  ;;  %v4173_v6 = vcombine.low %v502_v25, %v506_v26 }
 0x256   : > { %6121 = vst [vmem:[#allocation18_spill] sm:$0xff] %v5526_v48  ;;  %3436 = vmatmul.mubr.bf16.gmra.mrb[192].mxu1 %v4159_v44  ;;  %3154 = vmatprep.mubr.bf16.mxu0 %v4166_v0  ;;  %v4174_v44 = vcombine.high %v502_v25, %v506_v26  ;;  %v518_v25 = vld [vmem:[%s4940_s24 + $0x510] sm:$0xff] }
 0x257   : > { %3443 = vmatprep.mubr.bf16.mxu1 %v4168_v47  ;;  %v4176_v47 = vcombine.high %v503_v15, %v507_v16  ;;  %v522_v26 = vld [vmem:[%s4940_s24 + $0x530] sm:$0xff] }
 0x258   : > { %v2618_v54 = vpop.f32.mrb[88].mxu0 }
 0x259   : > { %v2907_v27 = vpop.f32.mrb[88].mxu1  ;;  %v2620_v24 = vpop.f32.mrb[89].mxu0 }
 0x25a   : > { %v5532_v63 = vadd.f32 %v2907_v27, %v2618_v54  ;;  %v2909_v41 = vpop.f32.mrb[89].mxu1  ;;  %v2621_v36 = vpop.f32.mrb[90].mxu0  ;;  %v511_v54 = vld [vmem:[%s4940_s24 + $0x4d8] sm:$0xff] }
 0x25b   : > { %v2910_v0 = vpop.f32.mrb[90].mxu1  ;;  %v2623_v30 = vpop.f32.mrb[91].mxu0  ;;  %v515_v27 = vld [vmem:[%s4940_s24 + $0x4f8] sm:$0xff] }
 0x25c   : > { %6122 = vst [vmem:[#allocation19_spill] sm:$0xff] %v5532_v63  ;;  %v5534_v51 = vadd.f32 %v2910_v0, %v2621_v36  ;;  %v2912_v48 = vpop.f32.mrb[91].mxu1  ;;  %v4184_v0 = vcombine.high %v511_v54, %v515_v27 }
 0x25d   : > { %3155 = vmatmul.mubr.bf16.gmra.mrb[196].mxu0 %v4165_v12  ;;  %v4175_v48 = vcombine.low %v503_v15, %v507_v16  ;;  %v4182_v12 = vcombine.high %v510_v55, %v514_v58  ;;  %v4181_v15 = vcombine.low %v510_v55, %v514_v58  ;;  %v526_v55 = vld [vmem:[%s4940_s24 + $0x550] sm:$0xff] }
 0x25e   : > { %6123 = vst [vmem:[#allocation20_spill] sm:$0xff] %v5534_v51  ;;  %3444 = vmatmul.mubr.bf16.gmra.mrb[196].mxu1 %v4167_v20  ;;  %3162 = vmatprep.mubr.bf16.mxu0 %v4174_v44  ;;  %v530_v58 = vld [vmem:[%s4940_s24 + $0x570] sm:$0xff] }
 0x25f   : > { %3451 = vmatprep.mubr.bf16.mxu1 %v4176_v47 }
 0x260   : > { %v2626_v24 = vpop.f32.mrb[92].mxu0 }
 0x261   : > { %v2915_v41 = vpop.f32.mrb[92].mxu1  ;;  %v2628_v63 = vpop.f32.mrb[93].mxu0 }
 0x262   : > { %v5540_v11 = vadd.f32 %v2915_v41, %v2626_v24  ;;  %v2917_v30 = vpop.f32.mrb[93].mxu1  ;;  %v2629_v36 = vpop.f32.mrb[94].mxu0  ;;  %v519_v24 = vld [vmem:[%s4940_s24 + $0x518] sm:$0xff] }
 0x263   : > { %v2918_v20 = vpop.f32.mrb[94].mxu1  ;;  %v2631_v44 = vpop.f32.mrb[95].mxu0  ;;  %v523_v41 = vld [vmem:[%s4940_s24 + $0x538] sm:$0xff] }
 0x264   : > { %6124 = vst [vmem:[#allocation21_spill] sm:$0xff] %v5540_v11  ;;  %v5542_v47 = vadd.f32 %v2918_v20, %v2629_v36  ;;  %v2920_v51 = vpop.f32.mrb[95].mxu1  ;;  %v4192_v20 = vcombine.high %v519_v24, %v523_v41 }
 0x265   : > { %3163 = vmatmul.mubr.bf16.gmra.mrb[200].mxu0 %v4173_v6  ;;  %v4183_v51 = vcombine.low %v511_v54, %v515_v27  ;;  %v4190_v6 = vcombine.high %v518_v25, %v522_v26  ;;  %v4189_v54 = vcombine.low %v518_v25, %v522_v26  ;;  %v534_v25 = vld [vmem:[%s4940_s24 + $0x590] sm:$0xff] }
 0x266   : > { %6125 = vst [vmem:[#allocation22_spill] sm:$0xff] %v5542_v47  ;;  %3452 = vmatmul.mubr.bf16.gmra.mrb[200].mxu1 %v4175_v48  ;;  %3170 = vmatprep.mubr.bf16.mxu0 %v4182_v12  ;;  %v538_v26 = vld [vmem:[%s4940_s24 + $0x5b0] sm:$0xff] }
 0x267   : > { %3459 = vmatprep.mubr.bf16.mxu1 %v4184_v0 }
 0x268   : > { %v2634_v63 = vpop.f32.mrb[96].mxu0 }
 0x269   : > { %v2923_v30 = vpop.f32.mrb[96].mxu1  ;;  %v2636_v11 = vpop.f32.mrb[97].mxu0 }
 0x26a   : > { %v5548_v16 = vadd.f32 %v2923_v30, %v2634_v63  ;;  %v2925_v44 = vpop.f32.mrb[97].mxu1  ;;  %v2637_v36 = vpop.f32.mrb[98].mxu0  ;;  %v527_v63 = vld [vmem:[%s4940_s24 + $0x558] sm:$0xff] }
 0x26b   : > { %v2926_v48 = vpop.f32.mrb[98].mxu1  ;;  %v2639_v12 = vpop.f32.mrb[99].mxu0  ;;  %v531_v30 = vld [vmem:[%s4940_s24 + $0x578] sm:$0xff] }
 0x26c   : > { %6126 = vst [vmem:[#allocation23_spill] sm:$0xff] %v5548_v16  ;;  %v5550_v0 = vadd.f32 %v2926_v48, %v2637_v36  ;;  %v2928_v47 = vpop.f32.mrb[99].mxu1  ;;  %v4200_v48 = vcombine.high %v527_v63, %v531_v30 }
 0x26d   : > { %3171 = vmatmul.mubr.bf16.gmra.mrb[204].mxu0 %v4181_v15  ;;  %v4191_v47 = vcombine.low %v519_v24, %v523_v41  ;;  %v4198_v15 = vcombine.high %v526_v55, %v530_v58  ;;  %v4197_v24 = vcombine.low %v526_v55, %v530_v58  ;;  %v542_v55 = vld [vmem:[%s4940_s24 + $0x5d0] sm:$0xff] }
 0x26e   : > { %6127 = vst [vmem:[#allocation24_spill] sm:$0xff] %v5550_v0  ;;  %3460 = vmatmul.mubr.bf16.gmra.mrb[204].mxu1 %v4183_v51  ;;  %3178 = vmatprep.mubr.bf16.mxu0 %v4190_v6  ;;  %v546_v58 = vld [vmem:[%s4940_s24 + $0x5f0] sm:$0xff] }
 0x26f   : > { %3467 = vmatprep.mubr.bf16.mxu1 %v4192_v20 }
 0x270   : > { %v2642_v11 = vpop.f32.mrb[100].mxu0 }
 0x271   : > { %v2931_v44 = vpop.f32.mrb[100].mxu1  ;;  %v2644_v16 = vpop.f32.mrb[101].mxu0 }
 0x272   : > { %v5556_v27 = vadd.f32 %v2931_v44, %v2642_v11  ;;  %v2933_v12 = vpop.f32.mrb[101].mxu1  ;;  %v2645_v36 = vpop.f32.mrb[102].mxu0  ;;  %v535_v11 = vld [vmem:[%s4940_s24 + $0x598] sm:$0xff] }
 0x273   : > { %v2934_v51 = vpop.f32.mrb[102].mxu1  ;;  %v2647_v6 = vpop.f32.mrb[103].mxu0  ;;  %v539_v44 = vld [vmem:[%s4940_s24 + $0x5b8] sm:$0xff] }
 0x274   : > { %6128 = vst [vmem:[#allocation25_spill] sm:$0xff] %v5556_v27  ;;  %v5558_v20 = vadd.f32 %v2934_v51, %v2645_v36  ;;  %v2936_v0 = vpop.f32.mrb[103].mxu1  ;;  %v4208_v51 = vcombine.high %v535_v11, %v539_v44 }
 0x275   : > { %3179 = vmatmul.mubr.bf16.gmra.mrb[208].mxu0 %v4189_v54  ;;  %v4199_v0 = vcombine.low %v527_v63, %v531_v30  ;;  %v4206_v54 = vcombine.high %v534_v25, %v538_v26  ;;  %v4205_v63 = vcombine.low %v534_v25, %v538_v26  ;;  %v550_v25 = vld [vmem:[%s4940_s24 + $0x610] sm:$0xff] }
 0x276   : > { %6129 = vst [vmem:[#allocation26_spill] sm:$0xff] %v5558_v20  ;;  %3468 = vmatmul.mubr.bf16.gmra.mrb[208].mxu1 %v4191_v47  ;;  %3186 = vmatprep.mubr.bf16.mxu0 %v4198_v15  ;;  %v554_v26 = vld [vmem:[%s4940_s24 + $0x630] sm:$0xff] }
 0x277   : > { %3475 = vmatprep.mubr.bf16.mxu1 %v4200_v48 }
 0x278   : > { %v2650_v16 = vpop.f32.mrb[104].mxu0 }
 0x279   : > { %v2939_v12 = vpop.f32.mrb[104].mxu1  ;;  %v2652_v27 = vpop.f32.mrb[105].mxu0 }
 0x27a   : > { %v5564_v41 = vadd.f32 %v2939_v12, %v2650_v16  ;;  %v2941_v6 = vpop.f32.mrb[105].mxu1  ;;  %v2653_v36 = vpop.f32.mrb[106].mxu0  ;;  %v543_v16 = vld [vmem:[%s4940_s24 + $0x5d8] sm:$0xff] }
 0x27b   : > { %v2942_v47 = vpop.f32.mrb[106].mxu1  ;;  %v2655_v15 = vpop.f32.mrb[107].mxu0  ;;  %v547_v12 = vld [vmem:[%s4940_s24 + $0x5f8] sm:$0xff] }
 0x27c   : > { %6130 = vst [vmem:[#allocation27_spill] sm:$0xff] %v5564_v41  ;;  %v5566_v48 = vadd.f32 %v2942_v47, %v2653_v36  ;;  %v2944_v20 = vpop.f32.mrb[107].mxu1  ;;  %v4216_v47 = vcombine.high %v543_v16, %v547_v12 }
 0x27d   : > { %3187 = vmatmul.mubr.bf16.gmra.mrb[212].mxu0 %v4197_v24  ;;  %v4207_v20 = vcombine.low %v535_v11, %v539_v44  ;;  %v4214_v24 = vcombine.high %v542_v55, %v546_v58  ;;  %v4213_v11 = vcombine.low %v542_v55, %v546_v58  ;;  %v558_v55 = vld [vmem:[%s4940_s24 + $0x650] sm:$0xff] }
 0x27e   : > { %6131 = vst [vmem:[#allocation28_spill] sm:$0xff] %v5566_v48  ;;  %3476 = vmatmul.mubr.bf16.gmra.mrb[212].mxu1 %v4199_v0  ;;  %3194 = vmatprep.mubr.bf16.mxu0 %v4206_v54  ;;  %v562_v58 = vld [vmem:[%s4940_s24 + $0x670] sm:$0xff] }
 0x27f   : > { %3483 = vmatprep.mubr.bf16.mxu1 %v4208_v51 }
 0x280   : > { %v2658_v27 = vpop.f32.mrb[108].mxu0 }
 0x281   : > { %v2947_v6 = vpop.f32.mrb[108].mxu1  ;;  %v2660_v41 = vpop.f32.mrb[109].mxu0 }
 0x282   : > { %v5572_v30 = vadd.f32 %v2947_v6, %v2658_v27  ;;  %v2949_v15 = vpop.f32.mrb[109].mxu1  ;;  %v2661_v36 = vpop.f32.mrb[110].mxu0  ;;  %v551_v27 = vld [vmem:[%s4940_s24 + $0x618] sm:$0xff] }
 0x283   : > { %v2950_v0 = vpop.f32.mrb[110].mxu1  ;;  %v2663_v54 = vpop.f32.mrb[111].mxu0  ;;  %v555_v6 = vld [vmem:[%s4940_s24 + $0x638] sm:$0xff] }
 0x284   : > { %6132 = vst [vmem:[#allocation29_spill] sm:$0xff] %v5572_v30  ;;  %v5574_v51 = vadd.f32 %v2950_v0, %v2661_v36  ;;  %v2952_v48 = vpop.f32.mrb[111].mxu1  ;;  %v4224_v0 = vcombine.high %v551_v27, %v555_v6 }
 0x285   : > { %3195 = vmatmul.mubr.bf16.gmra.mrb[216].mxu0 %v4205_v63  ;;  %v4215_v48 = vcombine.low %v543_v16, %v547_v12  ;;  %v4222_v63 = vcombine.high %v550_v25, %v554_v26  ;;  %v4221_v16 = vcombine.low %v550_v25, %v554_v26  ;;  %v566_v25 = vld [vmem:[%s4940_s24 + $0x690] sm:$0xff] }
 0x286   : > { %6133 = vst [vmem:[#allocation30_spill] sm:$0xff] %v5574_v51  ;;  %3484 = vmatmul.mubr.bf16.gmra.mrb[216].mxu1 %v4207_v20  ;;  %3202 = vmatprep.mubr.bf16.mxu0 %v4214_v24  ;;  %v570_v26 = vld [vmem:[%s4940_s24 + $0x6b0] sm:$0xff] }
 0x287   : > { %3491 = vmatprep.mubr.bf16.mxu1 %v4216_v47 }
 0x288   : > { %v2666_v41 = vpop.f32.mrb[112].mxu0 }
 0x289   : > { %v2955_v15 = vpop.f32.mrb[112].mxu1  ;;  %v2668_v30 = vpop.f32.mrb[113].mxu0 }
 0x28a   : > { %v5580_v44 = vadd.f32 %v2955_v15, %v2666_v41  ;;  %v2957_v54 = vpop.f32.mrb[113].mxu1  ;;  %v2669_v36 = vpop.f32.mrb[114].mxu0  ;;  %v559_v41 = vld [vmem:[%s4940_s24 + $0x658] sm:$0xff] }
 0x28b   : > { %v2958_v20 = vpop.f32.mrb[114].mxu1  ;;  %v2671_v24 = vpop.f32.mrb[115].mxu0  ;;  %v563_v15 = vld [vmem:[%s4940_s24 + $0x678] sm:$0xff] }
 0x28c   : > { %6134 = vst [vmem:[#allocation31_spill] sm:$0xff] %v5580_v44  ;;  %v5582_v47 = vadd.f32 %v2958_v20, %v2669_v36  ;;  %v2960_v51 = vpop.f32.mrb[115].mxu1  ;;  %v4232_v20 = vcombine.high %v559_v41, %v563_v15 }
 0x28d   : > { %3203 = vmatmul.mubr.bf16.gmra.mrb[220].mxu0 %v4213_v11  ;;  %v4223_v51 = vcombine.low %v551_v27, %v555_v6  ;;  %v4230_v11 = vcombine.high %v558_v55, %v562_v58  ;;  %v4229_v27 = vcombine.low %v558_v55, %v562_v58  ;;  %v574_v55 = vld [vmem:[%s4940_s24 + $0x6d0] sm:$0xff] }
 0x28e   : > { %6135 = vst [vmem:[#allocation32_spill] sm:$0xff] %v5582_v47  ;;  %3492 = vmatmul.mubr.bf16.gmra.mrb[220].mxu1 %v4215_v48  ;;  %3210 = vmatprep.mubr.bf16.mxu0 %v4222_v63  ;;  %v578_v58 = vld [vmem:[%s4940_s24 + $0x6f0] sm:$0xff] }
 0x28f   : > { %3499 = vmatprep.mubr.bf16.mxu1 %v4224_v0 }
 0x290   : > { %v2674_v30 = vpop.f32.mrb[116].mxu0 }
 0x291   : > { %v2963_v54 = vpop.f32.mrb[116].mxu1  ;;  %v2676_v44 = vpop.f32.mrb[117].mxu0 }
 0x292   : > { %v5588_v12 = vadd.f32 %v2963_v54, %v2674_v30  ;;  %v2965_v24 = vpop.f32.mrb[117].mxu1  ;;  %v2677_v36 = vpop.f32.mrb[118].mxu0  ;;  %v567_v30 = vld [vmem:[%s4940_s24 + $0x698] sm:$0xff] }
 0x293   : > { %v2966_v48 = vpop.f32.mrb[118].mxu1  ;;  %v2679_v63 = vpop.f32.mrb[119].mxu0  ;;  %v571_v54 = vld [vmem:[%s4940_s24 + $0x6b8] sm:$0xff] }
 0x294   : > { %6136 = vst [vmem:[#allocation33_spill] sm:$0xff] %v5588_v12  ;;  %v5590_v0 = vadd.f32 %v2966_v48, %v2677_v36  ;;  %v2968_v47 = vpop.f32.mrb[119].mxu1  ;;  %v4240_v48 = vcombine.high %v567_v30, %v571_v54 }
 0x295   : > { %3211 = vmatmul.mubr.bf16.gmra.mrb[224].mxu0 %v4221_v16  ;;  %v4231_v47 = vcombine.low %v559_v41, %v563_v15  ;;  %v4238_v16 = vcombine.high %v566_v25, %v570_v26  ;;  %v4237_v41 = vcombine.low %v566_v25, %v570_v26  ;;  %v582_v25 = vld [vmem:[%s4940_s24 + $0x710] sm:$0xff] }
 0x296   : > { %6137 = vst [vmem:[#allocation34_spill] sm:$0xff] %v5590_v0  ;;  %3500 = vmatmul.mubr.bf16.gmra.mrb[224].mxu1 %v4223_v51  ;;  %3218 = vmatprep.mubr.bf16.mxu0 %v4230_v11  ;;  %v586_v26 = vld [vmem:[%s4940_s24 + $0x730] sm:$0xff] }
 0x297   : > { %3507 = vmatprep.mubr.bf16.mxu1 %v4232_v20 }
 0x298   : > { %v2682_v44 = vpop.f32.mrb[120].mxu0 }
 0x299   : > { %v2971_v24 = vpop.f32.mrb[120].mxu1  ;;  %v2684_v12 = vpop.f32.mrb[121].mxu0 }
 0x29a   : > { %v5596_v6 = vadd.f32 %v2971_v24, %v2682_v44  ;;  %v2973_v63 = vpop.f32.mrb[121].mxu1  ;;  %v2685_v36 = vpop.f32.mrb[122].mxu0  ;;  %v575_v44 = vld [vmem:[%s4940_s24 + $0x6d8] sm:$0xff] }
 0x29b   : > { %v2974_v51 = vpop.f32.mrb[122].mxu1  ;;  %v2687_v11 = vpop.f32.mrb[123].mxu0  ;;  %v579_v24 = vld [vmem:[%s4940_s24 + $0x6f8] sm:$0xff] }
 0x29c   : > { %6138 = vst [vmem:[#allocation35_spill] sm:$0xff] %v5596_v6  ;;  %v5598_v20 = vadd.f32 %v2974_v51, %v2685_v36  ;;  %v2976_v0 = vpop.f32.mrb[123].mxu1  ;;  %v4248_v51 = vcombine.high %v575_v44, %v579_v24 }
 0x29d   : > { %3219 = vmatmul.mubr.bf16.gmra.mrb[228].mxu0 %v4229_v27  ;;  %v4239_v0 = vcombine.low %v567_v30, %v571_v54  ;;  %v4246_v27 = vcombine.high %v574_v55, %v578_v58 }
 0x29e   : > { %6139 = vst [vmem:[#allocation36_spill] sm:$0xff] %v5598_v20  ;;  %3508 = vmatmul.mubr.bf16.gmra.mrb[228].mxu1 %v4231_v47  ;;  %3226 = vmatprep.mubr.bf16.mxu0 %v4238_v16 }
 0x29f   : > { %3515 = vmatprep.mubr.bf16.mxu1 %v4240_v48 }
 0x2a0   : > { %v2690_v12 = vpop.f32.mrb[124].mxu0 }
 0x2a1   : > { %v2979_v63 = vpop.f32.mrb[124].mxu1  ;;  %v2692_v6 = vpop.f32.mrb[125].mxu0 }
 0x2a2   : > { %v5604_v15 = vadd.f32 %v2979_v63, %v2690_v12  ;;  %v2981_v11 = vpop.f32.mrb[125].mxu1  ;;  %v2693_v36 = vpop.f32.mrb[126].mxu0  ;;  %v583_v12 = vld [vmem:[%s4940_s24 + $0x718] sm:$0xff] }
 0x2a3   : > { %v2982_v47 = vpop.f32.mrb[126].mxu1  ;;  %v2695_v16 = vpop.f32.mrb[127].mxu0  ;;  %v587_v63 = vld [vmem:[%s4940_s24 + $0x738] sm:$0xff] }
 0x2a4   : > { %6140 = vst [vmem:[#allocation37_spill] sm:$0xff] %v5604_v15  ;;  %v5606_v48 = vadd.f32 %v2982_v47, %v2693_v36  ;;  %v2984_v20 = vpop.f32.mrb[127].mxu1  ;;  %v4245_v16 = vcombine.low %v574_v55, %v578_v58  ;;  %v292_v15 = vld [vmem:[%s4953_s9] sm:$0xff] }
 0x2a5   : > { %3227 = vmatmul.mubr.bf16.gmra.mrb[232].mxu0 %v4237_v41  ;;  %v4247_v20 = vcombine.low %v575_v44, %v579_v24  ;;  %v4254_v41 = vcombine.high %v582_v25, %v586_v26  ;;  %v590_v44 = vld [vmem:[%s4940_s24 + $0x750] sm:$0xff] }
 0x2a6   : > { %6141 = vst [vmem:[#allocation38_spill] sm:$0xff] %v5606_v48  ;;  %3516 = vmatmul.mubr.bf16.gmra.mrb[232].mxu1 %v4239_v0  ;;  %3234 = vmatprep.mubr.bf16.mxu0 %v4246_v27  ;;  %v4256_v48 = vcombine.high %v583_v12, %v587_v63  ;;  %v594_v24 = vld [vmem:[%s4940_s24 + $0x770] sm:$0xff] }
 0x2a7   : > { %3523 = vmatprep.mubr.bf16.mxu1 %v4248_v51 }
 0x2a8   : > { %v3020_v6 = vpop.f32.mrb[128].mxu0 }
 0x2a9   : > { %v3021_v30 = vadd.f32 %v3020_v6, %v5356_v42  ;;  %v3309_v54 = vpop.f32.mrb[128].mxu1  ;;  %v3022_v11 = vpop.f32.mrb[129].mxu0  ;;  %v293_v42 = vld [vmem:[%s4953_s9 + $0x8] sm:$0xff] }
 0x2aa   : > { %v3311_v34 = vpop.f32.mrb[129].mxu1  ;;  %v3023_v36 = vpop.f32.mrb[130].mxu0 }
 0x2ab   : > { %v3310_v0 = vadd.f32 %v3309_v54, %v3021_v30  ;;  %v3024_v27 = vadd.f32 %v3023_v36, %v5358_v50  ;;  %v3312_v47 = vpop.f32.mrb[130].mxu1  ;;  %v3025_v51 = vpop.f32.mrb[131].mxu0  ;;  %v591_v30 = vld [vmem:[%s4940_s24 + $0x758] sm:$0xff] }
 0x2ac   : > { %v3314_v6 = vpop.f32.mrb[131].mxu1  ;;  %v595_v54 = vld [vmem:[%s4940_s24 + $0x778] sm:$0xff] }
 0x2ad   : > { %v3564_v55 = vadd.f32 %v3310_v0, %v292_v15  ;;  %v3313_v58 = vadd.f32 %v3312_v47, %v3024_v27  ;;  %3235 = vmatmul.mubr.bf16.gmra.mrb[236].mxu0 %v4245_v16  ;;  %v4253_v15 = vcombine.low %v582_v25, %v586_v26  ;;  %v294_v0 = vld [vmem:[%s4953_s9 + $0x10] sm:$0xff]  ;;  %v4262_v27 = vcombine.high %v590_v44, %v594_v24 }
 0x2ae   : > { %3524 = vmatmul.mubr.bf16.gmra.mrb[236].mxu1 %v4247_v20  ;;  %3242 = vmatprep.mubr.bf16.mxu0 %v4254_v41  ;;  %v4255_v41 = vcombine.low %v583_v12, %v587_v63  ;;  %v598_v63 = vld [vmem:[%s4940_s24 + $0x790] sm:$0xff] }
 0x2af   : > { %3628 = vst [vmem:[%s4953_s9] sm:$0xff] %v3564_v55  ;;  %v3565_v34 = vadd.f32 %v3313_v58, %v293_v42  ;;  %3531 = vmatprep.mubr.bf16.mxu1 %v4256_v48  ;;  %v4264_v55 = vcombine.high %v591_v30, %v595_v54 }
 0x2b0   : > { %v3028_v50 = vpop.f32.mrb[132].mxu0 }
 0x2b1   : > { %3629 = vst [vmem:[%s4953_s9 + $0x8] sm:$0xff] %v3565_v34  ;;  %v3029_v11 = vadd.f32 %v3028_v50, %v5364_v60  ;;  %v3317_v36 = vpop.f32.mrb[132].mxu1  ;;  %v3030_v51 = vpop.f32.mrb[133].mxu0  ;;  %v295_v60 = vld [vmem:[%s4953_s9 + $0x18] sm:$0xff]  ;;  %v602_v34 = vld [vmem:[%s4940_s24 + $0x7b0] sm:$0xff] }
 0x2b2   : > { %v3319_v16 = vpop.f32.mrb[133].mxu1  ;;  %v3031_v20 = vpop.f32.mrb[134].mxu0  ;;  %v599_v50 = vld [vmem:[%s4940_s24 + $0x798] sm:$0xff] }
 0x2b3   : > { %v3318_v48 = vadd.f32 %v3317_v36, %v3029_v11  ;;  %v3032_v47 = vadd.f32 %v3031_v20, %v5366_v3  ;;  %v3320_v42 = vpop.f32.mrb[134].mxu1  ;;  %v3033_v6 = vpop.f32.mrb[135].mxu0  ;;  %v603_v11 = vld [vmem:[%s4940_s24 + $0x7b8] sm:$0xff]  ;;  %v296_v20 = vld [vmem:[%s4953_s9 + $0x20] sm:$0xff] }
 0x2b4   : > { %v3322_v58 = vpop.f32.mrb[135].mxu1 }
 0x2b5   : > { %v3566_v25 = vadd.f32 %v3318_v48, %v294_v0  ;;  %v3321_v26 = vadd.f32 %v3320_v42, %v3032_v47  ;;  %3243 = vmatmul.mubr.bf16.gmra.mrb[240].mxu0 %v4253_v15  ;;  %v4261_v0 = vcombine.low %v590_v44, %v594_v24  ;;  %v4270_v48 = vcombine.high %v598_v63, %v602_v34 }
 0x2b6   : > { %3532 = vmatmul.mubr.bf16.gmra.mrb[240].mxu1 %v4255_v41  ;;  %3250 = vmatprep.mubr.bf16.mxu0 %v4262_v27  ;;  %v4263_v27 = vcombine.low %v591_v30, %v595_v54  ;;  %v606_v54 = vld [vmem:[%s4940_s24 + $0x7d0] sm:$0xff] }
 0x2b7   : > { %3630 = vst [vmem:[%s4953_s9 + $0x10] sm:$0xff] %v3566_v25  ;;  %v3567_v12 = vadd.f32 %v3321_v26, %v295_v60  ;;  %3539 = vmatprep.mubr.bf16.mxu1 %v4264_v55  ;;  %v4272_v60 = vcombine.high %v599_v50, %v603_v11  ;;  %v610_v25 = vld [vmem:[%s4940_s24 + $0x7f0] sm:$0xff]  ;;  %v607_v26 = vld [vmem:[%s4940_s24 + $0x7d8] sm:$0xff] }
 0x2b8   : > { %v3036_v3 = vpop.f32.mrb[136].mxu0 }
 0x2b9   : > { %3631 = vst [vmem:[%s4953_s9 + $0x18] sm:$0xff] %v3567_v12  ;;  %v3037_v36 = vadd.f32 %v3036_v3, %v5372_v14  ;;  %v3325_v51 = vpop.f32.mrb[136].mxu1  ;;  %v3038_v16 = vpop.f32.mrb[137].mxu0  ;;  %v297_v14 = vld [vmem:[%s4953_s9 + $0x28] sm:$0xff]  ;;  %v611_v12 = vld [vmem:[%s4940_s24 + $0x7f8] sm:$0xff] }
 0x2ba   : > { %v3327_v15 = vpop.f32.mrb[137].mxu1  ;;  %v3039_v41 = vpop.f32.mrb[138].mxu0  ;;  %v4269_v16 = vcombine.low %v598_v63, %v602_v34 }
 0x2bb   : > { %v3326_v47 = vadd.f32 %v3325_v51, %v3037_v36  ;;  %v3040_v42 = vadd.f32 %v3039_v41, %v5374_v22  ;;  %v3328_v6 = vpop.f32.mrb[138].mxu1  ;;  %v3041_v55 = vpop.f32.mrb[139].mxu0  ;;  %v4271_v41 = vcombine.low %v599_v50, %v603_v11 }
 0x2bc   : > { %v3330_v58 = vpop.f32.mrb[139].mxu1  ;;  %v4280_v55 = vcombine.high %v607_v26, %v611_v12 }
 0x2bd   : > { %v3568_v44 = vadd.f32 %v3326_v47, %v296_v20  ;;  %v3329_v24 = vadd.f32 %v3328_v6, %v3040_v42  ;;  %3251 = vmatmul.mubr.bf16.gmra.mrb[244].mxu0 %v4261_v0  ;;  %v298_v20 = vld [vmem:[%s4953_s9 + $0x30] sm:$0xff] }
 0x2be   : > { %3540 = vmatmul.mubr.bf16.gmra.mrb[244].mxu1 %v4263_v27  ;;  %3258 = vmatprep.mubr.bf16.mxu0 %v4270_v48  ;;  %v4278_v27 = vcombine.high %v606_v54, %v610_v25 }
 0x2bf   : > { %3632 = vst [vmem:[%s4953_s9 + $0x20] sm:$0xff] %v3568_v44  ;;  %v3569_v30 = vadd.f32 %v3329_v24, %v297_v14  ;;  %3547 = vmatprep.mubr.bf16.mxu1 %v4272_v60  ;;  %v299_v60 = vld [vmem:[%s4953_s9 + $0x38] sm:$0xff]  ;;  %v4277_v44 = vcombine.low %v606_v54, %v610_v25  ;;  %v300_v24 = vld [vmem:[%s4953_s9 + $0x40] sm:$0xff] }
 0x2c0   : > { %v3044_v22 = vpop.f32.mrb[140].mxu0 }
 0x2c1   : > { %3633 = vst [vmem:[%s4953_s9 + $0x28] sm:$0xff] %v3569_v30  ;;  %v3045_v3 = vadd.f32 %v3044_v22, %v5380_v32  ;;  %v3333_v36 = vpop.f32.mrb[140].mxu1  ;;  %v3046_v51 = vpop.f32.mrb[141].mxu0 }
 0x2c2   : > { %v3335_v0 = vpop.f32.mrb[141].mxu1  ;;  %v3047_v15 = vpop.f32.mrb[142].mxu0 }
 0x2c3   : > { %v3334_v48 = vadd.f32 %v3333_v36, %v3045_v3  ;;  %v3048_v47 = vadd.f32 %v3047_v15, %v5382_v40  ;;  %v3336_v42 = vpop.f32.mrb[142].mxu1  ;;  %v3049_v6 = vpop.f32.mrb[143].mxu0  ;;  %v4279_v3 = vcombine.low %v607_v26, %v611_v12  ;;  %v301_v0 = vld [vmem:[%s4953_s9 + $0x48] sm:$0xff]  ;;  %v302_v12 = vld [vmem:[%s4953_s9 + $0x50] sm:$0xff] }
 0x2c4   : > { %v3338_v14 = vpop.f32.mrb[143].mxu1 }
 0x2c5   : > { %v3570_v32 = vadd.f32 %v3334_v48, %v298_v20  ;;  %v3337_v58 = vadd.f32 %v3336_v42, %v3048_v47  ;;  %3259 = vmatmul.mubr.bf16.gmra.mrb[248].mxu0 %v4269_v16  ;;  %v303_v14 = vld [vmem:[%s4953_s9 + $0x58] sm:$0xff] }
 0x2c6   : > { %3548 = vmatmul.mubr.bf16.gmra.mrb[248].mxu1 %v4271_v41  ;;  %3266 = vmatprep.mubr.bf16.mxu0 %v4278_v27 }
 0x2c7   : > { %3634 = vst [vmem:[%s4953_s9 + $0x30] sm:$0xff] %v3570_v32  ;;  %v3571_v63 = vadd.f32 %v3337_v58, %v299_v60  ;;  %3555 = vmatprep.mubr.bf16.mxu1 %v4280_v55 }
 0x2c8   : > { %v3052_v34 = vpop.f32.mrb[144].mxu0 }
 0x2c9   : > { %3635 = vst [vmem:[%s4953_s9 + $0x38] sm:$0xff] %v3571_v63  ;;  %v3053_v50 = vadd.f32 %v3052_v34, %v5388_v52  ;;  %v3341_v40 = vpop.f32.mrb[144].mxu1  ;;  %v3054_v11 = vpop.f32.mrb[145].mxu0 }
 0x2ca   : > { %v3343_v30 = vpop.f32.mrb[145].mxu1  ;;  %v3055_v22 = vpop.f32.mrb[146].mxu0 }
 0x2cb   : > { %v3342_v36 = vadd.f32 %v3341_v40, %v3053_v50  ;;  %v3056_v51 = vadd.f32 %v3055_v22, %v5390_v61  ;;  %v3344_v16 = vpop.f32.mrb[146].mxu1  ;;  %v3057_v20 = vpop.f32.mrb[147].mxu0 }
 0x2cc   : > { %v3346_v15 = vpop.f32.mrb[147].mxu1 }
 0x2cd   : > { %v3572_v41 = vadd.f32 %v3342_v36, %v300_v24  ;;  %v3345_v27 = vadd.f32 %v3344_v16, %v3056_v51  ;;  %3267 = vmatmul.mubr.bf16.gmra.mrb[252].mxu0 %v4277_v44  ;;  %v304_v44 = vld [vmem:[%s4953_s9 + $0x60] sm:$0xff]  ;;  %v305_v51 = vld [vmem:[%s4953_s9 + $0x68] sm:$0xff] }
 0x2ce   : > { %3556 = vmatmul.mubr.bf16.gmra.mrb[252].mxu1 %v4279_v3 }
 0x2cf   : > { %3636 = vst [vmem:[%s4953_s9 + $0x40] sm:$0xff] %v3572_v41  ;;  %v3573_v52 = vadd.f32 %v3345_v27, %v301_v0 }
 0x2d0   : > { %v3060_v54 = vpop.f32.mrb[148].mxu0 }
 0x2d1   : > { %3637 = vst [vmem:[%s4953_s9 + $0x48] sm:$0xff] %v3573_v52  ;;  %v3061_v25 = vadd.f32 %v3060_v54, %v5396_v8  ;;  %v3349_v26 = vpop.f32.mrb[148].mxu1  ;;  %v3062_v61 = vpop.f32.mrb[149].mxu0  ;;  %v306_v54 = vld [vmem:[%s4953_s9 + $0x70] sm:$0xff] }
 0x2d2   : > { %v3351_v48 = vpop.f32.mrb[149].mxu1  ;;  %v3063_v47 = vpop.f32.mrb[150].mxu0 }
 0x2d3   : > { %v3350_v42 = vadd.f32 %v3349_v26, %v3061_v25  ;;  %v3064_v6 = vadd.f32 %v3063_v47, %v5398_v17  ;;  %v3352_v55 = vpop.f32.mrb[150].mxu1  ;;  %v3065_v60 = vpop.f32.mrb[151].mxu0  ;;  %v307_v47 = vld [vmem:[%s4953_s9 + $0x78] sm:$0xff] }
 0x2d4   : > { %v3354_v32 = vpop.f32.mrb[151].mxu1 }
 0x2d5   : > { %v3574_v58 = vadd.f32 %v3350_v42, %v302_v12  ;;  %v3353_v63 = vadd.f32 %v3352_v55, %v3064_v6 }
 0x2d7   : > { %3638 = vst [vmem:[%s4953_s9 + $0x50] sm:$0xff] %v3574_v58  ;;  %v3575_v34 = vadd.f32 %v3353_v63, %v303_v14  ;;  %v308_v63 = vld [vmem:[%s4953_s9 + $0x80] sm:$0xff] }
 0x2d8   : > { %v3068_v8 = vpop.f32.mrb[152].mxu0 }
 0x2d9   : > { %3639 = vst [vmem:[%s4953_s9 + $0x58] sm:$0xff] %v3575_v34  ;;  %v3069_v50 = vadd.f32 %v3068_v8, %v5404_v28  ;;  %v3357_v40 = vpop.f32.mrb[152].mxu1  ;;  %v3070_v11 = vpop.f32.mrb[153].mxu0 }
 0x2da   : > { %v3359_v24 = vpop.f32.mrb[153].mxu1  ;;  %v3071_v17 = vpop.f32.mrb[154].mxu0 }
 0x2db   : > { %v3358_v30 = vadd.f32 %v3357_v40, %v3069_v50  ;;  %v3072_v22 = vadd.f32 %v3071_v17, %v5406_v37  ;;  %v3360_v3 = vpop.f32.mrb[154].mxu1  ;;  %v3073_v36 = vpop.f32.mrb[155].mxu0 }
 0x2dc   : > { %v3362_v16 = vpop.f32.mrb[155].mxu1 }
 0x2dd   : > { %v3576_v20 = vadd.f32 %v3358_v30, %v304_v44  ;;  %v3361_v0 = vadd.f32 %v3360_v3, %v3072_v22  ;;  %v309_v44 = vld [vmem:[%s4953_s9 + $0x88] sm:$0xff]  ;;  %v310_v16 = vld [vmem:[%s4953_s9 + $0x90] sm:$0xff] }
 0x2df   : > { %3640 = vst [vmem:[%s4953_s9 + $0x60] sm:$0xff] %v3576_v20  ;;  %v3577_v15 = vadd.f32 %v3361_v0, %v305_v51 }
 0x2e0   : > { %v3076_v28 = vpop.f32.mrb[156].mxu0 }
 0x2e1   : > { %3641 = vst [vmem:[%s4953_s9 + $0x68] sm:$0xff] %v3577_v15  ;;  %v3077_v41 = vadd.f32 %v3076_v28, %v5412_v49  ;;  %v3365_v27 = vpop.f32.mrb[156].mxu1  ;;  %v3078_v52 = vpop.f32.mrb[157].mxu0 }
 0x2e2   : > { %v3367_v25 = vpop.f32.mrb[157].mxu1  ;;  %v3079_v37 = vpop.f32.mrb[158].mxu0 }
 0x2e3   : > { %v3366_v26 = vadd.f32 %v3365_v27, %v3077_v41  ;;  %v3080_v61 = vadd.f32 %v3079_v37, %v5414_v59  ;;  %v3368_v12 = vpop.f32.mrb[158].mxu1  ;;  %v3081_v48 = vpop.f32.mrb[159].mxu0  ;;  %v311_v27 = vld [vmem:[%s4953_s9 + $0x98] sm:$0xff] }
 0x2e4   : > { %v3370_v42 = vpop.f32.mrb[159].mxu1  ;;  %v312_v48 = vld [vmem:[%s4953_s9 + $0xa0] sm:$0xff] }
 0x2e5   : > { %v3578_v6 = vadd.f32 %v3366_v26, %v306_v54  ;;  %v3369_v55 = vadd.f32 %v3368_v12, %v3080_v61 }
 0x2e7   : > { %3642 = vst [vmem:[%s4953_s9 + $0x70] sm:$0xff] %v3578_v6  ;;  %v3579_v60 = vadd.f32 %v3369_v55, %v307_v47 }
 0x2e8   : > { %v3084_v49 = vpop.f32.mrb[160].mxu0 }
 0x2e9   : > { %3643 = vst [vmem:[%s4953_s9 + $0x78] sm:$0xff] %v3579_v60  ;;  %v3085_v14 = vadd.f32 %v3084_v49, %v5420_v9  ;;  %v3373_v32 = vpop.f32.mrb[160].mxu1  ;;  %v3086_v58 = vpop.f32.mrb[161].mxu0  ;;  %v313_v49 = vld [vmem:[%s4953_s9 + $0xa8] sm:$0xff] }
 0x2ea   : > { %v3375_v34 = vpop.f32.mrb[161].mxu1  ;;  %v3087_v59 = vpop.f32.mrb[162].mxu0 }
 0x2eb   : > { %v3374_v8 = vadd.f32 %v3373_v32, %v3085_v14  ;;  %v3088_v50 = vadd.f32 %v3087_v59, %v5422_v19  ;;  %v3376_v40 = vpop.f32.mrb[162].mxu1  ;;  %v3089_v11 = vpop.f32.mrb[163].mxu0 }
 0x2ec   : > { %v3378_v24 = vpop.f32.mrb[163].mxu1 }
 0x2ed   : > { %v3580_v17 = vadd.f32 %v3374_v8, %v308_v63  ;;  %v3377_v30 = vadd.f32 %v3376_v40, %v3088_v50  ;;  %v314_v50 = vld [vmem:[%s4953_s9 + $0xb0] sm:$0xff] }
 0x2ef   : > { %3644 = vst [vmem:[%s4953_s9 + $0x80] sm:$0xff] %v3580_v17  ;;  %v3581_v22 = vadd.f32 %v3377_v30, %v309_v44  ;;  %v315_v30 = vld [vmem:[%s4953_s9 + $0xb8] sm:$0xff] }
 0x2f0   : > { %v3092_v9 = vpop.f32.mrb[164].mxu0 }
 0x2f1   : > { %3645 = vst [vmem:[%s4953_s9 + $0x88] sm:$0xff] %v3581_v22  ;;  %v3093_v3 = vadd.f32 %v3092_v9, %v5428_v31  ;;  %v3381_v36 = vpop.f32.mrb[164].mxu1  ;;  %v3094_v51 = vpop.f32.mrb[165].mxu0 }
 0x2f2   : > { %v3383_v20 = vpop.f32.mrb[165].mxu1  ;;  %v3095_v19 = vpop.f32.mrb[166].mxu0 }
 0x2f3   : > { %v3382_v0 = vadd.f32 %v3381_v36, %v3093_v3  ;;  %v3096_v15 = vadd.f32 %v3095_v19, %v5430_v43  ;;  %v3384_v28 = vpop.f32.mrb[166].mxu1  ;;  %v3097_v41 = vpop.f32.mrb[167].mxu0  ;;  %v316_v19 = vld [vmem:[%s4953_s9 + $0xc0] sm:$0xff] }
 0x2f4   : > { %v3386_v52 = vpop.f32.mrb[167].mxu1 }
 0x2f5   : > { %v3582_v54 = vadd.f32 %v3382_v0, %v310_v16  ;;  %v3385_v25 = vadd.f32 %v3384_v28, %v3096_v15  ;;  %v317_v52 = vld [vmem:[%s4953_s9 + $0xc8] sm:$0xff] }
 0x2f7   : > { %3646 = vst [vmem:[%s4953_s9 + $0x90] sm:$0xff] %v3582_v54  ;;  %v3583_v37 = vadd.f32 %v3385_v25, %v311_v27 }
 0x2f8   : > { %v3100_v31 = vpop.f32.mrb[168].mxu0 }
 0x2f9   : > { %3647 = vst [vmem:[%s4953_s9 + $0x98] sm:$0xff] %v3583_v37  ;;  %v3101_v26 = vadd.f32 %v3100_v31, %v5436_v56  ;;  %v3389_v61 = vpop.f32.mrb[168].mxu1  ;;  %v3102_v12 = vpop.f32.mrb[169].mxu0 }
 0x2fa   : > { %v3391_v47 = vpop.f32.mrb[169].mxu1  ;;  %v3103_v43 = vpop.f32.mrb[170].mxu0 }
 0x2fb   : > { %v3390_v42 = vadd.f32 %v3389_v61, %v3101_v26  ;;  %v3104_v6 = vadd.f32 %v3103_v43, %v5438_v2  ;;  %v3392_v55 = vpop.f32.mrb[170].mxu1  ;;  %v3105_v60 = vpop.f32.mrb[171].mxu0 }
 0x2fc   : > { %v3394_v14 = vpop.f32.mrb[171].mxu1  ;;  %v319_v60 = vld [vmem:[%s4953_s9 + $0xd8] sm:$0xff] }
 0x2fd   : > { %v3584_v32 = vadd.f32 %v3390_v42, %v312_v48  ;;  %v3393_v58 = vadd.f32 %v3392_v55, %v3104_v6  ;;  %v318_v48 = vld [vmem:[%s4953_s9 + $0xd0] sm:$0xff] }
 0x2ff   : > { %3648 = vst [vmem:[%s4953_s9 + $0xa0] sm:$0xff] %v3584_v32  ;;  %v3585_v63 = vadd.f32 %v3393_v58, %v313_v49 }
 0x300   : > { %v3108_v56 = vpop.f32.mrb[172].mxu0 }
 0x301   : > { %3649 = vst [vmem:[%s4953_s9 + $0xa8] sm:$0xff] %v3585_v63  ;;  %v3109_v34 = vadd.f32 %v3108_v56, %v5444_v18  ;;  %v3397_v59 = vpop.f32.mrb[172].mxu1  ;;  %v3110_v8 = vpop.f32.mrb[173].mxu0 }
 0x302   : > { %v3399_v40 = vpop.f32.mrb[173].mxu1  ;;  %v3111_v2 = vpop.f32.mrb[174].mxu0 }
 0x303   : > { %v3398_v11 = vadd.f32 %v3397_v59, %v3109_v34  ;;  %v3112_v44 = vadd.f32 %v3111_v2, %v5446_v29  ;;  %v3400_v24 = vpop.f32.mrb[174].mxu1  ;;  %v3113_v17 = vpop.f32.mrb[175].mxu0  ;;  %v320_v59 = vld [vmem:[%s4953_s9 + $0xe0] sm:$0xff] }
 0x304   : > { %v3402_v22 = vpop.f32.mrb[175].mxu1 }
 0x305   : > { %v3586_v9 = vadd.f32 %v3398_v11, %v314_v50  ;;  %v3401_v3 = vadd.f32 %v3400_v24, %v3112_v44  ;;  %v321_v44 = vld [vmem:[%s4953_s9 + $0xe8] sm:$0xff] }
 0x307   : > { %3650 = vst [vmem:[%s4953_s9 + $0xb0] sm:$0xff] %v3586_v9  ;;  %v3587_v36 = vadd.f32 %v3401_v3, %v315_v30 }
 0x308   : > { %v3116_v18 = vpop.f32.mrb[176].mxu0 }
 0x309   : > { %3651 = vst [vmem:[%s4953_s9 + $0xb8] sm:$0xff] %v3587_v36  ;;  %v3117_v51 = vadd.f32 %v3116_v18, %v5452_v45  ;;  %v3405_v16 = vpop.f32.mrb[176].mxu1  ;;  %v3118_v20 = vpop.f32.mrb[177].mxu0  ;;  %v322_v18 = vld [vmem:[%s4953_s9 + $0xf0] sm:$0xff] }
 0x30a   : > { %v3407_v0 = vpop.f32.mrb[177].mxu1  ;;  %v3119_v29 = vpop.f32.mrb[178].mxu0 }
 0x30b   : > { %v3406_v15 = vadd.f32 %v3405_v16, %v3117_v51  ;;  %v3120_v28 = vadd.f32 %v3119_v29, %v5454_v57  ;;  %v3408_v41 = vpop.f32.mrb[178].mxu1  ;;  %v3121_v27 = vpop.f32.mrb[179].mxu0  ;;  %v323_v29 = vld [vmem:[%s4953_s9 + $0xf8] sm:$0xff] }
 0x30c   : > { %v3410_v54 = vpop.f32.mrb[179].mxu1 }
 0x30d   : > { %v3588_v25 = vadd.f32 %v3406_v15, %v316_v19  ;;  %v3409_v37 = vadd.f32 %v3408_v41, %v3120_v28 }
 0x30f   : > { %3652 = vst [vmem:[%s4953_s9 + $0xc0] sm:$0xff] %v3588_v25  ;;  %v3589_v31 = vadd.f32 %v3409_v37, %v317_v52  ;;  %v324_v37 = vld [vmem:[%s4953_s9 + $0x100] sm:$0xff] }
 0x310   : > { %v3124_v45 = vpop.f32.mrb[180].mxu0 }
 0x311   : > { %3653 = vst [vmem:[%s4953_s9 + $0xc8] sm:$0xff] %v3589_v31  ;;  %v3125_v26 = vadd.f32 %v3124_v45, %v5460_v10  ;;  %v3413_v61 = vpop.f32.mrb[180].mxu1  ;;  %v3126_v12 = vpop.f32.mrb[181].mxu0 }
 0x312   : > { %v3415_v47 = vpop.f32.mrb[181].mxu1  ;;  %v3127_v57 = vpop.f32.mrb[182].mxu0 }
 0x313   : > { %v3414_v43 = vadd.f32 %v3413_v61, %v3125_v26  ;;  %v3128_v42 = vadd.f32 %v3127_v57, %v5462_v23  ;;  %v3416_v6 = vpop.f32.mrb[182].mxu1  ;;  %v3129_v55 = vpop.f32.mrb[183].mxu0 }
 0x314   : > { %v3418_v49 = vpop.f32.mrb[183].mxu1 }
 0x315   : > { %v3590_v14 = vadd.f32 %v3414_v43, %v318_v48  ;;  %v3417_v32 = vadd.f32 %v3416_v6, %v3128_v42  ;;  %v325_v48 = vld [vmem:[%s4953_s9 + $0x108] sm:$0xff]  ;;  %v326_v49 = vld [vmem:[%s4953_s9 + $0x110] sm:$0xff] }
 0x317   : > { %3654 = vst [vmem:[%s4953_s9 + $0xd0] sm:$0xff] %v3590_v14  ;;  %v3591_v58 = vadd.f32 %v3417_v32, %v319_v60 }
 0x318   : > { %v3132_v10 = vpop.f32.mrb[184].mxu0 }
 0x319   : > { %3655 = vst [vmem:[%s4953_s9 + $0xd8] sm:$0xff] %v3591_v58  ;;  %v3133_v63 = vadd.f32 %v3132_v10, %v5468_v38  ;;  %v3421_v56 = vpop.f32.mrb[184].mxu1  ;;  %v3134_v34 = vpop.f32.mrb[185].mxu0 }
 0x31a   : > { %v3423_v8 = vpop.f32.mrb[185].mxu1  ;;  %v3135_v23 = vpop.f32.mrb[186].mxu0 }
 0x31b   : > { %v3422_v50 = vadd.f32 %v3421_v56, %v3133_v63  ;;  %v3136_v40 = vadd.f32 %v3135_v23, %v5470_v53  ;;  %v3424_v2 = vpop.f32.mrb[186].mxu1  ;;  %v3137_v11 = vpop.f32.mrb[187].mxu0  ;;  %v327_v56 = vld [vmem:[%s4953_s9 + $0x118] sm:$0xff] }
 0x31c   : > { %v3426_v24 = vpop.f32.mrb[187].mxu1  ;;  %v328_v11 = vld [vmem:[%s4953_s9 + $0x120] sm:$0xff] }
 0x31d   : > { %v3592_v17 = vadd.f32 %v3422_v50, %v320_v59  ;;  %v3425_v30 = vadd.f32 %v3424_v2, %v3136_v40 }
 0x31f   : > { %3656 = vst [vmem:[%s4953_s9 + $0xe0] sm:$0xff] %v3592_v17  ;;  %v3593_v22 = vadd.f32 %v3425_v30, %v321_v44 }
 0x320   : > { %v3140_v38 = vpop.f32.mrb[188].mxu0 }
 0x321   : > { %3657 = vst [vmem:[%s4953_s9 + $0xe8] sm:$0xff] %v3593_v22  ;;  %v3141_v9 = vadd.f32 %v3140_v38, %v5476_v1  ;;  %v3429_v3 = vpop.f32.mrb[188].mxu1  ;;  %v3142_v36 = vpop.f32.mrb[189].mxu0  ;;  %v329_v38 = vld [vmem:[%s4953_s9 + $0x128] sm:$0xff] }
 0x322   : > { %v3431_v51 = vpop.f32.mrb[189].mxu1  ;;  %v3143_v53 = vpop.f32.mrb[190].mxu0 }
 0x323   : > { %v3430_v16 = vadd.f32 %v3429_v3, %v3141_v9  ;;  %v3144_v20 = vadd.f32 %v3143_v53, %v5478_v21  ;;  %v3432_v19 = vpop.f32.mrb[190].mxu1  ;;  %v3145_v0 = vpop.f32.mrb[191].mxu0 }
 0x324   : > { %v3434_v15 = vpop.f32.mrb[191].mxu1 }
 0x325   : > { %v3594_v28 = vadd.f32 %v3430_v16, %v322_v18  ;;  %v3433_v41 = vadd.f32 %v3432_v19, %v3144_v20  ;;  %v330_v20 = vld [vmem:[%s4953_s9 + $0x130] sm:$0xff] }
 0x327   : > { %3658 = vst [vmem:[%s4953_s9 + $0xf0] sm:$0xff] %v3594_v28  ;;  %v3595_v27 = vadd.f32 %v3433_v41, %v323_v29  ;;  %v331_v41 = vld [vmem:[%s4953_s9 + $0x138] sm:$0xff] }
 0x328   : > { %v3148_v1 = vpop.f32.mrb[192].mxu0 }
 0x329   : > { %3659 = vst [vmem:[%s4953_s9 + $0xf8] sm:$0xff] %v3595_v27  ;;  %v3149_v52 = vadd.f32 %v3148_v1, %v5484_v33  ;;  %v3437_v54 = vpop.f32.mrb[192].mxu1  ;;  %v3150_v25 = vpop.f32.mrb[193].mxu0 }
 0x32a   : > { %v3439_v31 = vpop.f32.mrb[193].mxu1  ;;  %v3151_v21 = vpop.f32.mrb[194].mxu0 }
 0x32b   : > { %v3438_v45 = vadd.f32 %v3437_v54, %v3149_v52  ;;  %v3152_v26 = vadd.f32 %v3151_v21, %v5486_v62  ;;  %v3440_v61 = vpop.f32.mrb[194].mxu1  ;;  %v3153_v12 = vpop.f32.mrb[195].mxu0  ;;  %v332_v21 = vld [vmem:[%s4953_s9 + $0x140] sm:$0xff] }
 0x32c   : > { %v3442_v47 = vpop.f32.mrb[195].mxu1 }
 0x32d   : > { %v3596_v57 = vadd.f32 %v3438_v45, %v324_v37  ;;  %v3441_v43 = vadd.f32 %v3440_v61, %v3152_v26  ;;  %v6142_v61 = vld [vmem:[#allocation16_spill] sm:$0xff] }
 0x32f   : > { %3660 = vst [vmem:[%s4953_s9 + $0x100] sm:$0xff] %v3596_v57  ;;  %v3597_v42 = vadd.f32 %v3441_v43, %v325_v48  ;;  %v333_v57 = vld [vmem:[%s4953_s9 + $0x148] sm:$0xff] }
 0x330   : > { %v3156_v33 = vpop.f32.mrb[196].mxu0 }
 0x331   : > { %3661 = vst [vmem:[%s4953_s9 + $0x108] sm:$0xff] %v3597_v42  ;;  %v3157_v6 = vadd.f32 %v3156_v33, %v5492_v4  ;;  %v3445_v55 = vpop.f32.mrb[196].mxu1  ;;  %v3158_v60 = vpop.f32.mrb[197].mxu0 }
 0x332   : > { %v3447_v14 = vpop.f32.mrb[197].mxu1  ;;  %v3159_v62 = vpop.f32.mrb[198].mxu0 }
 0x333   : > { %v3446_v32 = vadd.f32 %v3445_v55, %v3157_v6  ;;  %v3160_v58 = vadd.f32 %v3159_v62, %v5494_v39  ;;  %v3448_v10 = vpop.f32.mrb[198].mxu1  ;;  %v3161_v63 = vpop.f32.mrb[199].mxu0  ;;  %v6143_v55 = vld [vmem:[#allocation17_spill] sm:$0xff]  ;;  %v334_v62 = vld [vmem:[%s4953_s9 + $0x150] sm:$0xff] }
 0x334   : > { %v3450_v34 = vpop.f32.mrb[199].mxu1  ;;  %v6144_v63 = vld [vmem:[#allocation18_spill] sm:$0xff] }
 0x335   : > { %v3598_v59 = vadd.f32 %v3446_v32, %v326_v49  ;;  %v3449_v8 = vadd.f32 %v3448_v10, %v3160_v58 }
 0x337   : > { %3662 = vst [vmem:[%s4953_s9 + $0x110] sm:$0xff] %v3598_v59  ;;  %v3599_v23 = vadd.f32 %v3449_v8, %v327_v56  ;;  %v335_v8 = vld [vmem:[%s4953_s9 + $0x158] sm:$0xff] }
 0x338   : > { %v3164_v4 = vpop.f32.mrb[200].mxu0 }
 0x339   : > { %3663 = vst [vmem:[%s4953_s9 + $0x118] sm:$0xff] %v3599_v23  ;;  %v3165_v50 = vadd.f32 %v3164_v4, %v5500_v35  ;;  %v3453_v40 = vpop.f32.mrb[200].mxu1  ;;  %v3166_v2 = vpop.f32.mrb[201].mxu0 }
 0x33a   : > { %v3455_v44 = vpop.f32.mrb[201].mxu1  ;;  %v3167_v39 = vpop.f32.mrb[202].mxu0 }
 0x33b   : > { %v3454_v24 = vadd.f32 %v3453_v40, %v3165_v50  ;;  %v3168_v17 = vadd.f32 %v3167_v39, %v5502_v13  ;;  %v3456_v30 = vpop.f32.mrb[202].mxu1  ;;  %v3169_v22 = vpop.f32.mrb[203].mxu0 }
 0x33c   : > { %v3458_v9 = vpop.f32.mrb[203].mxu1 }
 0x33d   : > { %v3600_v3 = vadd.f32 %v3454_v24, %v328_v11  ;;  %v3457_v36 = vadd.f32 %v3456_v30, %v3168_v17  ;;  %v6145_v11 = vld [vmem:[#allocation19_spill] sm:$0xff]  ;;  %v336_v17 = vld [vmem:[%s4953_s9 + $0x160] sm:$0xff] }
 0x33e   : > { %v6146_v9 = vld [vmem:[#allocation20_spill] sm:$0xff] }
 0x33f   : > { %3664 = vst [vmem:[%s4953_s9 + $0x120] sm:$0xff] %v3600_v3  ;;  %v3601_v18 = vadd.f32 %v3457_v36, %v329_v38 }
 0x340   : > { %v3172_v35 = vpop.f32.mrb[204].mxu0 }
 0x341   : > { %3665 = vst [vmem:[%s4953_s9 + $0x128] sm:$0xff] %v3601_v18  ;;  %v3173_v51 = vadd.f32 %v3172_v35, %v5508_v7  ;;  %v3461_v53 = vpop.f32.mrb[204].mxu1  ;;  %v3174_v16 = vpop.f32.mrb[205].mxu0  ;;  %v337_v35 = vld [vmem:[%s4953_s9 + $0x168] sm:$0xff] }
 0x342   : > { %v3463_v19 = vpop.f32.mrb[205].mxu1  ;;  %v3175_v13 = vpop.f32.mrb[206].mxu0 }
 0x343   : > { %v3462_v0 = vadd.f32 %v3461_v53, %v3173_v51  ;;  %v3176_v29 = vadd.f32 %v3175_v13, %v5510_v5  ;;  %v3464_v15 = vpop.f32.mrb[206].mxu1  ;;  %v3177_v28 = vpop.f32.mrb[207].mxu0  ;;  %v6147_v13 = vld [vmem:[#allocation21_spill] sm:$0xff] }
 0x344   : > { %v3466_v27 = vpop.f32.mrb[207].mxu1  ;;  %v338_v28 = vld [vmem:[%s4953_s9 + $0x170] sm:$0xff] }
 0x345   : > { %v3602_v1 = vadd.f32 %v3462_v0, %v330_v20  ;;  %v3465_v52 = vadd.f32 %v3464_v15, %v3176_v29 }
 0x347   : > { %3666 = vst [vmem:[%s4953_s9 + $0x130] sm:$0xff] %v3602_v1  ;;  %v3603_v54 = vadd.f32 %v3465_v52, %v331_v41  ;;  %v6148_v52 = vld [vmem:[#allocation22_spill] sm:$0xff] }
 0x348   : > { %v3180_v7 = vpop.f32.mrb[208].mxu0 }
 0x349   : > { %3667 = vst [vmem:[%s4953_s9 + $0x138] sm:$0xff] %v3603_v54  ;;  %v3181_v25 = vadd.f32 %v3180_v7, %v5516_v46  ;;  %v3469_v37 = vpop.f32.mrb[208].mxu1  ;;  %v3182_v31 = vpop.f32.mrb[209].mxu0 }
 0x34a   : > { %v3471_v45 = vpop.f32.mrb[209].mxu1  ;;  %v3183_v5 = vpop.f32.mrb[210].mxu0 }
 0x34b   : > { %v3470_v26 = vadd.f32 %v3469_v37, %v3181_v25  ;;  %v3184_v12 = vadd.f32 %v3183_v5, %v6142_v61  ;;  %v3472_v48 = vpop.f32.mrb[210].mxu1  ;;  %v3185_v47 = vpop.f32.mrb[211].mxu0  ;;  %v339_v37 = vld [vmem:[%s4953_s9 + $0x178] sm:$0xff] }
 0x34c   : > { %v3474_v43 = vpop.f32.mrb[211].mxu1  ;;  %v6149_v61 = vld [vmem:[#allocation23_spill] sm:$0xff] }
 0x34d   : > { %v3604_v42 = vadd.f32 %v3470_v26, %v332_v21  ;;  %v3473_v33 = vadd.f32 %v3472_v48, %v3184_v12 }
 0x34f   : > { %3668 = vst [vmem:[%s4953_s9 + $0x140] sm:$0xff] %v3604_v42  ;;  %v3605_v6 = vadd.f32 %v3473_v33, %v333_v57  ;;  %v340_v57 = vld [vmem:[%s4953_s9 + $0x180] sm:$0xff] }
 0x350   : > { %v3188_v46 = vpop.f32.mrb[212].mxu0 }
 0x351   : > { %3669 = vst [vmem:[%s4953_s9 + $0x148] sm:$0xff] %v3605_v6  ;;  %v3189_v60 = vadd.f32 %v3188_v46, %v6143_v55  ;;  %v3477_v49 = vpop.f32.mrb[212].mxu1  ;;  %v3190_v14 = vpop.f32.mrb[213].mxu0  ;;  %v6150_v6 = vld [vmem:[#allocation24_spill] sm:$0xff] }
 0x352   : > { %v3479_v32 = vpop.f32.mrb[213].mxu1  ;;  %v3191_v58 = vpop.f32.mrb[214].mxu0 }
 0x353   : > { %v3478_v10 = vadd.f32 %v3477_v49, %v3189_v60  ;;  %v3192_v56 = vadd.f32 %v3191_v58, %v6144_v63  ;;  %v3480_v34 = vpop.f32.mrb[214].mxu1  ;;  %v3193_v59 = vpop.f32.mrb[215].mxu0  ;;  %v341_v49 = vld [vmem:[%s4953_s9 + $0x188] sm:$0xff] }
 0x354   : > { %v3482_v23 = vpop.f32.mrb[215].mxu1  ;;  %v6151_v63 = vld [vmem:[#allocation25_spill] sm:$0xff] }
 0x355   : > { %v3606_v4 = vadd.f32 %v3478_v10, %v334_v62  ;;  %v3481_v50 = vadd.f32 %v3480_v34, %v3192_v56 }
 0x357   : > { %3670 = vst [vmem:[%s4953_s9 + $0x150] sm:$0xff] %v3606_v4  ;;  %v3607_v40 = vadd.f32 %v3481_v50, %v335_v8  ;;  %v342_v8 = vld [vmem:[%s4953_s9 + $0x190] sm:$0xff] }
 0x358   : > { %v3196_v2 = vpop.f32.mrb[216].mxu0 }
 0x359   : > { %3671 = vst [vmem:[%s4953_s9 + $0x158] sm:$0xff] %v3607_v40  ;;  %v3197_v44 = vadd.f32 %v3196_v2, %v6145_v11  ;;  %v3485_v39 = vpop.f32.mrb[216].mxu1  ;;  %v3198_v24 = vpop.f32.mrb[217].mxu0  ;;  %v6152_v40 = vld [vmem:[#allocation26_spill] sm:$0xff] }
 0x35a   : > { %v3487_v30 = vpop.f32.mrb[217].mxu1  ;;  %v3199_v22 = vpop.f32.mrb[218].mxu0 }
 0x35b   : > { %v3486_v38 = vadd.f32 %v3485_v39, %v3197_v44  ;;  %v3200_v3 = vadd.f32 %v3199_v22, %v6146_v9  ;;  %v3488_v36 = vpop.f32.mrb[218].mxu1  ;;  %v3201_v18 = vpop.f32.mrb[219].mxu0  ;;  %v343_v39 = vld [vmem:[%s4953_s9 + $0x198] sm:$0xff] }
 0x35c   : > { %v3490_v51 = vpop.f32.mrb[219].mxu1  ;;  %v6153_v9 = vld [vmem:[#allocation27_spill] sm:$0xff] }
 0x35d   : > { %v3608_v53 = vadd.f32 %v3486_v38, %v336_v17  ;;  %v3489_v16 = vadd.f32 %v3488_v36, %v3200_v3 }
 0x35f   : > { %3672 = vst [vmem:[%s4953_s9 + $0x160] sm:$0xff] %v3608_v53  ;;  %v3609_v20 = vadd.f32 %v3489_v16, %v337_v35  ;;  %v344_v35 = vld [vmem:[%s4953_s9 + $0x1a0] sm:$0xff] }
 0x360   : > { %v3204_v19 = vpop.f32.mrb[220].mxu0 }
 0x361   : > { %3673 = vst [vmem:[%s4953_s9 + $0x168] sm:$0xff] %v3609_v20  ;;  %v3205_v0 = vadd.f32 %v3204_v19, %v6147_v13  ;;  %v3493_v29 = vpop.f32.mrb[220].mxu1  ;;  %v3206_v15 = vpop.f32.mrb[221].mxu0  ;;  %v6154_v20 = vld [vmem:[#allocation28_spill] sm:$0xff] }
 0x362   : > { %v3495_v41 = vpop.f32.mrb[221].mxu1  ;;  %v3207_v27 = vpop.f32.mrb[222].mxu0 }
 0x363   : > { %v3494_v1 = vadd.f32 %v3493_v29, %v3205_v0  ;;  %v3208_v54 = vadd.f32 %v3207_v27, %v6148_v52  ;;  %v3496_v7 = vpop.f32.mrb[222].mxu1  ;;  %v3209_v25 = vpop.f32.mrb[223].mxu0  ;;  %v345_v29 = vld [vmem:[%s4953_s9 + $0x1a8] sm:$0xff] }
 0x364   : > { %v3498_v31 = vpop.f32.mrb[223].mxu1  ;;  %v6155_v52 = vld [vmem:[#allocation29_spill] sm:$0xff] }
 0x365   : > { %v3610_v21 = vadd.f32 %v3494_v1, %v338_v28  ;;  %v3497_v45 = vadd.f32 %v3496_v7, %v3208_v54 }
 0x367   : > { %3674 = vst [vmem:[%s4953_s9 + $0x170] sm:$0xff] %v3610_v21  ;;  %v3611_v5 = vadd.f32 %v3497_v45, %v339_v37  ;;  %v346_v37 = vld [vmem:[%s4953_s9 + $0x1b0] sm:$0xff] }
 0x368   : > { %v3212_v26 = vpop.f32.mrb[224].mxu0 }
 0x369   : > { %3675 = vst [vmem:[%s4953_s9 + $0x178] sm:$0xff] %v3611_v5  ;;  %v3213_v12 = vadd.f32 %v3212_v26, %v6149_v61  ;;  %v3501_v48 = vpop.f32.mrb[224].mxu1  ;;  %v3214_v47 = vpop.f32.mrb[225].mxu0  ;;  %v6156_v5 = vld [vmem:[#allocation30_spill] sm:$0xff] }
 0x36a   : > { %v3503_v43 = vpop.f32.mrb[225].mxu1  ;;  %v3215_v42 = vpop.f32.mrb[226].mxu0 }
 0x36b   : > { %v3502_v33 = vadd.f32 %v3501_v48, %v3213_v12  ;;  %v3216_v46 = vadd.f32 %v3215_v42, %v6150_v6  ;;  %v3504_v55 = vpop.f32.mrb[226].mxu1  ;;  %v3217_v60 = vpop.f32.mrb[227].mxu0  ;;  %v347_v48 = vld [vmem:[%s4953_s9 + $0x1b8] sm:$0xff] }
 0x36c   : > { %v3506_v14 = vpop.f32.mrb[227].mxu1  ;;  %v6157_v6 = vld [vmem:[#allocation31_spill] sm:$0xff] }
 0x36d   : > { %v3612_v62 = vadd.f32 %v3502_v33, %v340_v57  ;;  %v3505_v32 = vadd.f32 %v3504_v55, %v3216_v46 }
 0x36f   : > { %3676 = vst [vmem:[%s4953_s9 + $0x180] sm:$0xff] %v3612_v62  ;;  %v3613_v58 = vadd.f32 %v3505_v32, %v341_v49  ;;  %v348_v49 = vld [vmem:[%s4953_s9 + $0x1c0] sm:$0xff] }
 0x370   : > { %v3220_v10 = vpop.f32.mrb[228].mxu0 }
 0x371   : > { %3677 = vst [vmem:[%s4953_s9 + $0x188] sm:$0xff] %v3613_v58  ;;  %v3221_v56 = vadd.f32 %v3220_v10, %v6151_v63  ;;  %v3509_v34 = vpop.f32.mrb[228].mxu1  ;;  %v3222_v59 = vpop.f32.mrb[229].mxu0  ;;  %v6158_v58 = vld [vmem:[#allocation32_spill] sm:$0xff] }
 0x372   : > { %v3511_v23 = vpop.f32.mrb[229].mxu1  ;;  %v3223_v4 = vpop.f32.mrb[230].mxu0 }
 0x373   : > { %v3510_v50 = vadd.f32 %v3509_v34, %v3221_v56  ;;  %v3224_v2 = vadd.f32 %v3223_v4, %v6152_v40  ;;  %v3512_v11 = vpop.f32.mrb[230].mxu1  ;;  %v3225_v44 = vpop.f32.mrb[231].mxu0  ;;  %v349_v34 = vld [vmem:[%s4953_s9 + $0x1c8] sm:$0xff] }
 0x374   : > { %v3514_v24 = vpop.f32.mrb[231].mxu1  ;;  %v6159_v40 = vld [vmem:[#allocation33_spill] sm:$0xff] }
 0x375   : > { %v3614_v17 = vadd.f32 %v3510_v50, %v342_v8  ;;  %v3513_v30 = vadd.f32 %v3512_v11, %v3224_v2 }
 0x377   : > { %3678 = vst [vmem:[%s4953_s9 + $0x190] sm:$0xff] %v3614_v17  ;;  %v3615_v22 = vadd.f32 %v3513_v30, %v343_v39  ;;  %v350_v39 = vld [vmem:[%s4953_s9 + $0x1d0] sm:$0xff] }
 0x378   : > { %v3228_v38 = vpop.f32.mrb[232].mxu0 }
 0x379   : > { %3679 = vst [vmem:[%s4953_s9 + $0x198] sm:$0xff] %v3615_v22  ;;  %v3229_v3 = vadd.f32 %v3228_v38, %v6153_v9  ;;  %v3517_v36 = vpop.f32.mrb[232].mxu1  ;;  %v3230_v18 = vpop.f32.mrb[233].mxu0  ;;  %v6160_v22 = vld [vmem:[#allocation34_spill] sm:$0xff] }
 0x37a   : > { %v3519_v51 = vpop.f32.mrb[233].mxu1  ;;  %v3231_v53 = vpop.f32.mrb[234].mxu0 }
 0x37b   : > { %v3518_v16 = vadd.f32 %v3517_v36, %v3229_v3  ;;  %v3232_v19 = vadd.f32 %v3231_v53, %v6154_v20  ;;  %v3520_v13 = vpop.f32.mrb[234].mxu1  ;;  %v3233_v0 = vpop.f32.mrb[235].mxu0  ;;  %v351_v36 = vld [vmem:[%s4953_s9 + $0x1d8] sm:$0xff] }
 0x37c   : > { %v3522_v15 = vpop.f32.mrb[235].mxu1  ;;  %v6161_v20 = vld [vmem:[#allocation35_spill] sm:$0xff] }
 0x37d   : > { %v3616_v28 = vadd.f32 %v3518_v16, %v344_v35  ;;  %v3521_v41 = vadd.f32 %v3520_v13, %v3232_v19 }
 0x37f   : > { %3680 = vst [vmem:[%s4953_s9 + $0x1a0] sm:$0xff] %v3616_v28  ;;  %v3617_v27 = vadd.f32 %v3521_v41, %v345_v29  ;;  %v352_v29 = vld [vmem:[%s4953_s9 + $0x1e0] sm:$0xff] }
 0x380   : > { %v3236_v1 = vpop.f32.mrb[236].mxu0 }
 0x381   : > { %3681 = vst [vmem:[%s4953_s9 + $0x1a8] sm:$0xff] %v3617_v27  ;;  %v3237_v54 = vadd.f32 %v3236_v1, %v6155_v52  ;;  %v3525_v7 = vpop.f32.mrb[236].mxu1  ;;  %v3238_v25 = vpop.f32.mrb[237].mxu0  ;;  %v6162_v27 = vld [vmem:[#allocation36_spill] sm:$0xff] }
 0x382   : > { %v3527_v31 = vpop.f32.mrb[237].mxu1  ;;  %v3239_v21 = vpop.f32.mrb[238].mxu0 }
 0x383   : > { %v3526_v45 = vadd.f32 %v3525_v7, %v3237_v54  ;;  %v3240_v26 = vadd.f32 %v3239_v21, %v6156_v5  ;;  %v3528_v61 = vpop.f32.mrb[238].mxu1  ;;  %v3241_v12 = vpop.f32.mrb[239].mxu0  ;;  %v353_v7 = vld [vmem:[%s4953_s9 + $0x1e8] sm:$0xff] }
 0x384   : > { %v3530_v47 = vpop.f32.mrb[239].mxu1  ;;  %v6163_v5 = vld [vmem:[#allocation37_spill] sm:$0xff] }
 0x385   : > { %v3618_v57 = vadd.f32 %v3526_v45, %v346_v37  ;;  %v3529_v43 = vadd.f32 %v3528_v61, %v3240_v26 }
 0x387   : > { %3682 = vst [vmem:[%s4953_s9 + $0x1b0] sm:$0xff] %v3618_v57  ;;  %v3619_v42 = vadd.f32 %v3529_v43, %v347_v48  ;;  %v354_v48 = vld [vmem:[%s4953_s9 + $0x1f0] sm:$0xff] }
 0x388   : > { %v3244_v33 = vpop.f32.mrb[240].mxu0 }
 0x389   : > { %3683 = vst [vmem:[%s4953_s9 + $0x1b8] sm:$0xff] %v3619_v42  ;;  %v3245_v46 = vadd.f32 %v3244_v33, %v6157_v6  ;;  %v3533_v55 = vpop.f32.mrb[240].mxu1  ;;  %v3246_v60 = vpop.f32.mrb[241].mxu0  ;;  %v6164_v42 = vld [vmem:[#allocation38_spill] sm:$0xff] }
 0x38a   : > { %v3535_v14 = vpop.f32.mrb[241].mxu1  ;;  %v3247_v62 = vpop.f32.mrb[242].mxu0 }
 0x38b   : > { %v3534_v32 = vadd.f32 %v3533_v55, %v3245_v46  ;;  %v3248_v10 = vadd.f32 %v3247_v62, %v6158_v58  ;;  %v3536_v63 = vpop.f32.mrb[242].mxu1  ;;  %v3249_v56 = vpop.f32.mrb[243].mxu0  ;;  %v355_v55 = vld [vmem:[%s4953_s9 + $0x1f8] sm:$0xff] }
 0x38c   : > { %v3538_v59 = vpop.f32.mrb[243].mxu1  ;;  %v5818_v58 = vld [vmem:[#allocation5] ss:$0 sm:$0xff] (!%p4345_p4) }
 0x38d   : > { %v3620_v8 = vadd.f32 %v3534_v32, %v348_v49  ;;  %v3537_v23 = vadd.f32 %v3536_v63, %v3248_v10  ;;  %v3696_v32 = vld [vmem:[%s4953_s9] sm:$0xff] (!%p4345_p4)  ;;  %v3697_v10 = vld [vmem:[%s4953_s9 + $0x8] sm:$0xff] (!%p4345_p4)  ;;  %v3699_v59 = vld [vmem:[%s4953_s9 + $0x18] sm:$0xff] (!%p4345_p4) }
 0x38e   : > { %v3767_v63 = vadd.f32 (!%p4345_p4), %v5818_v58, %v3696_v32  ;;  %v3768_v56 = vadd.f32 (!%p4345_p4), %v5818_v58, %v3697_v10  ;;  %v3728_v10 = vld [vmem:[%s4953_s9 + $0x100] sm:$0xff] (!%p4345_p4) }
 0x38f   : > { %3684 = vst [vmem:[%s4953_s9 + $0x1c0] sm:$0xff] %v3620_v8  ;;  %v3621_v4 = vadd.f32 %v3537_v23, %v349_v34  ;;  %v3698_v34 = vld [vmem:[%s4953_s9 + $0x10] sm:$0xff] (!%p4345_p4)  ;;  %v3700_v8 = vld [vmem:[%s4953_s9 + $0x20] sm:$0xff] (!%p4345_p4) }
 0x390   : > { %v3252_v50 = vpop.f32.mrb[244].mxu0  ;;  %v3769_v23 = vadd.f32 (!%p4345_p4), %v5818_v58, %v3698_v34  ;;  %3831 = vst [vmem:[%s4953_s9] sm:$0xff] (!%p4345_p4), %v3767_v63  ;;  %3832 = vst [vmem:[%s4953_s9 + $0x8] sm:$0xff] (!%p4345_p4), %v3768_v56  ;;  %v3729_v63 = vld [vmem:[%s4953_s9 + $0x108] sm:$0xff] (!%p4345_p4)  ;;  %v3730_v56 = vld [vmem:[%s4953_s9 + $0x110] sm:$0xff] (!%p4345_p4)  ;;  %v3799_v34 = vadd.f32 (!%p4345_p4), %v5818_v58, %v3728_v10 }
 0x391   : > { %3685 = vst [vmem:[%s4953_s9 + $0x1c8] sm:$0xff] %v3621_v4  ;;  %v3253_v2 = vadd.f32 %v3252_v50, %v6159_v40  ;;  %v3541_v11 = vpop.f32.mrb[244].mxu1  ;;  %v3254_v44 = vpop.f32.mrb[245].mxu0  ;;  %v3770_v4 = vadd.f32 (!%p4345_p4), %v5818_v58, %v3699_v59  ;;  %v3771_v50 = vadd.f32 (!%p4345_p4), %v5818_v58, %v3700_v8  ;;  %v3701_v40 = vld [vmem:[%s4953_s9 + $0x28] sm:$0xff] (!%p4345_p4)  ;;  %v3800_v59 = vadd.f32 (!%p4345_p4), %v5818_v58, %v3729_v63 }
 0x392   : > { %v3543_v24 = vpop.f32.mrb[245].mxu1  ;;  %v3255_v17 = vpop.f32.mrb[246].mxu0  ;;  %v3772_v44 = vadd.f32 (!%p4345_p4), %v5818_v58, %v3701_v40  ;;  %3833 = vst [vmem:[%s4953_s9 + $0x10] sm:$0xff] (!%p4345_p4), %v3769_v23  ;;  %v3801_v8 = vadd.f32 (!%p4345_p4), %v5818_v58, %v3730_v56  ;;  %v3731_v23 = vld [vmem:[%s4953_s9 + $0x118] sm:$0xff] (!%p4345_p4)  ;;  %3863 = vst [vmem:[%s4953_s9 + $0x100] sm:$0xff] (!%p4345_p4), %v3799_v34 }
 0x393   : > { %v3542_v30 = vadd.f32 %v3541_v11, %v3253_v2  ;;  %v3256_v38 = vadd.f32 %v3255_v17, %v6160_v22  ;;  %v3544_v9 = vpop.f32.mrb[246].mxu1  ;;  %v3257_v3 = vpop.f32.mrb[247].mxu0  ;;  %v3702_v2 = vld [vmem:[%s4953_s9 + $0x30] sm:$0xff] (!%p4345_p4)  ;;  %v3703_v11 = vld [vmem:[%s4953_s9 + $0x38] sm:$0xff] (!%p4345_p4)  ;;  %v3704_v17 = vld [vmem:[%s4953_s9 + $0x40] sm:$0xff] (!%p4345_p4)  ;;  %3834 = vst [vmem:[%s4953_s9 + $0x18] sm:$0xff] (!%p4345_p4), %v3770_v4  ;;  %v3802_v40 = vadd.f32 (!%p4345_p4), %v5818_v58, %v3731_v23 }
 0x394   : > { %v3546_v18 = vpop.f32.mrb[247].mxu1  ;;  %v3774_v24 = vadd.f32 (!%p4345_p4), %v5818_v58, %v3703_v11  ;;  %v3706_v22 = vld [vmem:[%s4953_s9 + $0x50] sm:$0xff] (!%p4345_p4)  ;;  %3835 = vst [vmem:[%s4953_s9 + $0x20] sm:$0xff] (!%p4345_p4), %v3771_v50  ;;  %3836 = vst [vmem:[%s4953_s9 + $0x28] sm:$0xff] (!%p4345_p4), %v3772_v44  ;;  %v3732_v4 = vld [vmem:[%s4953_s9 + $0x120] sm:$0xff] (!%p4345_p4) }
 0x395   : > { %v3622_v35 = vadd.f32 %v3542_v30, %v350_v39  ;;  %v3545_v51 = vadd.f32 %v3544_v9, %v3256_v38  ;;  %v3773_v39 = vadd.f32 (!%p4345_p4), %v5818_v58, %v3702_v2  ;;  %v3705_v30 = vld [vmem:[%s4953_s9 + $0x48] sm:$0xff] (!%p4345_p4)  ;;  %v3775_v38 = vadd.f32 (!%p4345_p4), %v5818_v58, %v3704_v17  ;;  %v3708_v18 = vld [vmem:[%s4953_s9 + $0x60] sm:$0xff] (!%p4345_p4)  ;;  %v3734_v44 = vld [vmem:[%s4953_s9 + $0x130] sm:$0xff] (!%p4345_p4)  ;;  %3864 = vst [vmem:[%s4953_s9 + $0x108] sm:$0xff] (!%p4345_p4), %v3800_v59 }
 0x396   : > { %v3776_v9 = vadd.f32 (!%p4345_p4), %v5818_v58, %v3705_v30  ;;  %v3777_v3 = vadd.f32 (!%p4345_p4), %v5818_v58, %v3706_v22  ;;  %3838 = vst [vmem:[%s4953_s9 + $0x38] sm:$0xff] (!%p4345_p4), %v3774_v24  ;;  %v3733_v50 = vld [vmem:[%s4953_s9 + $0x128] sm:$0xff] (!%p4345_p4)  ;;  %v3803_v2 = vadd.f32 (!%p4345_p4), %v5818_v58, %v3732_v4  ;;  %v3736_v24 = vld [vmem:[%s4953_s9 + $0x140] sm:$0xff] (!%p4345_p4)  ;;  %3865 = vst [vmem:[%s4953_s9 + $0x110] sm:$0xff] (!%p4345_p4), %v3801_v8 }
 0x397   : > { %3686 = vst [vmem:[%s4953_s9 + $0x1d0] sm:$0xff] %v3622_v35  ;;  %v3623_v53 = vadd.f32 %v3545_v51, %v351_v36  ;;  %v3707_v36 = vld [vmem:[%s4953_s9 + $0x58] sm:$0xff] (!%p4345_p4)  ;;  %v3709_v35 = vld [vmem:[%s4953_s9 + $0x68] sm:$0xff] (!%p4345_p4)  ;;  %3837 = vst [vmem:[%s4953_s9 + $0x30] sm:$0xff] (!%p4345_p4), %v3773_v39  ;;  %v3804_v11 = vadd.f32 (!%p4345_p4), %v5818_v58, %v3733_v50  ;;  %v3805_v17 = vadd.f32 (!%p4345_p4), %v5818_v58, %v3734_v44 }
 0x398   : > { %v3260_v16 = vpop.f32.mrb[248].mxu0  ;;  %v3778_v51 = vadd.f32 (!%p4345_p4), %v5818_v58, %v3707_v36  ;;  %3839 = vst [vmem:[%s4953_s9 + $0x40] sm:$0xff] (!%p4345_p4), %v3775_v38  ;;  %3840 = vst [vmem:[%s4953_s9 + $0x48] sm:$0xff] (!%p4345_p4), %v3776_v9  ;;  %v3735_v39 = vld [vmem:[%s4953_s9 + $0x138] sm:$0xff] (!%p4345_p4)  ;;  %v3807_v22 = vadd.f32 (!%p4345_p4), %v5818_v58, %v3736_v24  ;;  %v3737_v38 = vld [vmem:[%s4953_s9 + $0x148] sm:$0xff] (!%p4345_p4) }
 0x399   : > { %3687 = vst [vmem:[%s4953_s9 + $0x1d8] sm:$0xff] %v3623_v53  ;;  %v3261_v19 = vadd.f32 %v3260_v16, %v6161_v20  ;;  %v3549_v13 = vpop.f32.mrb[248].mxu1  ;;  %v3262_v0 = vpop.f32.mrb[249].mxu0  ;;  %v3779_v53 = vadd.f32 (!%p4345_p4), %v5818_v58, %v3708_v18  ;;  %v3780_v16 = vadd.f32 (!%p4345_p4), %v5818_v58, %v3709_v35  ;;  %v3710_v20 = vld [vmem:[%s4953_s9 + $0x70] sm:$0xff] (!%p4345_p4)  ;;  %3841 = vst [vmem:[%s4953_s9 + $0x50] sm:$0xff] (!%p4345_p4), %v3777_v3  ;;  %v3739_v3 = vld [vmem:[%s4953_s9 + $0x158] sm:$0xff] (!%p4345_p4) }
 0x39a   : > { %v3551_v15 = vpop.f32.mrb[249].mxu1  ;;  %v3263_v28 = vpop.f32.mrb[250].mxu0  ;;  %v3781_v0 = vadd.f32 (!%p4345_p4), %v5818_v58, %v3710_v20  ;;  %3842 = vst [vmem:[%s4953_s9 + $0x58] sm:$0xff] (!%p4345_p4), %v3778_v51  ;;  %v3806_v30 = vadd.f32 (!%p4345_p4), %v5818_v58, %v3735_v39  ;;  %v3738_v9 = vld [vmem:[%s4953_s9 + $0x150] sm:$0xff] (!%p4345_p4)  ;;  %3866 = vst [vmem:[%s4953_s9 + $0x118] sm:$0xff] (!%p4345_p4), %v3802_v40  ;;  %v3808_v36 = vadd.f32 (!%p4345_p4), %v5818_v58, %v3737_v38  ;;  %v3740_v51 = vld [vmem:[%s4953_s9 + $0x160] sm:$0xff] (!%p4345_p4) }
 0x39b   : > { %v3550_v41 = vadd.f32 %v3549_v13, %v3261_v19  ;;  %v3264_v1 = vadd.f32 %v3263_v28, %v6162_v27  ;;  %v3552_v52 = vpop.f32.mrb[250].mxu1  ;;  %v3265_v54 = vpop.f32.mrb[251].mxu0  ;;  %v3711_v19 = vld [vmem:[%s4953_s9 + $0x78] sm:$0xff] (!%p4345_p4)  ;;  %v3712_v13 = vld [vmem:[%s4953_s9 + $0x80] sm:$0xff] (!%p4345_p4)  ;;  %v3713_v28 = vld [vmem:[%s4953_s9 + $0x88] sm:$0xff] (!%p4345_p4)  ;;  %3843 = vst [vmem:[%s4953_s9 + $0x60] sm:$0xff] (!%p4345_p4), %v3779_v53  ;;  %v3809_v18 = vadd.f32 (!%p4345_p4), %v5818_v58, %v3738_v9  ;;  %v3810_v35 = vadd.f32 (!%p4345_p4), %v5818_v58, %v3739_v3 }
 0x39c   : > { %v3554_v25 = vpop.f32.mrb[251].mxu1  ;;  %v3783_v15 = vadd.f32 (!%p4345_p4), %v5818_v58, %v3712_v13  ;;  %v3715_v27 = vld [vmem:[%s4953_s9 + $0x98] sm:$0xff] (!%p4345_p4)  ;;  %3844 = vst [vmem:[%s4953_s9 + $0x68] sm:$0xff] (!%p4345_p4), %v3780_v16  ;;  %3845 = vst [vmem:[%s4953_s9 + $0x70] sm:$0xff] (!%p4345_p4), %v3781_v0  ;;  %v3741_v53 = vld [vmem:[%s4953_s9 + $0x168] sm:$0xff] (!%p4345_p4)  ;;  %v3811_v20 = vadd.f32 (!%p4345_p4), %v5818_v58, %v3740_v51 }
 0x39d   : > { %v3624_v37 = vadd.f32 %v3550_v41, %v352_v29  ;;  %v3553_v31 = vadd.f32 %v3552_v52, %v3264_v1  ;;  %v3782_v29 = vadd.f32 (!%p4345_p4), %v5818_v58, %v3711_v19  ;;  %v3714_v41 = vld [vmem:[%s4953_s9 + $0x90] sm:$0xff] (!%p4345_p4)  ;;  %v3784_v1 = vadd.f32 (!%p4345_p4), %v5818_v58, %v3713_v28  ;;  %v3717_v25 = vld [vmem:[%s4953_s9 + $0xa8] sm:$0xff] (!%p4345_p4)  ;;  %3867 = vst [vmem:[%s4953_s9 + $0x120] sm:$0xff] (!%p4345_p4), %v3803_v2  ;;  %v3743_v0 = vld [vmem:[%s4953_s9 + $0x178] sm:$0xff] (!%p4345_p4) }
 0x39e   : > { %v3785_v52 = vadd.f32 (!%p4345_p4), %v5818_v58, %v3714_v41  ;;  %v3786_v54 = vadd.f32 (!%p4345_p4), %v5818_v58, %v3715_v27  ;;  %3847 = vst [vmem:[%s4953_s9 + $0x80] sm:$0xff] (!%p4345_p4), %v3783_v15  ;;  %3868 = vst [vmem:[%s4953_s9 + $0x128] sm:$0xff] (!%p4345_p4), %v3804_v11  ;;  %v3742_v16 = vld [vmem:[%s4953_s9 + $0x170] sm:$0xff] (!%p4345_p4)  ;;  %v3812_v19 = vadd.f32 (!%p4345_p4), %v5818_v58, %v3741_v53  ;;  %v3745_v15 = vld [vmem:[%s4953_s9 + $0x188] sm:$0xff] (!%p4345_p4) }
 0x39f   : > { %3688 = vst [vmem:[%s4953_s9 + $0x1e0] sm:$0xff] %v3624_v37  ;;  %v3625_v21 = vadd.f32 %v3553_v31, %v353_v7  ;;  %v3716_v7 = vld [vmem:[%s4953_s9 + $0xa0] sm:$0xff] (!%p4345_p4)  ;;  %v3718_v37 = vld [vmem:[%s4953_s9 + $0xb0] sm:$0xff] (!%p4345_p4)  ;;  %3846 = vst [vmem:[%s4953_s9 + $0x78] sm:$0xff] (!%p4345_p4), %v3782_v29  ;;  %v3813_v13 = vadd.f32 (!%p4345_p4), %v5818_v58, %v3742_v16  ;;  %v3814_v28 = vadd.f32 (!%p4345_p4), %v5818_v58, %v3743_v0 }
 0x3a0   : > { %v3268_v45 = vpop.f32.mrb[252].mxu0  ;;  %v3787_v31 = vadd.f32 (!%p4345_p4), %v5818_v58, %v3716_v7  ;;  %3848 = vst [vmem:[%s4953_s9 + $0x88] sm:$0xff] (!%p4345_p4), %v3784_v1  ;;  %3849 = vst [vmem:[%s4953_s9 + $0x90] sm:$0xff] (!%p4345_p4), %v3785_v52  ;;  %v3744_v29 = vld [vmem:[%s4953_s9 + $0x180] sm:$0xff] (!%p4345_p4)  ;;  %v3816_v27 = vadd.f32 (!%p4345_p4), %v5818_v58, %v3745_v15  ;;  %v3746_v1 = vld [vmem:[%s4953_s9 + $0x190] sm:$0xff] (!%p4345_p4) }
 0x3a1   : > { %3689 = vst [vmem:[%s4953_s9 + $0x1e8] sm:$0xff] %v3625_v21  ;;  %v3269_v26 = vadd.f32 %v3268_v45, %v6163_v5  ;;  %v3557_v61 = vpop.f32.mrb[252].mxu1  ;;  %v3270_v12 = vpop.f32.mrb[253].mxu0  ;;  %v3788_v21 = vadd.f32 (!%p4345_p4), %v5818_v58, %v3717_v25  ;;  %v3789_v45 = vadd.f32 (!%p4345_p4), %v5818_v58, %v3718_v37  ;;  %v3719_v5 = vld [vmem:[%s4953_s9 + $0xb8] sm:$0xff] (!%p4345_p4)  ;;  %3850 = vst [vmem:[%s4953_s9 + $0x98] sm:$0xff] (!%p4345_p4), %v3786_v54  ;;  %v3748_v54 = vld [vmem:[%s4953_s9 + $0x1a0] sm:$0xff] (!%p4345_p4) }
 0x3a2   : > { %v3559_v47 = vpop.f32.mrb[253].mxu1  ;;  %v3271_v57 = vpop.f32.mrb[254].mxu0  ;;  %v3790_v12 = vadd.f32 (!%p4345_p4), %v5818_v58, %v3719_v5  ;;  %3851 = vst [vmem:[%s4953_s9 + $0xa0] sm:$0xff] (!%p4345_p4), %v3787_v31  ;;  %3869 = vst [vmem:[%s4953_s9 + $0x130] sm:$0xff] (!%p4345_p4), %v3805_v17  ;;  %v3815_v41 = vadd.f32 (!%p4345_p4), %v5818_v58, %v3744_v29  ;;  %v3747_v52 = vld [vmem:[%s4953_s9 + $0x198] sm:$0xff] (!%p4345_p4)  ;;  %v3817_v7 = vadd.f32 (!%p4345_p4), %v5818_v58, %v3746_v1  ;;  %v3749_v31 = vld [vmem:[%s4953_s9 + $0x1a8] sm:$0xff] (!%p4345_p4) }
 0x3a3   : > { %v3558_v43 = vadd.f32 %v3557_v61, %v3269_v26  ;;  %v3272_v33 = vadd.f32 %v3271_v57, %v6164_v42  ;;  %v3560_v6 = vpop.f32.mrb[254].mxu1  ;;  %v3273_v46 = vpop.f32.mrb[255].mxu0  ;;  %3695 = sbr.rel (%p4345_p4) target bundleno = 952 (0x3b8), region = 48  ;;  %v3720_v26 = vld [vmem:[%s4953_s9 + $0xc0] sm:$0xff] (!%p4345_p4)  ;;  %v3721_v61 = vld [vmem:[%s4953_s9 + $0xc8] sm:$0xff] (!%p4345_p4)  ;;  %v3722_v57 = vld [vmem:[%s4953_s9 + $0xd0] sm:$0xff] (!%p4345_p4)  ;;  %v3818_v25 = vadd.f32 (!%p4345_p4), %v5818_v58, %v3747_v52  ;;  %v3819_v37 = vadd.f32 (!%p4345_p4), %v5818_v58, %v3748_v54 }
 0x3a4   : > { %v3562_v60 = vpop.f32.mrb[255].mxu1  ;;  %v3792_v47 = vadd.f32 (!%p4345_p4), %v5818_v58, %v3721_v61  ;;  %v3724_v42 = vld [vmem:[%s4953_s9 + $0xe0] sm:$0xff] (!%p4345_p4)  ;;  %3852 = vst [vmem:[%s4953_s9 + $0xa8] sm:$0xff] (!%p4345_p4), %v3788_v21  ;;  %3853 = vst [vmem:[%s4953_s9 + $0xb0] sm:$0xff] (!%p4345_p4), %v3789_v45  ;;  %v3750_v21 = vld [vmem:[%s4953_s9 + $0x1b0] sm:$0xff] (!%p4345_p4)  ;;  %v3820_v5 = vadd.f32 (!%p4345_p4), %v5818_v58, %v3749_v31 }
 0x3a5   : > { %v3626_v49 = vadd.f32 %v3558_v43, %v354_v48  ;;  %v3561_v14 = vadd.f32 %v3560_v6, %v3272_v33  ;;  %v3791_v48 = vadd.f32 (!%p4345_p4), %v5818_v58, %v3720_v26  ;;  %v3723_v43 = vld [vmem:[%s4953_s9 + $0xd8] sm:$0xff] (!%p4345_p4)  ;;  %v3793_v33 = vadd.f32 (!%p4345_p4), %v5818_v58, %v3722_v57  ;;  %v3726_v60 = vld [vmem:[%s4953_s9 + $0xf0] sm:$0xff] (!%p4345_p4)  ;;  %3854 = vst [vmem:[%s4953_s9 + $0xb8] sm:$0xff] (!%p4345_p4), %v3790_v12  ;;  %v3752_v12 = vld [vmem:[%s4953_s9 + $0x1c0] sm:$0xff] (!%p4345_p4) }
 0x3a6   : > { %v3794_v6 = vadd.f32 (!%p4345_p4), %v5818_v58, %v3723_v43  ;;  %v3795_v46 = vadd.f32 (!%p4345_p4), %v5818_v58, %v3724_v42  ;;  %3856 = vst [vmem:[%s4953_s9 + $0xc8] sm:$0xff] (!%p4345_p4), %v3792_v47  ;;  %3870 = vst [vmem:[%s4953_s9 + $0x138] sm:$0xff] (!%p4345_p4), %v3806_v30  ;;  %v3751_v45 = vld [vmem:[%s4953_s9 + $0x1b8] sm:$0xff] (!%p4345_p4)  ;;  %v3821_v26 = vadd.f32 (!%p4345_p4), %v5818_v58, %v3750_v21  ;;  %v3754_v47 = vld [vmem:[%s4953_s9 + $0x1d0] sm:$0xff] (!%p4345_p4) }
 0x3a7   : > { %3690 = vst [vmem:[%s4953_s9 + $0x1f0] sm:$0xff] %v3626_v49  ;;  %v3627_v62 = vadd.f32 %v3561_v14, %v355_v55  ;;  %v3725_v55 = vld [vmem:[%s4953_s9 + $0xe8] sm:$0xff] (!%p4345_p4)  ;;  %v3727_v49 = vld [vmem:[%s4953_s9 + $0xf8] sm:$0xff] (!%p4345_p4)  ;;  %3855 = vst [vmem:[%s4953_s9 + $0xc0] sm:$0xff] (!%p4345_p4), %v3791_v48  ;;  %v3822_v61 = vadd.f32 (!%p4345_p4), %v5818_v58, %v3751_v45  ;;  %v3823_v57 = vadd.f32 (!%p4345_p4), %v5818_v58, %v3752_v12 }
 0x3a8   : > { %v3796_v14 = vadd.f32 (!%p4345_p4), %v5818_v58, %v3725_v55  ;;  %v3798_v32 = vadd.f32 (!%p4345_p4), %v5818_v58, %v3727_v49  ;;  %3857 = vst [vmem:[%s4953_s9 + $0xd0] sm:$0xff] (!%p4345_p4), %v3793_v33  ;;  %3858 = vst [vmem:[%s4953_s9 + $0xd8] sm:$0xff] (!%p4345_p4), %v3794_v6  ;;  %v3753_v48 = vld [vmem:[%s4953_s9 + $0x1c8] sm:$0xff] (!%p4345_p4)  ;;  %v3825_v42 = vadd.f32 (!%p4345_p4), %v5818_v58, %v3754_v47  ;;  %v3755_v33 = vld [vmem:[%s4953_s9 + $0x1d8] sm:$0xff] (!%p4345_p4) }
 0x3a9   : > { %3691 = vst [vmem:[%s4953_s9 + $0x1f8] sm:$0xff] %v3627_v62  ;;  %v3797_v62 = vadd.f32 (!%p4345_p4), %v5818_v58, %v3726_v60  ;;  %3859 = vst [vmem:[%s4953_s9 + $0xe0] sm:$0xff] (!%p4345_p4), %v3795_v46  ;;  %v3824_v43 = vadd.f32 (!%p4345_p4), %v5818_v58, %v3753_v48  ;;  %v3756_v6 = vld [vmem:[%s4953_s9 + $0x1e0] sm:$0xff] (!%p4345_p4)  ;;  %v3757_v46 = vld [vmem:[%s4953_s9 + $0x1e8] sm:$0xff] (!%p4345_p4)  ;;  %v3826_v55 = vadd.f32 (!%p4345_p4), %v5818_v58, %v3755_v33 }
 0x3aa   : > { %3860 = vst [vmem:[%s4953_s9 + $0xe8] sm:$0xff] %v3796_v14  ;;  %3862 = vst [vmem:[%s4953_s9 + $0xf8] sm:$0xff] %v3798_v32  ;;  %v3827_v60 = vadd.f32 %v5818_v58, %v3756_v6  ;;  %v3828_v49 = vadd.f32 %v5818_v58, %v3757_v46 }
 0x3ab   : > { %3861 = vst [vmem:[%s4953_s9 + $0xf0] sm:$0xff] %v3797_v62  ;;  %3871 = vst [vmem:[%s4953_s9 + $0x140] sm:$0xff] %v3807_v22 }
 0x3ac   : > { %3872 = vst [vmem:[%s4953_s9 + $0x148] sm:$0xff] %v3808_v36  ;;  %3873 = vst [vmem:[%s4953_s9 + $0x150] sm:$0xff] %v3809_v18 }
 0x3ad   : > { %3874 = vst [vmem:[%s4953_s9 + $0x158] sm:$0xff] %v3810_v35  ;;  %3875 = vst [vmem:[%s4953_s9 + $0x160] sm:$0xff] %v3811_v20 }
 0x3ae   : > { %3876 = vst [vmem:[%s4953_s9 + $0x168] sm:$0xff] %v3812_v19  ;;  %3877 = vst [vmem:[%s4953_s9 + $0x170] sm:$0xff] %v3813_v13  ;;  %v3758_v14 = vld [vmem:[%s4953_s9 + $0x1f0] sm:$0xff] }
 0x3af   : > { %3878 = vst [vmem:[%s4953_s9 + $0x178] sm:$0xff] %v3814_v28  ;;  %3879 = vst [vmem:[%s4953_s9 + $0x180] sm:$0xff] %v3815_v41  ;;  %v3829_v32 = vadd.f32 %v5818_v58, %v3758_v14 }
 0x3b0   : > { %3880 = vst [vmem:[%s4953_s9 + $0x188] sm:$0xff] %v3816_v27  ;;  %3881 = vst [vmem:[%s4953_s9 + $0x190] sm:$0xff] %v3817_v7  ;;  %v3759_v62 = vld [vmem:[%s4953_s9 + $0x1f8] sm:$0xff] }
 0x3b1   : > { %3882 = vst [vmem:[%s4953_s9 + $0x198] sm:$0xff] %v3818_v25  ;;  %3883 = vst [vmem:[%s4953_s9 + $0x1a0] sm:$0xff] %v3819_v37  ;;  %v3830_v10 = vadd.f32 %v5818_v58, %v3759_v62 }
 0x3b2   : > { %3884 = vst [vmem:[%s4953_s9 + $0x1a8] sm:$0xff] %v3820_v5  ;;  %3885 = vst [vmem:[%s4953_s9 + $0x1b0] sm:$0xff] %v3821_v26 }
 0x3b3   : > { %3886 = vst [vmem:[%s4953_s9 + $0x1b8] sm:$0xff] %v3822_v61  ;;  %3887 = vst [vmem:[%s4953_s9 + $0x1c0] sm:$0xff] %v3823_v57 }
 0x3b4   : > { %3888 = vst [vmem:[%s4953_s9 + $0x1c8] sm:$0xff] %v3824_v43  ;;  %3889 = vst [vmem:[%s4953_s9 + $0x1d0] sm:$0xff] %v3825_v42 }
 0x3b5   : > { %3890 = vst [vmem:[%s4953_s9 + $0x1d8] sm:$0xff] %v3826_v55  ;;  %3891 = vst [vmem:[%s4953_s9 + $0x1e0] sm:$0xff] %v3827_v60 }
 0x3b6   : > { %3892 = vst [vmem:[%s4953_s9 + $0x1e8] sm:$0xff] %v3828_v49  ;;  %3893 = vst [vmem:[%s4953_s9 + $0x1f0] sm:$0xff] %v3829_v32 }
 0x3b7   : > { %3894 = vst [vmem:[%s4953_s9 + $0x1f8] sm:$0xff] %v3830_v10 }
 0x3b8 PF: > { %s4353_s18 = sshll.u32 %s4710_s19, 13  ;;  %s3909_s12 = sshll.u32 %s4953_s9, 4  ;;  %s6018_s12 = int_to_ptr.vmem [resolvable:$true] %s3909_s12 }
 0x3b9   : > { %s6015_s2 = scalar_lea.hbm %s6086_s3, %s4353_s18  ;;  %s6022_s27 = scalar_lea.sflag [#allocation4], %s216_s20 }
 0x3ba   : > { %s4596_s4 = scalar_lea.vmem %s6018_s12, 8192  ;;  %p6165_p12 = scmp.ne.s32.totalorder %s6104_s30, 0 }
 0x3bb   : > { %p4597_p2 = scmp.ne.s32.totalorder %s6018_s12, %s4596_s4  ;;  %s4731_s19 = smov [#allocation7]  }
 0x3bc   : > { %s4600_s25 = sshll.u32 %s4731_s19, 4  ;;  %s4601_s25 = int_to_ptr.vmem [resolvable:$false] %s4600_s25 }
 0x3bd   : > { %p4598_p3 = pnand %p4597_p2, %p6165_p12  ;;  %s4602_s24 = scalar_lea.vmem %s4601_s25, 16384 }
 0x3be   : > { %p4603_p10 = scmp.lt.s32.totalorder %s6018_s12, %s4601_s25  ;;  %p4604_p0 = scmp.lt.s32.totalorder %s4602_s24, %s4596_s4 }
 0x3bf   : > { %p4599_p6 = pneg %p4598_p3 }
 0x3c0   : > { %p4605_p8 = por %p4604_p0, %p4603_p10 }
 0x3c2   : > { %p4606_p11 = pnand %p4605_p8, %p4599_p6 }
 0x3c4   : > { %4609 = shalt.err (!%p4606_p11)
}
 0x3c5   : > { %s4610_s20 = scalar_lea.hbm %s6015_s2, 8192  ;;  %s4614_s26 = scalar_lea.hbm %s6086_s3, 32768 }
 0x3c6   : > { %p4611_p13 = scmp.ne.s32.totalorder %s6015_s2, %s4610_s20  ;;  %p4615_p1 = scmp.lt.u32.totalorder %s6015_s2, %s6086_s3 }
 0x3c7   : > { %p4616_p5 = scmp.lt.u32.totalorder %s4614_s26, %s4610_s20  ;;  %p4618_p2 = scmp.lt.u32.totalorder %s4610_s20, %s6015_s2 }
 0x3c8   : > { %p4612_p7 = pnand %p4611_p13, %p6165_p12 }
 0x3c9   : > { %p4617_p4 = por %p4616_p5, %p4615_p1 }
 0x3ca   : > { %p4613_p9 = pneg %p4612_p7 }
 0x3cb   : > { %p4619_p3 = por %p4618_p2, %p4617_p4 }
 0x3cd   : > { %p4620_p6 = pnand %p4619_p3, %p4613_p9 }
 0x3cf   : > { %4623 = shalt.err (!%p4620_p6)
}
 0x3d0   : > { %s4732_s7 = smov 128   ;;  %s4733_s23 = smov 8  }
 0x3d1   : > { %4360 = dma.vmem_to_hbm [thread:$0]  (%p6165_p12), %s6018_s12, 8192, %s6015_s2, %s6022_s27, %s4732_s7, %s4732_s7, %s4733_s23  }
 0x3d2 PF: > { %s6166_s6 = sld [smem:[#allocation11_spill]]  ;;  %s6167_s18 = sld [smem:[#allocation13_spill]] }
 0x3d3   : > { %p4377_p10 = scmp.ge.s32.totalorder %s4722_s22, 2 }
 0x3d8   : > { %s3924_s28 = sand.u32 1, %s6166_s6   ;;  %p6168_p0 = scmp.ne.s32.totalorder %s6167_s18, 0 }
 0x3d9   : > { %s3925_s8 = scalar_lea.sflag [#allocation4], %s3924_s28 }
 0x3da   : > { %p4371_p8 = pnand %p4377_p10, %p6168_p0 }
 0x3dc   : > { %4677 = dma.done.wait (!%p4371_p8), %s3925_s8, 8192  }
 0x3dd   : > { %4679 = vsyncadd (!%p4371_p8), %s3925_s8, 4294959104  ;;  %s20_s22 = sadd.s32 1, %s4722_s22   ;;  %s6169_s18 = sld [smem:[#allocation12_spill]] }
 0x3de   : > { %p17_p11 = scmp.ge.s32.totalorder %s20_s22, 10   ;;  %s6170_s20 = sld [smem:[#allocation14_spill]] }
 0x3df   : > { %s6171_s30 = sld [smem:[#allocation15_spill]]  ;;  %s6172_s12 = smov %s4686_s13 }
 0x3e0   : > { %s6173_s13 = smov %s4690_s14  ;;  %s6174_s14 = smov %s4902_s11 }
 0x3e1   : > { %s6175_s15 = smov %s4698_s16  ;;  %s6176_s16 = smov %s4702_s17 }
 0x3e2   : > { %s6177_s17 = smov %s4907_s10  ;;  %s6178_s19 = smov %s4718_s21 }
 0x3e3   :  { %19 = sbr.rel (!%p17_p11) target bundleno = 12 (0xc), region = 90 }
 0x3e5   : > { %s6179_s21 = smov %s6171_s30 }
 0x3ea   :  { %3930 = vsyncpa [#allocation3], 1 }
 0x3eb   :  { %3932 = vsyncpa [#allocation3 + $0x1], 1 }
 0x3ec   :  { %3933 = vsyncpa [#allocation6], 1 }
 0x3ed   :  { %3934 = vsyncpa [#allocation4], 1 }
 0x3ee   :  { %3936 = vsyncpa [#allocation4 + $0x1], 1 }

</bundles_post_ra>
